<compile_context>
chip_gen: v6e
topology: v6e:2x2x1
jax: 0.10.0
libtpu: 0.0.40
codegen_flags: <defaults>
</compile_context>

<pallas_src>
import jax
import jax.numpy as jnp
from jax.experimental import pallas as pl
from jax.experimental.pallas import tpu as pltpu


# ------------------------------ fused kernel --------------------------------

def cgan_disc_kernel(ys_ref, wy_ref, by_ref, wemb_ref, vmask_ref,
                     patches_ref, wimg_ref, bc_ref, whr_ref, bh_ref, out_ref):
    # ---- y_encoder: (1, Y) @ (Y, E) + (1, E) ----
    y_emb = (jnp.dot(ys_ref[0], wy_ref[...], preferred_element_type=jnp.float32)
             + by_ref[...])                                            # (1, E)

    # ---- conv over the image channels: im2col matmul on the MXU ----
    conv = jnp.dot(patches_ref[...], wimg_ref[...],
                   preferred_element_type=jnp.float32) + bc_ref[...]   # (HW, F)

    # ---- label-embedding channels folded into an exact per-pixel bias ----
    # b_all[0, t*F + f] = sum_e y_emb[e] * w_conv[f, C+e, tap t]
    b_all = jnp.dot(y_emb, wemb_ref[...],
                    preferred_element_type=jnp.float32)                # (1, 9*F)
    f_dim = bc_ref.shape[-1]
    n_taps = wemb_ref.shape[-1] // f_dim
    for t in range(n_taps):
        # (HW,1) * (1,F) broadcast on the VPU; vmask zeroes taps that fall in the
        # zero-padding ring so border pixels are bit-exact vs. the reference conv.
        conv = conv + vmask_ref[:, t:t + 1] * b_all[:, t * f_dim:(t + 1) * f_dim]

    # ---- LeakyReLU(0.2) ----
    act = jnp.where(conv > 0, conv, 0.2 * conv)                        # (HW, F)

    # ---- global average pool (sublane reduce) + linear head (lane reduce) ----
    hw = patches_ref.shape[0]
    pooled = jnp.sum(act, axis=0, keepdims=True) * (1.0 / hw)          # (1, F)
    logit = jnp.sum(pooled * whr_ref[...], axis=1, keepdims=True) + bh_ref[...]
    out_ref[0] = logit                                                 # (1, 1)


# -------------------------------- wrapper ------------------------------------

def cgan_discriminator_forward(imgs, ys, params):
    """imgs: (N, C, H, W) float32 NCHW;  ys: (N, Y) float32  ->  (N, 1) logits."""
    N, C, H, W = imgs.shape
    HW = H * W
    Y = ys.shape[1]
    wy, by = params["wy"], params["by"]
    E = wy.shape[1]
    w_conv = params["w_conv"]                              # (F, C+E, 3, 3) OIHW
    F = w_conv.shape[0]
    bc, wh, bh = params["bc"], params["wh"], params["bh"]

    # --- im2col of the IMAGE channels only (K = C*9, zero-padded to mult of 8) ---
    # TODO(synk): for large H*W, replace this JAX-side im2col with in-kernel
    # shifted matmuls on a VMEM-resident padded tile to avoid the 9x expansion.
    K = C * 9
    Kpad = ((K + 7) // 8) * 8
    xp = jnp.pad(imgs, ((0, 0), (0, 0), (1, 1), (1, 1)))
    taps = [xp[:, :, dy:dy + H, dx:dx + W] for dy in range(3) for dx in range(3)]
    patches = jnp.stack(taps, axis=2)                                  # (N, C, 9, H, W)
    patches = patches.transpose(0, 3, 4, 1, 2).reshape(N, HW, K)       # k = c*9 + dy*3 + dx
    patches = jnp.pad(patches, ((0, 0), (0, 0), (0, Kpad - K)))
    patches = patches.reshape(N * HW, Kpad)                            # flat rows, 8-aligned K

    # --- one-time parameter repacking (pure reshuffles of the conv weight) ---
    w_img = w_conv[:, :C].reshape(F, K).T                              # (K, F)
    w_img = jnp.pad(w_img, ((0, Kpad - K), (0, 0)))                    # (Kpad, F)
    w_emb = jnp.transpose(w_conv[:, C:], (1, 2, 3, 0)).reshape(E, 9 * F)  # col = t*F + f
    wh_row = wh.T                                                      # (1, F)

    # --- tap-validity mask: exact zero-padding handling of the embedding fold ---
    ii = jnp.arange(H)[:, None]
    jj = jnp.arange(W)[None, :]
    cols = []
    for dy in range(3):
        for dx in range(3):
            vi = (ii + dy - 1 >= 0) & (ii + dy - 1 < H)
            vj = (jj + dx - 1 >= 0) & (jj + dx - 1 < W)
            cols.append((vi & vj).astype(jnp.float32).reshape(HW))
    v_mask = jnp.stack(cols, axis=1)                                   # (HW, 9)

    ys3 = ys.reshape(N, 1, Y)

    cost = pl.CostEstimate(
        flops=2 * N * HW * Kpad * F + 2 * N * HW * 9 * F + 2 * N * Y * E,
        transcendentals=0,
        bytes_accessed=4 * (patches.size + w_img.size + w_emb.size + v_mask.size
                            + ys.size + wy.size + 2 * F + N),
    )

    out = pl.pallas_call(
        cgan_disc_kernel,
        out_shape=jax.ShapeDtypeStruct((N, 1, 1), jnp.float32),
        grid=(N,),
        in_specs=[
            pl.BlockSpec((1, 1, Y), lambda n: (n, 0, 0)),      # ys (per sample)
            pl.BlockSpec((Y, E), lambda n: (0, 0)),            # wy
            pl.BlockSpec((1, E), lambda n: (0, 0)),            # by
            pl.BlockSpec((E, 9 * F), lambda n: (0, 0)),        # emb-channel conv weights
            pl.BlockSpec((HW, 9), lambda n: (0, 0)),           # tap-validity mask
            pl.BlockSpec((HW, Kpad), lambda n: (n, 0)),        # im2col patches (rows of sample n)
            pl.BlockSpec((Kpad, F), lambda n: (0, 0)),         # image-channel conv weights
            pl.BlockSpec((1, F), lambda n: (0, 0)),            # conv bias
            pl.BlockSpec((1, F), lambda n: (0, 0)),            # head weight (row)
            pl.BlockSpec((1, 1), lambda n: (0, 0)),            # head bias
        ],
        out_specs=pl.BlockSpec((1, 1, 1), lambda n: (n, 0, 0)),
        compiler_params=pltpu.CompilerParams(dimension_semantics=("parallel",)),
        cost_estimate=cost,
    )(ys3, wy, by, w_emb, v_mask, patches, w_img, bc, wh_row, bh)

    return out.reshape(N, 1)


# ---------------------------- pure-JAX reference -----------------------------

def reference_forward(imgs, ys, params):
    N, C, H, W = imgs.shape
    y_embs = ys @ params["wy"] + params["by"]
    y_maps = jnp.broadcast_to(y_embs[:, :, None, None], (N, y_embs.shape[1], H, W))
    x = jnp.concatenate([imgs, y_maps], axis=1)
    f = jax.lax.conv_general_dilated(
        x, params["w_conv"], window_strides=(1, 1), padding="SAME",
        dimension_numbers=("NCHW", "OIHW", "NCHW"))
    f = f + params["bc"].reshape(1, -1, 1, 1)
    f = jnp.where(f > 0, f, 0.2 * f)
    pooled = f.mean(axis=(2, 3))
    return pooled @ params["wh"] + params["bh"]


# --------------------------------- main ---------------------------------------

if __name__ == "__main__":
    N, C, H, W = 2, 4, 16, 16
    Y_DIM, EMB, F = 10, 8, 32

    key = jax.random.PRNGKey(0)
    k_img, k_y, k_wy, k_wc, k_wh = jax.random.split(key, 5)

    imgs = jax.random.normal(k_img, (N, C, H, W), dtype=jnp.float32)
    ys = jax.random.normal(k_y, (N, Y_DIM), dtype=jnp.float32)

    # Deterministic parameter init (nn.init.normal_(w, 0, 0.02); bias = 0)
    params = {
        "wy": 0.02 * jax.random.normal(k_wy, (Y_DIM, EMB), dtype=jnp.float32),
        "by": jnp.zeros((1, EMB), dtype=jnp.float32),
        "w_conv": 0.02 * jax.random.normal(k_wc, (F, C + EMB, 3, 3), dtype=jnp.float32),
        "bc": jnp.zeros((1, F), dtype=jnp.float32),
        "wh": 0.02 * jax.random.normal(k_wh, (F, 1), dtype=jnp.float32),
        "bh": jnp.zeros((1, 1), dtype=jnp.float32),
    }

    out = jax.block_until_ready(cgan_discriminator_forward(imgs, ys, params))
    ref = jax.block_until_ready(reference_forward(imgs, ys, params))

    assert out.shape == (N, 1)
    assert jnp.allclose(out, ref, rtol=1e-4, atol=1e-5), (out, ref)

    print("KERNEL_OK")
</pallas_src>

<mosaic_0001>
module attributes {stable_mosaic.version = 11 : i64} {
  func.func @cgan_disc_kernel(%arg0: i32, %arg1: memref<1x1x10xf32, #tpu.memory_space<vmem>>, %arg2: memref<10x8xf32, #tpu.memory_space<vmem>>, %arg3: memref<1x8xf32, #tpu.memory_space<vmem>>, %arg4: memref<8x288xf32, #tpu.memory_space<vmem>>, %arg5: memref<256x9xf32, #tpu.memory_space<vmem>>, %arg6: memref<256x40xf32, #tpu.memory_space<vmem>>, %arg7: memref<40x32xf32, #tpu.memory_space<vmem>>, %arg8: memref<1x32xf32, #tpu.memory_space<vmem>>, %arg9: memref<1x32xf32, #tpu.memory_space<vmem>>, %arg10: memref<1x1xf32, #tpu.memory_space<vmem>>, %arg11: memref<1x1x1xf32, #tpu.memory_space<vmem>>) attributes {dimension_semantics = [#tpu.dimension_semantics<parallel>], iteration_bounds = array<i64: 2>, scalar_prefetch = 0 : i64, scratch_operands = 0 : i64, tpu.core_type = #tpu.core_type<tc>, window_params = [{transform_indices = @transform_0, window_bounds = array<i64: 1, 1, 10>}, {pipeline_mode = #tpu.pipeline_mode<synchronous>, transform_indices = @transform_1, window_bounds = array<i64: 10, 8>}, {pipeline_mode = #tpu.pipeline_mode<synchronous>, transform_indices = @transform_2, window_bounds = array<i64: 1, 8>}, {pipeline_mode = #tpu.pipeline_mode<synchronous>, transform_indices = @transform_3, window_bounds = array<i64: 8, 288>}, {pipeline_mode = #tpu.pipeline_mode<synchronous>, transform_indices = @transform_4, window_bounds = array<i64: 256, 9>}, {transform_indices = @transform_5, window_bounds = array<i64: 256, 40>}, {pipeline_mode = #tpu.pipeline_mode<synchronous>, transform_indices = @transform_6, window_bounds = array<i64: 40, 32>}, {pipeline_mode = #tpu.pipeline_mode<synchronous>, transform_indices = @transform_7, window_bounds = array<i64: 1, 32>}, {pipeline_mode = #tpu.pipeline_mode<synchronous>, transform_indices = @transform_8, window_bounds = array<i64: 1, 32>}, {pipeline_mode = #tpu.pipeline_mode<synchronous>, transform_indices = @transform_9, window_bounds = array<i64: 1, 1>}, {transform_indices = @transform_10, window_bounds = array<i64: 1, 1, 1>}]} {
    %c0 = arith.constant 0 : index
    %c0_0 = arith.constant 0 : index
    %c0_1 = arith.constant 0 : index
    %0 = vector.load %arg1[%c0, %c0_0, %c0_1] : memref<1x1x10xf32, #tpu.memory_space<vmem>>, vector<1x1x10xf32>
    %1 = vector.shape_cast %0 : vector<1x1x10xf32> to vector<1x10xf32>
    %c0_2 = arith.constant 0 : index
    %c0_3 = arith.constant 0 : index
    %2 = vector.load %arg2[%c0_2, %c0_3] : memref<10x8xf32, #tpu.memory_space<vmem>>, vector<10x8xf32>
    %cst = arith.constant dense<0.000000e+00> : vector<1x8xf32>
    %3 = tpu.matmul %1, %2, %cst {dimension_numbers = #tpu.dot_dimension_numbers<[1], [0], [0], [1], [0, 0, 1, 1], [], []>} : vector<1x10xf32>, vector<10x8xf32>, vector<1x8xf32> -> vector<1x8xf32>
    %c0_4 = arith.constant 0 : index
    %c0_5 = arith.constant 0 : index
    %4 = vector.load %arg3[%c0_4, %c0_5] : memref<1x8xf32, #tpu.memory_space<vmem>>, vector<1x8xf32>
    %5 = arith.addf %3, %4 : vector<1x8xf32>
    %c0_6 = arith.constant 0 : index
    %c0_7 = arith.constant 0 : index
    %6 = vector.load %arg6[%c0_6, %c0_7] : memref<256x40xf32, #tpu.memory_space<vmem>>, vector<256x40xf32>
    %c0_8 = arith.constant 0 : index
    %c0_9 = arith.constant 0 : index
    %7 = vector.load %arg7[%c0_8, %c0_9] : memref<40x32xf32, #tpu.memory_space<vmem>>, vector<40x32xf32>
    %cst_10 = arith.constant dense<0.000000e+00> : vector<256x32xf32>
    %8 = tpu.matmul %6, %7, %cst_10 {dimension_numbers = #tpu.dot_dimension_numbers<[1], [0], [0], [1], [0, 0, 1, 1], [], []>} : vector<256x40xf32>, vector<40x32xf32>, vector<256x32xf32> -> vector<256x32xf32>
    %c0_11 = arith.constant 0 : index
    %c0_12 = arith.constant 0 : index
    %9 = vector.load %arg8[%c0_11, %c0_12] : memref<1x32xf32, #tpu.memory_space<vmem>>, vector<1x32xf32>
    %10 = vector.broadcast %9 : vector<1x32xf32> to vector<256x32xf32>
    %11 = arith.addf %8, %10 : vector<256x32xf32>
    %c0_13 = arith.constant 0 : index
    %c0_14 = arith.constant 0 : index
    %12 = vector.load %arg4[%c0_13, %c0_14] : memref<8x288xf32, #tpu.memory_space<vmem>>, vector<8x288xf32>
    %cst_15 = arith.constant dense<0.000000e+00> : vector<1x288xf32>
    %13 = tpu.matmul %5, %12, %cst_15 {dimension_numbers = #tpu.dot_dimension_numbers<[1], [0], [0], [1], [0, 0, 1, 1], [], []>} : vector<1x8xf32>, vector<8x288xf32>, vector<1x288xf32> -> vector<1x288xf32>
    %c0_16 = arith.constant 0 : index
    %c0_17 = arith.constant 0 : index
    %14 = vector.load %arg5[%c0_16, %c0_17] : memref<256x9xf32, #tpu.memory_space<vmem>>, vector<256x1xf32>
    %15 = vector.extract_strided_slice %13 {offsets = [0, 0], sizes = [1, 32], strides = [1, 1]} : vector<1x288xf32> to vector<1x32xf32>
    %16 = vector.broadcast %14 : vector<256x1xf32> to vector<256x32xf32>
    %17 = vector.broadcast %15 : vector<1x32xf32> to vector<256x32xf32>
    %18 = arith.mulf %16, %17 : vector<256x32xf32>
    %19 = arith.addf %11, %18 : vector<256x32xf32>
    %c0_18 = arith.constant 0 : index
    %c1 = arith.constant 1 : index
    %20 = vector.load %arg5[%c0_18, %c1] : memref<256x9xf32, #tpu.memory_space<vmem>>, vector<256x1xf32>
    %21 = vector.extract_strided_slice %13 {offsets = [0, 32], sizes = [1, 32], strides = [1, 1]} : vector<1x288xf32> to vector<1x32xf32>
    %22 = vector.broadcast %20 : vector<256x1xf32> to vector<256x32xf32>
    %23 = vector.broadcast %21 : vector<1x32xf32> to vector<256x32xf32>
    %24 = arith.mulf %22, %23 : vector<256x32xf32>
    %25 = arith.addf %19, %24 : vector<256x32xf32>
    %c0_19 = arith.constant 0 : index
    %c2 = arith.constant 2 : index
    %26 = vector.load %arg5[%c0_19, %c2] : memref<256x9xf32, #tpu.memory_space<vmem>>, vector<256x1xf32>
    %27 = vector.extract_strided_slice %13 {offsets = [0, 64], sizes = [1, 32], strides = [1, 1]} : vector<1x288xf32> to vector<1x32xf32>
    %28 = vector.broadcast %26 : vector<256x1xf32> to vector<256x32xf32>
    %29 = vector.broadcast %27 : vector<1x32xf32> to vector<256x32xf32>
    %30 = arith.mulf %28, %29 : vector<256x32xf32>
    %31 = arith.addf %25, %30 : vector<256x32xf32>
    %c0_20 = arith.constant 0 : index
    %c3 = arith.constant 3 : index
    %32 = vector.load %arg5[%c0_20, %c3] : memref<256x9xf32, #tpu.memory_space<vmem>>, vector<256x1xf32>
    %33 = vector.extract_strided_slice %13 {offsets = [0, 96], sizes = [1, 32], strides = [1, 1]} : vector<1x288xf32> to vector<1x32xf32>
    %34 = vector.broadcast %32 : vector<256x1xf32> to vector<256x32xf32>
    %35 = vector.broadcast %33 : vector<1x32xf32> to vector<256x32xf32>
    %36 = arith.mulf %34, %35 : vector<256x32xf32>
    %37 = arith.addf %31, %36 : vector<256x32xf32>
    %c0_21 = arith.constant 0 : index
    %c4 = arith.constant 4 : index
    %38 = vector.load %arg5[%c0_21, %c4] : memref<256x9xf32, #tpu.memory_space<vmem>>, vector<256x1xf32>
    %39 = vector.extract_strided_slice %13 {offsets = [0, 128], sizes = [1, 32], strides = [1, 1]} : vector<1x288xf32> to vector<1x32xf32>
    %40 = vector.broadcast %38 : vector<256x1xf32> to vector<256x32xf32>
    %41 = vector.broadcast %39 : vector<1x32xf32> to vector<256x32xf32>
    %42 = arith.mulf %40, %41 : vector<256x32xf32>
    %43 = arith.addf %37, %42 : vector<256x32xf32>
    %c0_22 = arith.constant 0 : index
    %c5 = arith.constant 5 : index
    %44 = vector.load %arg5[%c0_22, %c5] : memref<256x9xf32, #tpu.memory_space<vmem>>, vector<256x1xf32>
    %45 = vector.extract_strided_slice %13 {offsets = [0, 160], sizes = [1, 32], strides = [1, 1]} : vector<1x288xf32> to vector<1x32xf32>
    %46 = vector.broadcast %44 : vector<256x1xf32> to vector<256x32xf32>
    %47 = vector.broadcast %45 : vector<1x32xf32> to vector<256x32xf32>
    %48 = arith.mulf %46, %47 : vector<256x32xf32>
    %49 = arith.addf %43, %48 : vector<256x32xf32>
    %c0_23 = arith.constant 0 : index
    %c6 = arith.constant 6 : index
    %50 = vector.load %arg5[%c0_23, %c6] : memref<256x9xf32, #tpu.memory_space<vmem>>, vector<256x1xf32>
    %51 = vector.extract_strided_slice %13 {offsets = [0, 192], sizes = [1, 32], strides = [1, 1]} : vector<1x288xf32> to vector<1x32xf32>
    %52 = vector.broadcast %50 : vector<256x1xf32> to vector<256x32xf32>
    %53 = vector.broadcast %51 : vector<1x32xf32> to vector<256x32xf32>
    %54 = arith.mulf %52, %53 : vector<256x32xf32>
    %55 = arith.addf %49, %54 : vector<256x32xf32>
    %c0_24 = arith.constant 0 : index
    %c7 = arith.constant 7 : index
    %56 = vector.load %arg5[%c0_24, %c7] : memref<256x9xf32, #tpu.memory_space<vmem>>, vector<256x1xf32>
    %57 = vector.extract_strided_slice %13 {offsets = [0, 224], sizes = [1, 32], strides = [1, 1]} : vector<1x288xf32> to vector<1x32xf32>
    %58 = vector.broadcast %56 : vector<256x1xf32> to vector<256x32xf32>
    %59 = vector.broadcast %57 : vector<1x32xf32> to vector<256x32xf32>
    %60 = arith.mulf %58, %59 : vector<256x32xf32>
    %61 = arith.addf %55, %60 : vector<256x32xf32>
    %c0_25 = arith.constant 0 : index
    %c8 = arith.constant 8 : index
    %62 = vector.load %arg5[%c0_25, %c8] : memref<256x9xf32, #tpu.memory_space<vmem>>, vector<256x1xf32>
    %63 = vector.extract_strided_slice %13 {offsets = [0, 256], sizes = [1, 32], strides = [1, 1]} : vector<1x288xf32> to vector<1x32xf32>
    %64 = vector.broadcast %62 : vector<256x1xf32> to vector<256x32xf32>
    %65 = vector.broadcast %63 : vector<1x32xf32> to vector<256x32xf32>
    %66 = arith.mulf %64, %65 : vector<256x32xf32>
    %67 = arith.addf %61, %66 : vector<256x32xf32>
    %cst_26 = arith.constant 0.000000e+00 : f32
    %68 = vector.broadcast %cst_26 : f32 to vector<256x32xf32>
    %69 = arith.cmpf ogt, %67, %68 : vector<256x32xf32>
    %cst_27 = arith.constant 2.000000e-01 : f32
    %70 = vector.broadcast %cst_27 : f32 to vector<256x32xf32>
    %71 = arith.mulf %70, %67 : vector<256x32xf32>
    %72 = arith.select %69, %67, %71 : vector<256x32xi1>, vector<256x32xf32>
    %cst_28 = arith.constant dense<0.000000e+00> : vector<32xf32>
    %73 = vector.multi_reduction <add>, %72, %cst_28 [0] : vector<256x32xf32> to vector<32xf32>
    %74 = vector.shape_cast %73 : vector<32xf32> to vector<1x32xf32>
    %cst_29 = arith.constant 3.906250e-03 : f32
    %75 = vector.broadcast %cst_29 : f32 to vector<1x32xf32>
    %76 = arith.mulf %74, %75 : vector<1x32xf32>
    %c0_30 = arith.constant 0 : index
    %c0_31 = arith.constant 0 : index
    %77 = vector.load %arg9[%c0_30, %c0_31] : memref<1x32xf32, #tpu.memory_space<vmem>>, vector<1x32xf32>
    %78 = arith.mulf %76, %77 : vector<1x32xf32>
    %cst_32 = arith.constant dense<0.000000e+00> : vector<1xf32>
    %79 = vector.multi_reduction <add>, %78, %cst_32 [1] : vector<1x32xf32> to vector<1xf32>
    %80 = vector.shape_cast %79 : vector<1xf32> to vector<1x1xf32>
    %c0_33 = arith.constant 0 : index
    %c0_34 = arith.constant 0 : index
    %81 = vector.load %arg10[%c0_33, %c0_34] : memref<1x1xf32, #tpu.memory_space<vmem>>, vector<1x1xf32>
    %82 = arith.addf %80, %81 : vector<1x1xf32>
    %c0_35 = arith.constant 0 : index
    %c0_36 = arith.constant 0 : index
    %c0_37 = arith.constant 0 : index
    %83 = vector.load %arg11[%c0_35, %c0_36, %c0_37] : memref<1x1x1xf32, #tpu.memory_space<vmem>>, vector<1x1x1xf32>
    %84 = vector.shape_cast %83 : vector<1x1x1xf32> to vector<1x1xf32>
    %85 = vector.shape_cast %82 : vector<1x1xf32> to vector<1x1x1xf32>
    tpu.vector_store %arg11[%c0_35, %c0_36, %c0_37], %85 {strides = array<i32>} : memref<1x1x1xf32, #tpu.memory_space<vmem>>, vector<1x1x1xf32>,
    return
  }
  func.func @transform_0(%arg0: i32) -> (i32, i32, i32) {
    %c0_i32 = arith.constant 0 : i32
    %c0_i32_0 = arith.constant 0 : i32
    %c0_i32_1 = arith.constant 0 : i32
    return %arg0, %c0_i32, %c0_i32_0 : i32, i32, i32
  }
  func.func @transform_1(%arg0: i32) -> (i32, i32) {
    %c0_i32 = arith.constant 0 : i32
    %c0_i32_0 = arith.constant 0 : i32
    %c0_i32_1 = arith.constant 0 : i32
    return %c0_i32, %c0_i32_0 : i32, i32
  }
  func.func @transform_2(%arg0: i32) -> (i32, i32) {
    %c0_i32 = arith.constant 0 : i32
    %c0_i32_0 = arith.constant 0 : i32
    %c0_i32_1 = arith.constant 0 : i32
    return %c0_i32, %c0_i32_0 : i32, i32
  }
  func.func @transform_3(%arg0: i32) -> (i32, i32) {
    %c0_i32 = arith.constant 0 : i32
    %c0_i32_0 = arith.constant 0 : i32
    %c0_i32_1 = arith.constant 0 : i32
    return %c0_i32, %c0_i32_0 : i32, i32
  }
  func.func @transform_4(%arg0: i32) -> (i32, i32) {
    %c0_i32 = arith.constant 0 : i32
    %c0_i32_0 = arith.constant 0 : i32
    %c0_i32_1 = arith.constant 0 : i32
    return %c0_i32, %c0_i32_0 : i32, i32
  }
  func.func @transform_5(%arg0: i32) -> (i32, i32) {
    %c0_i32 = arith.constant 0 : i32
    %c0_i32_0 = arith.constant 0 : i32
    return %arg0, %c0_i32 : i32, i32
  }
  func.func @transform_6(%arg0: i32) -> (i32, i32) {
    %c0_i32 = arith.constant 0 : i32
    %c0_i32_0 = arith.constant 0 : i32
    %c0_i32_1 = arith.constant 0 : i32
    return %c0_i32, %c0_i32_0 : i32, i32
  }
  func.func @transform_7(%arg0: i32) -> (i32, i32) {
    %c0_i32 = arith.constant 0 : i32
    %c0_i32_0 = arith.constant 0 : i32
    %c0_i32_1 = arith.constant 0 : i32
    return %c0_i32, %c0_i32_0 : i32, i32
  }
  func.func @transform_8(%arg0: i32) -> (i32, i32) {
    %c0_i32 = arith.constant 0 : i32
    %c0_i32_0 = arith.constant 0 : i32
    %c0_i32_1 = arith.constant 0 : i32
    return %c0_i32, %c0_i32_0 : i32, i32
  }
  func.func @transform_9(%arg0: i32) -> (i32, i32) {
    %c0_i32 = arith.constant 0 : i32
    %c0_i32_0 = arith.constant 0 : i32
    %c0_i32_1 = arith.constant 0 : i32
    return %c0_i32, %c0_i32_0 : i32, i32
  }
  func.func @transform_10(%arg0: i32) -> (i32, i32, i32) {
    %c0_i32 = arith.constant 0 : i32
    %c0_i32_0 = arith.constant 0 : i32
    %c0_i32_1 = arith.constant 0 : i32
    return %arg0, %c0_i32, %c0_i32_0 : i32, i32, i32
  }
}

</mosaic_0001>

<bundles_post_ra>
// kernel: tpu_custom_call.1
= control target key start
LH: loop header
LB: loop body
LE: loop exit
PB: predicated region body
PF: predicated region fallthrough
CT: control target
= control target key end

     0   :  { %s4124_s15 = smov 0   ;;  %s6697_s0 = inlined_call_operand.vmem [shape: f32[2,1,10], index: 0, kind: input, shape index: {}]   ;;  %s6698_s1 = inlined_call_operand.vmem [shape: f32[10,8], index: 1, kind: input, shape index: {}]   ;;  %s6699_s2 = inlined_call_operand.vmem [shape: f32[1,8], index: 2, kind: input, shape index: {}]   ;;  %s6700_s3 = inlined_call_operand.vmem [shape: f32[8,288], index: 3, kind: input, shape index: {}]   ;;  %s6701_s4 = inlined_call_operand.vmem [shape: f32[256,9], index: 4, kind: input, shape index: {}]   ;;  %s6702_s5 = inlined_call_operand.vmem [shape: f32[512,40], index: 5, kind: input, shape index: {}]   ;;  %s6703_s6 = inlined_call_operand.vmem [shape: f32[40,32], index: 6, kind: input, shape index: {}]   ;;  %s6704_s7 = inlined_call_operand.vmem [shape: f32[1,32], index: 7, kind: input, shape index: {}]   ;;  %s6705_s8 = inlined_call_operand.vmem [shape: f32[1,32], index: 8, kind: input, shape index: {}]   ;;  %s6706_s9 = inlined_call_operand.<no memory space> [shape: f32[1,1], index: 9, kind: input, shape index: {}]   ;;  %s6707_s10 = inlined_call_operand.vmem [shape: f32[2,1,1], index: 10, kind: output, shape index: {}]  }
   0x1   :  { %v15_v0 = vstv %s6706_s9 }
   0x2   :  { %16 = vst [vmem:[#allocation2] sm:$0x1] %v15_v0 }
   0x3 LB: > { %s4130_s16 = sadd.s32 4294967295, %s4050_s15   ;;  %p3779_p0 = scmp.ge.s32.totalorder %s4050_s15, 1  ;;  %s4050_s15 = sphi %s4124_s15, %s22_s15  }
   0x4   : > { %p323_p1 = scmp.lt.s32.totalorder %s4050_s15, 3 }
   0x6   : > { %p324_p2 = pnand %p3779_p0, %p323_p1 }
   0x8   : > { %327 = sbr.rel (%p324_p2) target bundleno = 1589 (0x635), region = 60 }
   0xd   : > { %v376_v1 = vld [vmem:[%s6698_s1 + $0x8] sm:$0x3]  ;;  %vm382_vm0 = vcmask 1041408   ;;  %v4052_v2 = vmov 0.0   ;;  %v375_v3 = vld [vmem:[%s6698_s1] sm:$0xff]  ;;  %vm4053_vm1 = vmmov 0  }
   0xe   : > { %3863 = vmatprep.subr.mxu0 %v4052_v2  ;;  %3867 = vmatprep.mubr.msk.f32.mxu0 %vm4053_vm1, %v4052_v2  ;;  %p362_p3 = scmp.lt.s32.totalorder %s4130_s16, 1  ;;  %v4147_v4 = vld [vmem:[%s6701_s4 + $0x10] sm:$0xff]  ;;  %v4054_v5 = vmov 0   ;;  %v4152_v6 = vld [vmem:[%s6701_s4] sm:$0xff]  ;;  %vm378_vm2 = vcmask 80896   ;;  %v4162_v7 = vld [vmem:[%s6701_s4 + $0x18] sm:$0xff] }
   0xf   : > { %3864 = vmatpush3.msk.msra.mxu0 %vm382_vm0, %v376_v1  ;;  %3966 = vset.pattern.permute.xlu1 %v4054_v5  ;;  %v4172_v9 = vld [vmem:[%s6701_s4 + $0x8] sm:$0xff]  ;;  %v4184_v11 = vld [vmem:[%s6701_s4 + $0x20] sm:$0xff]  ;;  %v4190_v12 = vld [vmem:[%s6701_s4 + $0x38] sm:$0xff]  ;;  %s3780_s23 = sshll.u32 %s4130_s16, 5  ;;  %vm500_vm3 = vcmask 326656   ;;  %vm825_vm4 = vcmask 64512  }
  0x10   : > { %3865 = vmatprep.subr.mxu0 %v4052_v2  ;;  %s4156_s24 = scalar_select %p362_p3, %s4130_s16, 1  ;;  %1014 = vperm.xlu1 %3966, %v4147_v4   ;;  %v4178_v10 = vld [vmem:[%s6701_s4 + $0x28] sm:$0xff]  ;;  %v4196_v13 = vld [vmem:[%s6701_s4 + $0x30] sm:$0xff]  ;;  %v492_v15 = vld [vmem:[%s6703_s6 + $0x20] sm:$0xff]  ;;  %vm3638_vm6 = vcmask 261120  }
  0x11   : > { %3866 = vmatpush3.msra.mxu0 %v375_v3  ;;  %3965 = vset.pattern.permute.xlu0 %v4054_v5  ;;  %v4202_v14 = vld [vmem:[%s6701_s4 + $0x48] sm:$0xff]  ;;  %v491_v16 = vld [vmem:[%s6703_s6 + $0x18] sm:$0xff]  ;;  %v4214_v17 = vld [vmem:[%s6701_s4 + $0x40] sm:$0xff]  ;;  %p366_p4 = scmp.lt.s32.totalorder %s3780_s23, 63  ;;  %s4058_s9 = smov 96  }
  0x12   : > { %s364_s29 = scalar_lea.vmem %s6697_s0, %s4156_s24  ;;  %1004 = vperm.xlu0 %3965, %v4152_v6   ;;  %3933 = vmatprep.subr.mxu1 %v492_v15  ;;  %v4220_v18 = vld [vmem:[%s6701_s4 + $0x58] sm:$0xff]  ;;  %v490_v19 = vld [vmem:[%s6703_s6 + $0x10] sm:$0xff]  ;;  %v489_v20 = vld [vmem:[%s6703_s6 + $0x8] sm:$0xff]  ;;  %s4059_s21 = smov 64  }
  0x13   : > { %v374_v8 = vld [vmem:[%s364_s29] sm:$0x1]  ;;  %3870 = vmatprep.subr.mxu0 %v492_v15  ;;  %3938 = vmatpush3.msra.mxu1 %v492_v15  ;;  %v4232_v21 = vld [vmem:[%s6701_s4 + $0x50] sm:$0xff]  ;;  %v4238_v22 = vld [vmem:[%s6701_s4 + $0x68] sm:$0xff]  ;;  %s7183_s23 = smov (!%p366_p4, %s3780_s23), 63  ;;  %s4061_s22 = smov 32  }
  0x14   : > { %3868 = vmatmul.mubr.msk.f32.vlgmr.msra.gmra.mxu0 %vm378_vm2, %v374_v8  ;;  %1019 = vperm.xlu1 %3966, %v4162_v7   ;;  %v488_v23 = vld [vmem:[%s6703_s6] sm:$0xff]  ;;  %v4254_v25 = vld [vmem:[%s6701_s4 + $0x78] sm:$0xff]  ;;  %v4260_v26 = vld [vmem:[%s6701_s4 + $0x70] sm:$0xff]  ;;  %s3781_s30 = sshll.u32 %s7183_s23, 3  ;;  %s373_s16 = scalar_lea.vmem %s6707_s10, %s4156_s24 }
  0x15   : > { %3934 = vmatprep.subr.mxu1 %v491_v16  ;;  %3871 = vmatpush3.msra.mxu0 %v492_v15  ;;  %v4248_v24 = vld [vmem:[%s6701_s4 + $0x60] sm:$0xff]  ;;  %v4266_v27 = vld [vmem:[%s6701_s4 + $0x88] sm:$0xff]  ;;  %s4271_s17 = scalar_lea.vmem %s6702_s5, %s3781_s30  ;;  %v4291_v34 = vld [vmem:[%s6701_s4 + $0x98] sm:$0xff] }
  0x16   : > { %1009 = vperm.xlu0 %3965, %v4172_v9   ;;  %3939 = vmatpush3.msra.mxu1 %v491_v16  ;;  %v468_v28 = vld [vmem:[%s4271_s17 + $0x60] sm:$0xff]  ;;  %v469_v29 = vld [vmem:[%s4271_s17 + $0x68] sm:$0xff]  ;;  %v470_v30 = vld [vmem:[%s4271_s17 + $0x70] sm:$0xff] }
  0x17   : > { %3935 = vmatprep.subr.mxu1 %v490_v19  ;;  %3872 = vmatprep.subr.mxu0 %v491_v16  ;;  %v4281_v31 = vld [vmem:[%s6701_s4 + $0x80] sm:$0xff]  ;;  %v471_v33 = vld [vmem:[%s4271_s17 + $0x78] sm:$0xff]  ;;  %v457_v36 = vld [vmem:[%s4271_s17 + $0x8] sm:$0xff] }
  0x18   : > { %1029 = vperm.xlu1 %3966, %v4178_v10   ;;  %3940 = vmatpush3.msra.mxu1 %v490_v19  ;;  %v456_v32 = vld [vmem:[%s4271_s17] sm:$0xff]  ;;  %v823_v37 = vld [vmem:[%s6700_s3 + $0x8] sm:$0xff]  ;;  %v4303_v38 = vld [vmem:[%s6701_s4 + $0x90] sm:$0xff] }
  0x19   : > { %3936 = vmatprep.subr.mxu1 %v489_v20  ;;  %3873 = vmatpush3.msra.mxu0 %v491_v16  ;;  %v472_v35 = vld [vmem:[%s4271_s17 + $0x80] sm:$0xff]  ;;  %v458_v40 = vld [vmem:[%s4271_s17 + $0x10] sm:$0xff]  ;;  %v473_v41 = vld [vmem:[%s4271_s17 + $0x88] sm:$0xff] }
  0x1a   : > { %1024 = vperm.xlu0 %3965, %v4184_v11   ;;  %3941 = vmatpush3.msra.mxu1 %v489_v20  ;;  %v822_v39 = vld [vmem:[%s6700_s3] sm:$0xff]  ;;  %v4317_v42 = vld [vmem:[%s6701_s4 + $0xa8] sm:$0xff]  ;;  %v474_v43 = vld [vmem:[%s4271_s17 + $0x90] sm:$0xff] }
  0x1b   : > { %3937 = vmatprep.subr.mxu1 %v488_v23  ;;  %3874 = vmatprep.subr.mxu0 %v490_v19  ;;  %v459_v44 = vld [vmem:[%s4271_s17 + $0x18] sm:$0xff]  ;;  %v4326_v45 = vld [vmem:[%s6701_s4 + $0xa0] sm:$0xff]  ;;  %v461_v50 = vld [vmem:[%s4271_s17 + $0x28] sm:$0xff] }
  0x1c   : > { %1039 = vperm.xlu1 %3966, %v4190_v12   ;;  %3942 = vmatpush3.msra.mxu1 %v488_v23  ;;  %v460_v46 = vld [vmem:[%s4271_s17 + $0x20] sm:$0xff]  ;;  %v475_v47 = vld [vmem:[%s4271_s17 + $0x98] sm:$0xff]  ;;  %v4347_v51 = vld [vmem:[%s6701_s4 + $0xb0] sm:$0xff] }
  0x1d   : > { %3875 = vmatpush3.msra.mxu0 %v490_v19  ;;  %3898 = vmatprep.mubr.msk.f32.mxu1 %vm500_vm3, %v468_v28  ;;  %v4337_v48 = vld [vmem:[%s6701_s4 + $0xb8] sm:$0xff]  ;;  %v476_v49 = vld [vmem:[%s4271_s17 + $0xa0] sm:$0xff]  ;;  %v462_v52 = vld [vmem:[%s4271_s17 + $0x30] sm:$0xff] }
  0x1e   : > { %1034 = vperm.xlu0 %3965, %v4196_v13   ;;  %3876 = vmatprep.subr.mxu0 %v489_v20  ;;  %v477_v53 = vld [vmem:[%s4271_s17 + $0xa8] sm:$0xff]  ;;  %v478_v55 = vld [vmem:[%s4271_s17 + $0xb0] sm:$0xff]  ;;  %v463_v56 = vld [vmem:[%s4271_s17 + $0x38] sm:$0xff] }
  0x1f   : > { %3877 = vmatpush3.msra.mxu0 %v489_v20  ;;  %3899 = vmatmul.mubr.msk.f32.vlgmr.msra.gmra.mxu1 %vm500_vm3, %v469_v29  ;;  %v4358_v54 = vld [vmem:[%s6701_s4 + $0xc8] sm:$0xff]  ;;  %v4367_v57 = vld [vmem:[%s6701_s4 + $0xc0] sm:$0xff]  ;;  %v479_v59 = vld [vmem:[%s4271_s17 + $0xb8] sm:$0xff]  ;;  %v4055_v29 = vmov 1  }
  0x20   : > { %1049 = vperm.xlu1 %3966, %v4202_v14   ;;  %3878 = vmatprep.subr.mxu0 %v488_v23  ;;  %v464_v58 = vld [vmem:[%s4271_s17 + $0x40] sm:$0xff]  ;;  %v4378_v60 = vld [vmem:[%s6701_s4 + $0xd8] sm:$0xff]  ;;  %v465_v62 = vld [vmem:[%s4271_s17 + $0x48] sm:$0xff] }
  0x21   : > { %3879 = vmatpush3.msra.mxu0 %v488_v23  ;;  %3901 = vmatprep.mubr.msk.f32.mxu1 %vm500_vm3, %v470_v30  ;;  %v480_v61 = vld [vmem:[%s4271_s17 + $0xc0] sm:$0xff]  ;;  %v4387_v63 = vld [vmem:[%s6701_s4 + $0xd0] sm:$0xff]  ;;  %v481_v1 = vld [vmem:[%s4271_s17 + $0xc8] sm:$0xff] }
  0x22   : > { %1044 = vperm.xlu0 %3965, %v4214_v17   ;;  %3880 = vmatprep.mubr.msk.f32.mxu0 %vm500_vm3, %v456_v32  ;;  %v466_v0 = vld [vmem:[%s4271_s17 + $0x50] sm:$0xff]  ;;  %v4398_v3 = vld [vmem:[%s6701_s4 + $0xe8] sm:$0xff]  ;;  %v467_v8 = vld [vmem:[%s4271_s17 + $0x58] sm:$0xff] }
  0x23   : > { %3902 = vmatmul.mubr.msk.f32.gmra.mxu1 %vm500_vm3, %v471_v33  ;;  %3881 = vmatmul.mubr.msk.f32.vlgmr.msra.gmra.mxu0 %vm500_vm3, %v457_v36  ;;  %v482_v5 = vld [vmem:[%s4271_s17 + $0xd0] sm:$0xff]  ;;  %v4407_v15 = vld [vmem:[%s6701_s4 + $0xe0] sm:$0xff]  ;;  %v483_v16 = vld [vmem:[%s4271_s17 + $0xd8] sm:$0xff]  ;;  %v4056_v33 = vmov 2  }
  0x24   : > { %1059 = vperm.xlu1 %3966, %v4220_v18   ;;  %3904 = vmatprep.mubr.msk.f32.mxu1 %vm500_vm3, %v472_v35  ;;  %v4417_v19 = vld [vmem:[%s6701_s4 + $0xf8] sm:$0xff]  ;;  %v484_v20 = vld [vmem:[%s4271_s17 + $0xe0] sm:$0xff]  ;;  %v4425_v23 = vld [vmem:[%s6701_s4 + $0xf0] sm:$0xff] }
  0x25   : > { %859 = vmatprep.subr.mxu0 %v823_v37  ;;  %3883 = vmatprep.mubr.msk.f32.mxu0 %vm500_vm3, %v458_v40  ;;  %v485_v28 = vld [vmem:[%s4271_s17 + $0xe8] sm:$0xff]  ;;  %v486_v30 = vld [vmem:[%s4271_s17 + $0xf0] sm:$0xff]  ;;  %v487_v32 = vld [vmem:[%s4271_s17 + $0xf8] sm:$0xff] }
  0x26   : > { %1054 = vperm.xlu0 %3965, %v4232_v21   ;;  %860 = vmatpush1.msra.mxu0 %v822_v39 }
  0x27   : > { %3905 = vmatmul.mubr.msk.f32.gmra.mxu1 %vm500_vm3, %v473_v41  ;;  %3884 = vmatmul.mubr.msk.f32.gmra.mxu0 %vm500_vm3, %v459_v44 }
  0x28   : > { %1069 = vperm.xlu1 %3966, %v4238_v22   ;;  %3907 = vmatprep.mubr.msk.f32.mxu1 %vm500_vm3, %v474_v43 }
  0x29   : > { %3886 = vmatprep.mubr.msk.f32.mxu0 %vm500_vm3, %v460_v46  ;;  %3928 = vmatprep.subr.mxu0 %v4052_v2 }
  0x2a   : > { %1064 = vperm.xlu0 %3965, %v4248_v24  }
  0x2b   : > { %3908 = vmatmul.mubr.msk.f32.gmra.mxu1 %vm500_vm3, %v475_v47  ;;  %3887 = vmatmul.mubr.msk.f32.gmra.mxu0 %vm500_vm3, %v461_v50 }
  0x2c   : > { %1079 = vperm.xlu1 %3966, %v4254_v25   ;;  %3910 = vmatprep.mubr.msk.f32.mxu1 %vm500_vm3, %v476_v49 }
  0x2d   : > { %3889 = vmatprep.mubr.msk.f32.mxu0 %vm500_vm3, %v462_v52 }
  0x2e   : > { %1074 = vperm.xlu0 %3965, %v4260_v26  }
  0x2f   : > { %3911 = vmatmul.mubr.msk.f32.gmra.mxu1 %vm500_vm3, %v477_v53  ;;  %3890 = vmatmul.mubr.msk.f32.gmra.mxu0 %vm500_vm3, %v463_v56 }
  0x30   : > { %1089 = vperm.xlu1 %3966, %v4266_v27   ;;  %3913 = vmatprep.mubr.msk.f32.mxu1 %vm500_vm3, %v478_v55 }
  0x31   : > { %3892 = vmatprep.mubr.msk.f32.mxu0 %vm500_vm3, %v464_v58 }
  0x32   : > { %1084 = vperm.xlu0 %3965, %v4281_v31  }
  0x33   : > { %3914 = vmatmul.mubr.msk.f32.gmra.mxu1 %vm500_vm3, %v479_v59  ;;  %3893 = vmatmul.mubr.msk.f32.gmra.mxu0 %vm500_vm3, %v465_v62 }
  0x34   : > { %1099 = vperm.xlu1 %3966, %v4291_v34   ;;  %3916 = vmatprep.mubr.msk.f32.mxu1 %vm500_vm3, %v480_v61 }
  0x35   : > { %3895 = vmatprep.mubr.msk.f32.mxu0 %vm500_vm3, %v466_v0  ;;  %v4057_v0 = vmov 3  }
  0x36   : > { %1094 = vperm.xlu0 %3965, %v4303_v38  }
  0x37   : > { %3917 = vmatmul.mubr.msk.f32.gmra.mxu1 %vm500_vm3, %v481_v1  ;;  %3896 = vmatmul.mubr.msk.f32.gmra.mxu0 %vm500_vm3, %v467_v8  ;;  %v377_v1 = vld [vmem:[%s6699_s2] sm:$0x1] }
  0x38   : > { %1109 = vperm.xlu1 %3966, %v4317_v42   ;;  %3919 = vmatprep.mubr.msk.f32.mxu1 %vm500_vm3, %v482_v5 }
  0x39   : > { %893 = vmatprep.mubr.f32.mxu0 %v4052_v2 }
  0x3a   : > { %1104 = vperm.xlu0 %3965, %v4326_v45  }
  0x3b   : > { %3920 = vmatmul.mubr.msk.f32.gmra.mxu1 %vm500_vm3, %v483_v16 }
  0x3c   : > { %1119 = vperm.xlu1 %3966, %v4337_v48   ;;  %3922 = vmatprep.mubr.msk.f32.mxu1 %vm500_vm3, %v484_v20 }
  0x3e   : > { %1114 = vperm.xlu0 %3965, %v4347_v51  }
  0x3f   : > { %3923 = vmatmul.mubr.msk.f32.gmra.mxu1 %vm500_vm3, %v485_v28  ;;  %v824_v28 = vld [vmem:[%s6700_s3 + $0x10] sm:$0xff] }
  0x40   : > { %1129 = vperm.xlu1 %3966, %v4358_v54   ;;  %3925 = vmatprep.mubr.msk.f32.mxu1 %vm500_vm3, %v486_v30 }
  0x42   : > { %1124 = vperm.xlu0 %3965, %v4367_v57  }
  0x43   : > { %3926 = vmatmul.mubr.msk.f32.gmra.mxu1 %vm500_vm3, %v487_v32 }
  0x44   : > { %1139 = vperm.xlu1 %3966, %v4378_v60  }
  0x46   : > { %1134 = vperm.xlu0 %3965, %v4387_v63  }
  0x48   : > { %1149 = vperm.xlu1 %3966, %v4398_v3  }
  0x4a   : > { %1144 = vperm.xlu0 %3965, %v4407_v15  }
  0x4c   : > { %1159 = vperm.xlu1 %3966, %v4417_v19  }
  0x4e   : > { %1154 = vperm.xlu0 %3965, %v4425_v23  }
  0x50   : > { %3968 = vset.pattern.permute.xlu1 %v4055_v29 }
  0x51   : > { %1235 = vperm.xlu1 %3968, %v4172_v9  }
  0x52   : > { %3967 = vset.pattern.permute.xlu0 %v4055_v29 }
  0x53   : > { %1231 = vperm.xlu0 %3967, %v4152_v6  }
  0x55   : > { %1239 = vperm.xlu1 %3968, %v4147_v4  }
  0x57   : > { %1243 = vperm.xlu0 %3967, %v4162_v7  }
  0x59   : > { %1247 = vperm.xlu1 %3968, %v4184_v11  }
  0x5b   : > { %1251 = vperm.xlu0 %3967, %v4178_v10  }
  0x5d   : > { %1255 = vperm.xlu1 %3968, %v4196_v13  }
  0x5f   : > { %1259 = vperm.xlu0 %3967, %v4190_v12  }
  0x61   : > { %1263 = vperm.xlu1 %3968, %v4214_v17  }
  0x63   : > { %1267 = vperm.xlu0 %3967, %v4202_v14  }
  0x65   : > { %1271 = vperm.xlu1 %3968, %v4232_v21  }
  0x67   : > { %1275 = vperm.xlu0 %3967, %v4220_v18  }
  0x69   : > { %1279 = vperm.xlu1 %3968, %v4248_v24  }
  0x6b   : > { %1283 = vperm.xlu0 %3967, %v4238_v22  }
  0x6d   : > { %1287 = vperm.xlu1 %3968, %v4260_v26  }
  0x6f   : > { %1291 = vperm.xlu0 %3967, %v4254_v25  }
  0x71   : > { %1295 = vperm.xlu1 %3968, %v4281_v31  }
  0x73   : > { %1299 = vperm.xlu0 %3967, %v4266_v27  }
  0x75   : > { %1303 = vperm.xlu1 %3968, %v4303_v38  }
  0x77   : > { %1307 = vperm.xlu0 %3967, %v4291_v34  }
  0x79   : > { %1311 = vperm.xlu1 %3968, %v4326_v45  }
  0x7b   : > { %1315 = vperm.xlu0 %3967, %v4317_v42  }
  0x7d   : > { %1319 = vperm.xlu1 %3968, %v4347_v51  }
  0x7f   : > { %1323 = vperm.xlu0 %3967, %v4337_v48  }
  0x81   : > { %1327 = vperm.xlu1 %3968, %v4367_v57  }
  0x83   : > { %1331 = vperm.xlu0 %3967, %v4358_v54  }
  0x85   : > { %1335 = vperm.xlu1 %3968, %v4387_v63  }
  0x87   : > { %1339 = vperm.xlu0 %3967, %v4378_v60  }
  0x89   : > { %1343 = vperm.xlu1 %3968, %v4407_v15  }
  0x8b   : > { %1347 = vperm.xlu0 %3967, %v4398_v3   ;;  %v4470_v35 = vpop.permute.xlu1 %1014 }
  0x8d   : > { %1351 = vperm.xlu1 %3968, %v4425_v23   ;;  %v4479_v37 = vpop.permute.xlu0 %1004 }
  0x8f   : > { %1355 = vperm.xlu0 %3967, %v4417_v19   ;;  %v4475_v36 = vpop.permute.xlu1 %1019 }
  0x91   : > { %3969 = vset.pattern.permute.xlu1 %v4056_v33  ;;  %v4486_v40 = vpop.permute.xlu0 %1009 }
  0x92   : > { %1551 = vperm.xlu1 %3969, %v4152_v6  }
  0x93   : > { %3970 = vset.pattern.permute.xlu0 %v4056_v33  ;;  %v4482_v39 = vpop.permute.xlu1 %1029 }
  0x94   : > { %1555 = vperm.xlu0 %3970, %v4172_v9  }
  0x95   : > { %v4493_v43 = vpop.permute.xlu0 %1024 }
  0x96   : > { %1559 = vperm.xlu1 %3969, %v4147_v4  }
  0x97   : > { %v4489_v41 = vpop.permute.xlu1 %1039 }
  0x98   : > { %1567 = vperm.xlu0 %3970, %v4184_v11  }
  0x99   : > { %v4500_v46 = vpop.permute.xlu0 %1034 }
  0x9a   : > { %1563 = vperm.xlu1 %3969, %v4162_v7  }
  0x9b   : > { %v4496_v44 = vpop.permute.xlu1 %1049 }
  0x9c   : > { %1575 = vperm.xlu0 %3970, %v4196_v13  }
  0x9d   : > { %v4507_v49 = vpop.permute.xlu0 %1044 }
  0x9e   : > { %1571 = vperm.xlu1 %3969, %v4178_v10  }
  0x9f   : > { %v4503_v47 = vpop.permute.xlu1 %1059 }
  0xa0   : > { %1583 = vperm.xlu0 %3970, %v4214_v17  }
  0xa1   : > { %v4514_v52 = vpop.permute.xlu0 %1054 }
  0xa2   : > { %1579 = vperm.xlu1 %3969, %v4190_v12   ;;  %6709 = vst [vmem:[#allocation4_spill] sm:$0xff] %v4514_v52 }
  0xa3   : > { %v4510_v50 = vpop.permute.xlu1 %1069 }
  0xa4   : > { %1591 = vperm.xlu0 %3970, %v4232_v21   ;;  %6708 = vst [vmem:[#allocation3_spill] sm:$0xff] %v4510_v50 }
  0xa5   : > { %v4521_v55 = vpop.permute.xlu0 %1064 }
  0xa6   : > { %1587 = vperm.xlu1 %3969, %v4202_v14   ;;  %6711 = vst [vmem:[#allocation6_spill] sm:$0xff] %v4521_v55 }
  0xa7   : > { %v4517_v53 = vpop.permute.xlu1 %1079 }
  0xa8   : > { %1599 = vperm.xlu0 %3970, %v4248_v24   ;;  %6710 = vst [vmem:[#allocation5_spill] sm:$0xff] %v4517_v53 }
  0xa9   : > { %v4528_v58 = vpop.permute.xlu0 %1074 }
  0xaa   : > { %1595 = vperm.xlu1 %3969, %v4220_v18   ;;  %6713 = vst [vmem:[#allocation8_spill] sm:$0xff] %v4528_v58 }
  0xab   : > { %v4524_v56 = vpop.permute.xlu1 %1089 }
  0xac   : > { %1607 = vperm.xlu0 %3970, %v4260_v26   ;;  %6712 = vst [vmem:[#allocation7_spill] sm:$0xff] %v4524_v56 }
  0xad   : > { %v4535_v61 = vpop.permute.xlu0 %1084 }
  0xae   : > { %1603 = vperm.xlu1 %3969, %v4238_v22   ;;  %6715 = vst [vmem:[#allocation10_spill] sm:$0xff] %v4535_v61 }
  0xaf   : > { %v4531_v59 = vpop.permute.xlu1 %1099 }
  0xb0   : > { %1615 = vperm.xlu0 %3970, %v4281_v31   ;;  %6714 = vst [vmem:[#allocation9_spill] sm:$0xff] %v4531_v59 }
  0xb1   : > { %v4545_v5 = vpop.permute.xlu0 %1094 }
  0xb2   : > { %1611 = vperm.xlu1 %3969, %v4254_v25   ;;  %6717 = vst [vmem:[#allocation12_spill] sm:$0xff] %v4545_v5 }
  0xb3   : > { %v4538_v62 = vpop.permute.xlu1 %1109 }
  0xb4   : > { %1623 = vperm.xlu0 %3970, %v4303_v38   ;;  %6716 = vst [vmem:[#allocation11_spill] sm:$0xff] %v4538_v62 }
  0xb5   : > { %v4557_v29 = vpop.permute.xlu0 %1104 }
  0xb6   : > { %1619 = vperm.xlu1 %3969, %v4266_v27   ;;  %6719 = vst [vmem:[#allocation14_spill] sm:$0xff] %v4557_v29 }
  0xb7   : > { %v4547_v16 = vpop.permute.xlu1 %1119 }
  0xb8   : > { %1631 = vperm.xlu0 %3970, %v4326_v45   ;;  %6718 = vst [vmem:[#allocation13_spill] sm:$0xff] %v4547_v16 }
  0xba   : > { %1627 = vperm.xlu1 %3969, %v4291_v34  }
  0xbb   : > { %v4559_v30 = vpop.permute.xlu1 %1129 }
  0xbc   : > { %1639 = vperm.xlu0 %3970, %v4347_v51   ;;  %6720 = vst [vmem:[#allocation15_spill] sm:$0xff] %v4559_v30 }
  0xbe   : > { %1635 = vperm.xlu1 %3969, %v4317_v42  }
  0xc0   : > { %1647 = vperm.xlu0 %3970, %v4367_v57  }
  0xc2   : > { %1643 = vperm.xlu1 %3969, %v4337_v48  }
  0xc4   : > { %1655 = vperm.xlu0 %3970, %v4387_v63  }
  0xc6   : > { %1651 = vperm.xlu1 %3969, %v4358_v54  }
  0xc8   : > { %1663 = vperm.xlu0 %3970, %v4407_v15  }
  0xca   : > { %1659 = vperm.xlu1 %3969, %v4378_v60  }
  0xcc   : > { %1671 = vperm.xlu0 %3970, %v4425_v23  }
  0xce   : > { %1667 = vperm.xlu1 %3969, %v4398_v3  }
  0xd0   : > { %3971 = vset.pattern.permute.xlu0 %v4057_v0 }
  0xd1   : > { %1871 = vperm.xlu0 %3971, %v4152_v6  }
  0xd2   : > { %1675 = vperm.xlu1 %3969, %v4417_v19  }
  0xd4   : > { %v452_v8 = vpop.f32.mrf.mxu0 }
  0xd5   : > { %v453_v20 = vadd.f32 %v452_v8, %v377_v1  ;;  %1883 = vperm.xlu0 %3971, %v4162_v7   ;;  %v4564_v7 = vpop.permute.xlu0 %1114 }
  0xd6   : > { %v3869_v6 = vpop.f32.mrf.mxu0  ;;  %3972 = vset.pattern.permute.xlu1 %v4057_v0  ;;  %6721 = vst [vmem:[#allocation16_spill] sm:$0xff] %v4564_v7 }
  0xd7   : > { %3817 = vmatmul.mubr.msk.f32.vlgmr.msra.gmra.mxu0 %vm825_vm4, %v453_v20  ;;  %1875 = vperm.xlu1 %3972, %v4172_v9   ;;  %v4566_v9 = vpop.permute.xlu1 %1139 }
  0xd8   : > { %3929 = vmatpush3.msra.mxu0 %v824_v28  ;;  %3930 = vmatprep.mubr.msk.f32.mxu0 %vm4053_vm1, %v4052_v2  ;;  %6722 = vst [vmem:[#allocation17_spill] sm:$0xff] %v4566_v9 }
  0xd9   : > { %1891 = vperm.xlu0 %3971, %v4178_v10   ;;  %v4571_v2 = vpop.permute.xlu0 %1124 }
  0xda   : > { %6723 = vst [vmem:[#allocation18_spill] sm:$0xff] %v4571_v2 }
  0xdb   : > { %3931 = vmatmul.mubr.msk.f32.vlgmr.msra.gmra.mxu0 %vm825_vm4, %v453_v20  ;;  %1879 = vperm.xlu1 %3972, %v4147_v4   ;;  %v4573_v10 = vpop.permute.xlu1 %1149 }
  0xdc   : > { %6724 = vst [vmem:[#allocation19_spill] sm:$0xff] %v4573_v10 }
  0xdd   : > { %1899 = vperm.xlu0 %3971, %v4190_v12   ;;  %v4578_v4 = vpop.permute.xlu0 %1134 }
  0xde   : > { %6725 = vst [vmem:[#allocation20_spill] sm:$0xff] %v4578_v4 }
  0xdf   : > { %1887 = vperm.xlu1 %3972, %v4184_v11   ;;  %v4580_v11 = vpop.permute.xlu1 %1159 }
  0xe0   : > { %6726 = vst [vmem:[#allocation21_spill] sm:$0xff] %v4580_v11 }
  0xe1   : > { %1907 = vperm.xlu0 %3971, %v4202_v14   ;;  %v4585_v12 = vpop.permute.xlu0 %1144 }
  0xe2   : > { %6727 = vst [vmem:[#allocation22_spill] sm:$0xff] %v4585_v12 }
  0xe3   : > { %1895 = vperm.xlu1 %3972, %v4196_v13   ;;  %v4587_v13 = vpop.permute.xlu1 %1235  ;;  %v4681_v2 = vpop.f32.mrf.mxu0 }
  0xe5   : > { %1915 = vperm.xlu0 %3971, %v4220_v18   ;;  %v4592_v14 = vpop.permute.xlu0 %1154  ;;  %v4687_v62 = vpop.f32.mrf.mxu0 }
  0xe6   : > { %6728 = vst [vmem:[#allocation23_spill] sm:$0xff] %v4592_v14 }
  0xe7   : > { %1903 = vperm.xlu1 %3972, %v4214_v17   ;;  %v4594_v17 = vpop.permute.xlu1 %1239  ;;  %v3885_v5 = vpop.f32.mrf.mxu0 }
  0xe9   : > { %1923 = vperm.xlu0 %3971, %v4238_v22   ;;  %v4599_v18 = vpop.permute.xlu0 %1231  ;;  %v673_v56 = vpop.f32.mrf.mxu0 }
  0xeb   : > { %1911 = vperm.xlu1 %3972, %v4232_v21   ;;  %v4601_v21 = vpop.permute.xlu1 %1247  ;;  %v3888_v58 = vpop.f32.mrf.mxu0 }
  0xed   : > { %1931 = vperm.xlu0 %3971, %v4254_v25   ;;  %v4606_v22 = vpop.permute.xlu0 %1243  ;;  %v683_v52 = vpop.f32.mrf.mxu0 }
  0xef   : > { %1919 = vperm.xlu1 %3972, %v4248_v24   ;;  %v4608_v24 = vpop.permute.xlu1 %1255  ;;  %v3891_v14 = vpop.f32.mrf.mxu0 }
  0xf1   : > { %1939 = vperm.xlu0 %3971, %v4266_v27   ;;  %v4613_v25 = vpop.permute.xlu0 %1251 }
  0xf3   : > { %1927 = vperm.xlu1 %3972, %v4260_v26   ;;  %v4615_v26 = vpop.permute.xlu1 %1263 }
  0xf5   : > { %1947 = vperm.xlu0 %3971, %v4291_v34   ;;  %v4620_v27 = vpop.permute.xlu0 %1259 }
  0xf7   : > { %1935 = vperm.xlu1 %3972, %v4281_v31   ;;  %v4622_v31 = vpop.permute.xlu1 %1271 }
  0xf9   : > { %1955 = vperm.xlu0 %3971, %v4317_v42   ;;  %v4625_v34 = vpop.permute.xlu0 %1267 }
  0xfb   : > { %1943 = vperm.xlu1 %3972, %v4303_v38   ;;  %v4627_v38 = vpop.permute.xlu1 %1279 }
  0xfd   : > { %1963 = vperm.xlu0 %3971, %v4337_v48   ;;  %v4629_v42 = vpop.permute.xlu0 %1275 }
  0xff   : > { %1951 = vperm.xlu1 %3972, %v4326_v45   ;;  %v4631_v45 = vpop.permute.xlu1 %1287 }
 0x101   : > { %1971 = vperm.xlu0 %3971, %v4358_v54   ;;  %v4633_v48 = vpop.permute.xlu0 %1283 }
 0x103   : > { %1959 = vperm.xlu1 %3972, %v4347_v51   ;;  %v4635_v51 = vpop.permute.xlu1 %1295 }
 0x105   : > { %1979 = vperm.xlu0 %3971, %v4378_v60   ;;  %v4637_v54 = vpop.permute.xlu0 %1291 }
 0x107   : > { %1967 = vperm.xlu1 %3972, %v4367_v57   ;;  %v4639_v57 = vpop.permute.xlu1 %1303 }
 0x109   : > { %1987 = vperm.xlu0 %3971, %v4398_v3   ;;  %v4641_v60 = vpop.permute.xlu0 %1299 }
 0x10b   : > { %1975 = vperm.xlu1 %3972, %v4387_v63   ;;  %v4643_v63 = vpop.permute.xlu1 %1311 }
 0x10d   : > { %1995 = vperm.xlu0 %3971, %v4417_v19   ;;  %v4645_v3 = vpop.permute.xlu0 %1307 }
 0x10f   : > { %1983 = vperm.xlu1 %3972, %v4407_v15   ;;  %v4647_v15 = vpop.permute.xlu1 %1319 }
 0x111   : > { %v4649_v19 = vpop.permute.xlu0 %1315 }
 0x113   : > { %1991 = vperm.xlu1 %3972, %v4425_v23   ;;  %v4651_v23 = vpop.permute.xlu1 %1327 }
 0x115   : > { %v4653_v32 = vpop.permute.xlu0 %1323 }
 0x117   : > { %v4655_v33 = vpop.permute.xlu1 %1335 }
 0x119   : > { %v4657_v0 = vpop.permute.xlu0 %1331 }
 0x11b   : > { %v4659_v1 = vpop.permute.xlu1 %1343 }
 0x11c   : > { %6729 = vst [vmem:[#allocation24_spill] sm:$0xff] %v4659_v1 }
 0x11d   : > { %v4661_v8 = vpop.permute.xlu0 %1339 }
 0x11f   : > { %v4663_v20 = vpop.permute.xlu1 %1351 }
 0x120   : > { %6730 = vst [vmem:[#allocation25_spill] sm:$0xff] %v4663_v20 }
 0x121   : > { %v4665_v28 = vpop.permute.xlu0 %1347 }
 0x123   : > { %v4667_v6 = vpop.permute.xlu1 %1551 }
 0x124   : > { %6731 = vst [vmem:[#allocation26_spill] sm:$0xff] %v4667_v6 }
 0x125   : > { %v4669_v11 = vpop.permute.xlu0 %1355 }
 0x126   : > { %6732 = vst [vmem:[#allocation27_spill] sm:$0xff] %v4669_v11 }
 0x127   : > { %v4671_v10 = vpop.permute.xlu1 %1559 }
 0x128   : > { %6733 = vst [vmem:[#allocation28_spill] sm:$0xff] %v4671_v10 }
 0x129   : > { %v4673_v12 = vpop.permute.xlu0 %1555 }
 0x12a   : > { %6734 = vst [vmem:[#allocation29_spill] sm:$0xff] %v4673_v12 }
 0x12b   : > { %v4675_v9 = vpop.permute.xlu1 %1563 }
 0x12c   : > { %6735 = vst [vmem:[#allocation30_spill] sm:$0xff] %v4675_v9  ;;  %v1162_v9 = vlaneseq }
 0x12d   : > { %v4677_v4 = vpop.permute.xlu0 %1567 }
 0x12e   : > { %6736 = vst [vmem:[#allocation31_spill] sm:$0xff] %v4677_v4 }
 0x12f   : > { %v4679_v30 = vpop.permute.xlu1 %1571 }
 0x130   : > { %6737 = vst [vmem:[#allocation32_spill] sm:$0xff] %v4679_v30 }
 0x131   : > { %v4683_v16 = vpop.permute.xlu0 %1575 }
 0x132   : > { %6738 = vst [vmem:[#allocation33_spill] sm:$0xff] %v4683_v16 }
 0x133   : > { %v4685_v7 = vpop.permute.xlu1 %1579 }
 0x134   : > { %6739 = vst [vmem:[#allocation34_spill] sm:$0xff] %v4685_v7 }
 0x135   : > { %v4689_v29 = vpop.permute.xlu0 %1583 }
 0x136   : > { %6740 = vst [vmem:[#allocation35_spill] sm:$0xff] %v4689_v29  ;;  %v693_v29 = vpop.f32.mrf.mxu0 }
 0x137   : > { %v4691_v59 = vpop.permute.xlu1 %1587 }
 0x138   : > { %6741 = vst [vmem:[#allocation36_spill] sm:$0xff] %v4691_v59  ;;  %v4709_v4 = vpop.f32.mrf.mxu0 }
 0x139   : > { %v4693_v61 = vpop.permute.xlu0 %1591 }
 0x13a   : > { %6742 = vst [vmem:[#allocation37_spill] sm:$0xff] %v4693_v61  ;;  %v4711_v61 = vpop.f32.mrf.mxu0 }
 0x13b   : > { %v4695_v53 = vpop.permute.xlu1 %1595 }
 0x13c   : > { %6743 = vst [vmem:[#allocation38_spill] sm:$0xff] %v4695_v53 }
 0x13d   : > { %v4697_v50 = vpop.permute.xlu0 %1599 }
 0x13e   : > { %6744 = vst [vmem:[#allocation39_spill] sm:$0xff] %v4697_v50 }
 0x13f   : > { %v4699_v55 = vpop.permute.xlu1 %1603 }
 0x140   : > { %6745 = vst [vmem:[#allocation40_spill] sm:$0xff] %v4699_v55  ;;  %v4717_v55 = vpop.f32.mrf.mxu0 }
 0x141   : > { %v4701_v7 = vpop.permute.xlu0 %1607 }
 0x142   : > { %6746 = vst [vmem:[#allocation41_spill] sm:$0xff] %v4701_v7 }
 0x143   : > { %v4703_v16 = vpop.permute.xlu1 %1611 }
 0x144   : > { %6747 = vst [vmem:[#allocation42_spill] sm:$0xff] %v4703_v16  ;;  %v4723_v16 = vpop.f32.mrf.mxu0 }
 0x145   : > { %v4705_v30 = vpop.permute.xlu0 %1615  ;;  %6754 = vst [vmem:[#allocation49_spill] sm:$0xff] %v4723_v16 }
 0x146   : > { %6748 = vst [vmem:[#allocation43_spill] sm:$0xff] %v4705_v30  ;;  %v1163_v30 = vshrl.u32 %v1162_v9, 7 }
 0x147   : > { %v4707_v59 = vpop.permute.xlu1 %1619 }
 0x148   : > { %6749 = vst [vmem:[#allocation44_spill] sm:$0xff] %v4707_v59  ;;  %v4729_v20 = vsub.s32 0, %v1163_v30 }
 0x149   : > { %v4713_v53 = vpop.permute.xlu0 %1623 }
 0x14a   : > { %6750 = vst [vmem:[#allocation45_spill] sm:$0xff] %v4713_v53 }
 0x14b   : > { %v4715_v50 = vpop.permute.xlu1 %1627 }
 0x14c   : > { %6751 = vst [vmem:[#allocation46_spill] sm:$0xff] %v4715_v50 }
 0x14d   : > { %v4719_v10 = vpop.permute.xlu0 %1631 }
 0x14e   : > { %6752 = vst [vmem:[#allocation47_spill] sm:$0xff] %v4719_v10 }
 0x14f   : > { %v4721_v7 = vpop.permute.xlu1 %1635 }
 0x150   : > { %6753 = vst [vmem:[#allocation48_spill] sm:$0xff] %v4721_v7 }
 0x151   : > { %v4727_v6 = vpop.permute.xlu0 %1639 }
 0x153   : > { %v4731_v53 = vpop.permute.xlu1 %1643 }
 0x155   : > { %v4738_v10 = vpop.permute.xlu0 %1647 }
 0x157   : > { %v4740_v7 = vpop.permute.xlu1 %1651 }
 0x158   : > { %6755 = vst [vmem:[#allocation50_spill] sm:$0xff] %v4740_v7 }
 0x159   : > { %v4748_v30 = vpop.permute.xlu0 %1655 }
 0x197   : > { %v895_v12 = vpop.f32.mrf.mxu0 }
 0x198   : > { %v4736_v1 = vrot.slane %v895_v12, %v4729_v20  ;;  %v4752_v12 = vpop.permute.xlu1 %1659 }
 0x199   : > { %v4725_v59 = vpop.f32.mrf.mxu0  ;;  %6756 = vst [vmem:[#allocation51_spill] sm:$0xff] %v4752_v12 }
 0x19a   : > { %v1358_v9 = vmul.f32 %v4599_v18, %v4736_v1  ;;  %v1359_v16 = vmul.f32 %v4587_v13, %v4736_v1  ;;  %v1360_v7 = vmul.f32 %v4594_v17, %v4736_v1  ;;  %v1363_v13 = vmul.f32 %v4613_v25, %v4736_v1  ;;  %v4762_v18 = vpop.permute.xlu0 %1663  ;;  %v3784_v25 = vld [vmem:[%s6704_s7] ss:$0 sm:$0xff] }
 0x19b   : > { %v4733_v50 = vpop.f32.mrf.mxu0  ;;  %6757 = vst [vmem:[#allocation52_spill] sm:$0xff] %v4762_v18  ;;  %v1365_v17 = vmul.f32 %v4620_v27, %v4736_v1  ;;  %v669_v27 = vadd.f32 %v4681_v2, %v3784_v25  ;;  %v689_v18 = vadd.f32 %v3888_v58, %v3784_v25  ;;  %v699_v12 = vadd.f32 %v3891_v14, %v3784_v25 }
 0x19c   : > { %1424 = vrot.lane.b32.xlu0 %v1359_v16, %s4058_s9  ;;  %1422 = vrot.lane.b32.xlu1 %v1358_v9, %s4058_s9  ;;  %v1362_v16 = vmul.f32 %v4601_v21, %v4736_v1  ;;  %v1367_v9 = vmul.f32 %v4625_v34, %v4736_v1  ;;  %v1166_v34 = vmul.f32 %v4736_v1, %v4479_v37 }
 0x19d   : > { %v3932_v11 = vpop.f32.mrf.mxu0  ;;  %v1171_v58 = vmul.f32 %v4736_v1, %v4482_v39  ;;  %v1369_v37 = vmul.f32 %v4629_v42, %v4736_v1  ;;  %v704_v39 = vadd.f32 %v3784_v25, %v4711_v61  ;;  %v1175_v2 = vmul.f32 %v4736_v1, %v4496_v44 }
 0x19e   : > { %v1361_v11 = vmul.f32 %v4606_v22, %v4736_v1  ;;  %v4765_v22 = vpop.permute.xlu1 %1667  ;;  %v4777_v21 = vpop.permute.xlu0 %1671  ;;  %v1370_v14 = vmul.f32 %v4627_v38, %v4736_v1 }
 0x19f   : > { %6758 = vst [vmem:[#allocation53_spill] sm:$0xff] %v4765_v22  ;;  %v674_v22 = vadd.f32 %v3784_v25, %v673_v56  ;;  %v1169_v56 = vmul.f32 %v4736_v1, %v4475_v36  ;;  %v1368_v36 = vmul.f32 %v4622_v31, %v4736_v1  ;;  %v4838_v42 = vadd.f32 %v1171_v58, %v689_v18 }
 0x1a0   : > { %1428 = vrot.lane.b32.xlu0 %v1361_v11, %s4058_s9  ;;  %1426 = vrot.lane.b32.xlu1 %v1360_v7, %s4058_s9  ;;  %v1364_v7 = vmul.f32 %v4608_v24, %v4736_v1  ;;  %v679_v24 = vadd.f32 %v3885_v5, %v3784_v25  ;;  %v1174_v5 = vmul.f32 %v4736_v1, %v4507_v49 }
 0x1a1   : > { %v719_v49 = vadd.f32 %v4717_v55, %v3784_v25  ;;  %6762 = vst [vmem:[#allocation57_spill] sm:$0xff] %v4838_v42  ;;  %v1373_v18 = vmul.f32 %v4637_v54, %v4736_v1  ;;  %v1374_v54 = vmul.f32 %v4635_v51, %v4736_v1  ;;  %v1379_v51 = vmul.f32 %v4649_v19, %v4736_v1 }
 0x1a2   : > { %v4781_v11 = vpop.permute.xlu1 %1675 }
 0x1a3   : > { %6759 = vst [vmem:[#allocation54_spill] sm:$0xff] %v4781_v11  ;;  %v1167_v11 = vmul.f32 %v4736_v1, %v4486_v40  ;;  %v1172_v40 = vmul.f32 %v4736_v1, %v4500_v46  ;;  %v1177_v46 = vmul.f32 %v4736_v1, %v4503_v47  ;;  %v4834_v47 = vadd.f32 %v1169_v56, %v679_v24 }
 0x1a4   : > { %1432 = vrot.lane.b32.xlu0 %v1363_v13, %s4058_s9  ;;  %1430 = vrot.lane.b32.xlu1 %v1362_v16, %s4058_s9  ;;  %v664_v13 = vadd.f32 %v3784_v25, %v4687_v62  ;;  %v1366_v16 = vmul.f32 %v4615_v26, %v4736_v1  ;;  %v1168_v62 = vmul.f32 %v4736_v1, %v4470_v35 }
 0x1a5   : > { %v1173_v35 = vmul.f32 %v4736_v1, %v4489_v41  ;;  %v4830_v44 = vadd.f32 %v1167_v11, %v669_v27  ;;  %6760 = vst [vmem:[#allocation55_spill] sm:$0xff] %v4834_v47  ;;  %v1375_v27 = vmul.f32 %v4641_v60, %v4736_v1  ;;  %v4870_v24 = vrot.slane %v4733_v50, %v4729_v20 }
 0x1a6   : > { %v4820_v41 = vpop.permute.xlu1 %1875  ;;  %v4827_v26 = vadd.f32 %v1166_v34, %v664_v13  ;;  %v4832_v61 = vadd.f32 %v1168_v62, %v674_v22  ;;  %v4866_v13 = vrot.slane %v4725_v59, %v4729_v20  ;;  %v1377_v60 = vmul.f32 %v4645_v3, %v4736_v1 }
 0x1a7   : > { %v4842_v38 = vadd.f32 %v1173_v35, %v699_v12  ;;  %v1372_v12 = vmul.f32 %v4631_v45, %v4736_v1  ;;  %v1376_v59 = vmul.f32 %v4639_v57, %v4736_v1  ;;  %v1381_v57 = vmul.f32 %v4653_v32, %v4736_v1 }
 0x1a8   : > { %1436 = vrot.lane.b32.xlu0 %v1365_v17, %s4058_s9  ;;  %1434 = vrot.lane.b32.xlu1 %v1364_v7, %s4058_s9  ;;  %v684_v17 = vadd.f32 %v3784_v25, %v683_v52  ;;  %v694_v7 = vadd.f32 %v3784_v25, %v693_v29  ;;  %v1170_v52 = vmul.f32 %v4736_v1, %v4493_v43  ;;  %v4811_v29 = vpop.permute.xlu0 %1871 }
 0x1a9   : > { %v709_v43 = vadd.f32 %v4709_v4, %v3784_v25  ;;  %v1371_v4 = vmul.f32 %v4633_v48, %v4736_v1  ;;  %6764 = vst [vmem:[#allocation59_spill] sm:$0xff] %v4842_v38  ;;  %v4844_v25 = vadd.f32 %v1174_v5, %v704_v39  ;;  %v1380_v3 = vmul.f32 %v4647_v15, %v4736_v1  ;;  %v6771_v5 = vld [vmem:[#allocation26_spill] sm:$0xff]  ;;  %v6772_v39 = vld [vmem:[#allocation29_spill] sm:$0xff]  ;;  %v5489_v38 = vld [vmem:[%s6701_s4 + $0xe8] sm:$0xff] }
 0x1aa   : > { %v4836_v31 = vadd.f32 %v1170_v52, %v684_v17  ;;  %v4840_v55 = vadd.f32 %v1172_v40, %v694_v7  ;;  %v4856_v11 = vpop.permute.xlu1 %1879  ;;  %v1378_v17 = vmul.f32 %v4643_v63, %v4736_v1  ;;  %v1383_v63 = vmul.f32 %v4657_v0, %v4736_v1  ;;  %v6768_v0 = vld [vmem:[#allocation24_spill] sm:$0xff]  ;;  %v6770_v40 = vld [vmem:[#allocation25_spill] sm:$0xff] }
 0x1ab   : > { %6765 = vst [vmem:[#allocation60_spill] sm:$0xff] %v4844_v25  ;;  %v4846_v48 = vadd.f32 %v1175_v2, %v709_v43  ;;  %v1382_v34 = vmul.f32 %v4651_v23, %v4736_v1  ;;  %v1385_v15 = vmul.f32 %v4661_v8, %v4736_v1  ;;  %v1384_v56 = vmul.f32 %v4655_v33, %v4736_v1  ;;  %v6769_v33 = vld [vmem:[#allocation27_spill] sm:$0xff] }
 0x1ac   : > { %1440 = vrot.lane.b32.xlu0 %v1367_v9, %s4058_s9  ;;  %1438 = vrot.lane.b32.xlu1 %v1366_v16, %s4058_s9  ;;  %6761 = vst [vmem:[#allocation56_spill] sm:$0xff] %v4836_v31  ;;  %6763 = vst [vmem:[#allocation58_spill] sm:$0xff] %v4840_v55  ;;  %v4848_v9 = vadd.f32 %v1177_v46, %v719_v49  ;;  %v4852_v22 = vpop.permute.xlu0 %1883  ;;  %v1387_v23 = vmul.f32 %v4665_v28, %v4736_v1  ;;  %v4060_v46 = vmov 4   ;;  %v6773_v49 = vld [vmem:[#allocation28_spill] sm:$0xff] }
 0x1ad   : > { %6766 = vst [vmem:[#allocation61_spill] sm:$0xff] %v4846_v48  ;;  %v1386_v52 = vmul.f32 %v6768_v0, %v4736_v1  ;;  %v1388_v35 = vmul.f32 %v6770_v40, %v4736_v1  ;;  %v1679_v2 = vmul.f32 %v6772_v39, %v4736_v1  ;;  %3974 = vset.pattern.permute.xlu0 %v4060_v46  ;;  %v6780_v0 = vld [vmem:[#allocation36_spill] sm:$0xff]  ;;  %v6781_v40 = vld [vmem:[#allocation37_spill] sm:$0xff] }
 0x1ae   : > { %6767 = vst [vmem:[#allocation62_spill] sm:$0xff] %v4848_v9  ;;  %v4877_v45 = vpop.permute.xlu1 %1887  ;;  %3973 = vset.pattern.permute.xlu1 %v4060_v46 }
 0x1b0   : > { %1444 = vrot.lane.b32.xlu0 %v1369_v37, %s4058_s9  ;;  %1442 = vrot.lane.b32.xlu1 %v1368_v36, %s4058_s9  ;;  %v4874_v16 = vpop.permute.xlu0 %1891  ;;  %v1389_v37 = vmul.f32 %v6769_v33, %v4736_v1  ;;  %v1678_v36 = vmul.f32 %v6771_v5, %v4736_v1  ;;  %v6782_v5 = vld [vmem:[#allocation38_spill] sm:$0xff] }
 0x1b2   : > { %v4890_v20 = vpop.permute.xlu1 %1895 }
 0x1b4   : > { %1448 = vrot.lane.b32.xlu0 %v1371_v4, %s4058_s9  ;;  %1446 = vrot.lane.b32.xlu1 %v1370_v14, %s4058_s9  ;;  %v4886_v50 = vpop.permute.xlu0 %1899  ;;  %v1680_v14 = vmul.f32 %v6773_v49, %v4736_v1  ;;  %v6774_v4 = vld [vmem:[#allocation30_spill] sm:$0xff] }
 0x1b6   : > { %v4903_v19 = vpop.permute.xlu1 %1903 }
 0x1b8   : > { %1452 = vrot.lane.b32.xlu0 %v1373_v18, %s4058_s9  ;;  %1450 = vrot.lane.b32.xlu1 %v1372_v12, %s4058_s9  ;;  %v4900_v7 = vpop.permute.xlu0 %1907  ;;  %v1681_v18 = vmul.f32 %v6774_v4, %v4736_v1 }
 0x1ba   : > { %v4916_v62 = vpop.permute.xlu1 %1911 }
 0x1bc   : > { %1456 = vrot.lane.b32.xlu0 %v1375_v27, %s4058_s9  ;;  %1454 = vrot.lane.b32.xlu1 %v1374_v54, %s4058_s9  ;;  %v4912_v32 = vpop.permute.xlu0 %1915  ;;  %v6775_v54 = vld [vmem:[#allocation31_spill] sm:$0xff] }
 0x1be   : > { %v4929_v8 = vpop.permute.xlu1 %1919 }
 0x1c0   : > { %1460 = vrot.lane.b32.xlu0 %v1377_v60, %s4058_s9  ;;  %1458 = vrot.lane.b32.xlu1 %v1376_v59, %s4058_s9  ;;  %v4926_v58 = vpop.permute.xlu0 %1923  ;;  %v1682_v60 = vmul.f32 %v6775_v54, %v4736_v1  ;;  %v6776_v59 = vld [vmem:[#allocation32_spill] sm:$0xff] }
 0x1c2   : > { %v4942_v43 = vpop.permute.xlu1 %1927 }
 0x1c4   : > { %1464 = vrot.lane.b32.xlu0 %v1379_v51, %s4058_s9  ;;  %1462 = vrot.lane.b32.xlu1 %v1378_v17, %s4058_s9  ;;  %v4938_v28 = vpop.permute.xlu0 %1931  ;;  %v1683_v51 = vmul.f32 %v6776_v59, %v4736_v1 }
 0x1c6   : > { %v4955_v27 = vpop.permute.xlu1 %1935 }
 0x1c8   : > { %1468 = vrot.lane.b32.xlu0 %v1381_v57, %s4058_s9  ;;  %1466 = vrot.lane.b32.xlu1 %v1380_v3, %s4058_s9  ;;  %v4952_v12 = vpop.permute.xlu0 %1939  ;;  %v6777_v57 = vld [vmem:[#allocation33_spill] sm:$0xff] }
 0x1c9   : > { %v1684_v3 = vmul.f32 %v6777_v57, %v4736_v1 }
 0x1cc   : > { %1472 = vrot.lane.b32.xlu0 %v1383_v63, %s4058_s9  ;;  %1470 = vrot.lane.b32.xlu1 %v1382_v34, %s4058_s9  ;;  %v4964_v17 = vpop.permute.xlu0 %1947  ;;  %v4968_v63 = vpop.permute.xlu1 %1943  ;;  %v6778_v34 = vld [vmem:[#allocation34_spill] sm:$0xff] }
 0x1d0   : > { %1476 = vrot.lane.b32.xlu0 %v1385_v15, %s4058_s9  ;;  %1474 = vrot.lane.b32.xlu1 %v1384_v56, %s4058_s9  ;;  %v1685_v15 = vmul.f32 %v6778_v34, %v4736_v1  ;;  %v6779_v56 = vld [vmem:[#allocation35_spill] sm:$0xff]  ;;  %v4978_v33 = vpop.permute.xlu0 %1955 }
 0x1d4   : > { %1480 = vrot.lane.b32.xlu0 %v1387_v23, %s4058_s9  ;;  %1478 = vrot.lane.b32.xlu1 %v1386_v52, %s4058_s9  ;;  %v1686_v23 = vmul.f32 %v6779_v56, %v4736_v1  ;;  %v1687_v52 = vmul.f32 %v6780_v0, %v4736_v1  ;;  %v4990_v39 = vpop.permute.xlu0 %1963  ;;  %v6789_v0 = vld [vmem:[#allocation45_spill] sm:$0xff] }
 0x1d8   : > { %1484 = vrot.lane.b32.xlu0 %v1389_v37, %s4058_s9  ;;  %1482 = vrot.lane.b32.xlu1 %v1388_v35, %s4058_s9  ;;  %v4981_v37 = vpop.permute.xlu1 %1951  ;;  %v1688_v35 = vmul.f32 %v6781_v40, %v4736_v1 }
 0x1dc   : > { %1742 = vrot.lane.b32.xlu0 %v1678_v36, %s4059_s21  ;;  %1744 = vrot.lane.b32.xlu1 %v1679_v2, %s4059_s21  ;;  %v1689_v36 = vmul.f32 %v6782_v5, %v4736_v1  ;;  %v6783_v2 = vld [vmem:[#allocation39_spill] sm:$0xff]  ;;  %v4994_v49 = vpop.permute.xlu1 %1959 }
 0x1dd   : > { %v1690_v46 = vmul.f32 %v6783_v2, %v4736_v1 }
 0x1e0   : > { %1746 = vrot.lane.b32.xlu0 %v1680_v14, %s4059_s21  ;;  %1748 = vrot.lane.b32.xlu1 %v1681_v18, %s4059_s21  ;;  %v6784_v14 = vld [vmem:[#allocation40_spill] sm:$0xff]  ;;  %v6785_v18 = vld [vmem:[#allocation41_spill] sm:$0xff]  ;;  %v5007_v57 = vpop.permute.xlu1 %1967 }
 0x1e1   : > { %v1691_v4 = vmul.f32 %v6784_v14, %v4736_v1  ;;  %v1692_v54 = vmul.f32 %v6785_v18, %v4736_v1 }
 0x1e4   : > { %1750 = vrot.lane.b32.xlu0 %v1682_v60, %s4059_s21  ;;  %1752 = vrot.lane.b32.xlu1 %v1683_v51, %s4059_s21  ;;  %v6786_v60 = vld [vmem:[#allocation42_spill] sm:$0xff]  ;;  %v5004_v51 = vpop.permute.xlu0 %1971  ;;  %v5020_v40 = vpop.permute.xlu1 %1975 }
 0x1e5   : > { %v1693_v59 = vmul.f32 %v6786_v60, %v4736_v1  ;;  %v1701_v60 = vmul.f32 %v4731_v53, %v4736_v1  ;;  %v1704_v53 = vmul.f32 %v4748_v30, %v4736_v1 }
 0x1e8   : > { %1754 = vrot.lane.b32.xlu0 %v1684_v3, %s4059_s21  ;;  %1756 = vrot.lane.b32.xlu1 %v1685_v15, %s4059_s21  ;;  %v6787_v3 = vld [vmem:[#allocation43_spill] sm:$0xff]  ;;  %v6788_v15 = vld [vmem:[#allocation44_spill] sm:$0xff]  ;;  %v5033_v18 = vpop.permute.xlu1 %1983 }
 0x1e9   : > { %v1694_v34 = vmul.f32 %v6787_v3, %v4736_v1  ;;  %v1695_v56 = vmul.f32 %v6788_v15, %v4736_v1 }
 0x1ec   : > { %1758 = vrot.lane.b32.xlu0 %v1686_v23, %s4059_s21  ;;  %1760 = vrot.lane.b32.xlu1 %v1687_v52, %s4059_s21  ;;  %v5016_v23 = vpop.permute.xlu0 %1979  ;;  %v1696_v52 = vmul.f32 %v6789_v0, %v4736_v1  ;;  %v6794_v0 = vld [vmem:[#allocation51_spill] sm:$0xff] }
 0x1f0   : > { %1762 = vrot.lane.b32.xlu0 %v1688_v35, %s4059_s21  ;;  %1764 = vrot.lane.b32.xlu1 %v1689_v36, %s4059_s21  ;;  %v6790_v35 = vld [vmem:[#allocation46_spill] sm:$0xff]  ;;  %v6791_v36 = vld [vmem:[#allocation47_spill] sm:$0xff] }
 0x1f1   : > { %v1697_v5 = vmul.f32 %v6790_v35, %v4736_v1  ;;  %v1698_v2 = vmul.f32 %v6791_v36, %v4736_v1  ;;  %v6795_v35 = vld [vmem:[#allocation52_spill] sm:$0xff] }
 0x1f4   : > { %1766 = vrot.lane.b32.xlu0 %v1690_v46, %s4059_s21  ;;  %1768 = vrot.lane.b32.xlu1 %v1691_v4, %s4059_s21  ;;  %v6792_v46 = vld [vmem:[#allocation48_spill] sm:$0xff]  ;;  %v5030_v4 = vpop.permute.xlu0 %1987 }
 0x1f5   : > { %v1699_v14 = vmul.f32 %v6792_v46, %v4736_v1 }
 0x1f8   : > { %1770 = vrot.lane.b32.xlu0 %v1692_v54, %s4059_s21  ;;  %1772 = vrot.lane.b32.xlu1 %v1693_v59, %s4059_s21  ;;  %v1700_v54 = vmul.f32 %v4727_v6, %v4736_v1  ;;  %v1702_v59 = vmul.f32 %v4738_v10, %v4736_v1  ;;  %v5044_v3 = vpop.permute.xlu0 %1995 }
 0x1fc   : > { %1774 = vrot.lane.b32.xlu0 %v1694_v34, %s4059_s21  ;;  %1776 = vrot.lane.b32.xlu1 %v1695_v56, %s4059_s21  ;;  %v6793_v34 = vld [vmem:[#allocation50_spill] sm:$0xff]  ;;  %v5048_v56 = vpop.permute.xlu1 %1991 }
 0x1fd   : > { %v1703_v15 = vmul.f32 %v6793_v34, %v4736_v1 }
 0x200   : > { %1778 = vrot.lane.b32.xlu0 %v1696_v52, %s4059_s21  ;;  %1780 = vrot.lane.b32.xlu1 %v1697_v5, %s4059_s21  ;;  %v1705_v52 = vmul.f32 %v6794_v0, %v4736_v1  ;;  %v1706_v5 = vmul.f32 %v6795_v35, %v4736_v1  ;;  %v1998_v0 = vmul.f32 %v4811_v29, %v4736_v1 }
 0x201   : > { %v2003_v29 = vmul.f32 %v4874_v16, %v4736_v1 }
 0x204   : > { %1782 = vrot.lane.b32.xlu0 %v1698_v2, %s4059_s21  ;;  %1784 = vrot.lane.b32.xlu1 %v1699_v14, %s4059_s21  ;;  %v6797_v2 = vld [vmem:[#allocation53_spill] sm:$0xff]  ;;  %v1708_v14 = vmul.f32 %v4777_v21, %v4736_v1 }
 0x205   : > { %v1707_v46 = vmul.f32 %v6797_v2, %v4736_v1 }
 0x208   : > { %1786 = vrot.lane.b32.xlu0 %v1700_v54, %s4059_s21  ;;  %1788 = vrot.lane.b32.xlu1 %v1701_v60, %s4059_s21  ;;  %v6799_v60 = vld [vmem:[#allocation54_spill] sm:$0xff] }
 0x20c   : > { %1790 = vrot.lane.b32.xlu0 %v1702_v59, %s4059_s21  ;;  %1792 = vrot.lane.b32.xlu1 %v1703_v15, %s4059_s21  ;;  %v1709_v59 = vmul.f32 %v6799_v60, %v4736_v1  ;;  %v1999_v15 = vmul.f32 %v4820_v41, %v4736_v1  ;;  %v2000_v41 = vmul.f32 %v4856_v11, %v4736_v1 }
 0x20d   : > { %v2005_v11 = vmul.f32 %v4886_v50, %v4736_v1  ;;  %v2004_v60 = vmul.f32 %v4890_v20, %v4736_v1  ;;  %v2009_v20 = vmul.f32 %v4912_v32, %v4736_v1 }
 0x20e   : > { %v5054_v6 = vpop.permute.xlu0 %1424  ;;  %v5058_v10 = vpop.permute.xlu1 %1422 }
 0x210   : > { %1794 = vrot.lane.b32.xlu0 %v1704_v53, %s4059_s21  ;;  %1796 = vrot.lane.b32.xlu1 %v1705_v52, %s4059_s21  ;;  %v2001_v52 = vmul.f32 %v4852_v22, %v4736_v1 }
 0x212   : > { %v5064_v36 = vpop.permute.xlu0 %1428  ;;  %v5068_v30 = vpop.permute.xlu1 %1426 }
 0x213   : > { %6796 = vst [vmem:[#allocation24_spill] sm:$0xff] %v5064_v36 }
 0x214   : > { %1798 = vrot.lane.b32.xlu0 %v1706_v5, %s4059_s21  ;;  %1800 = vrot.lane.b32.xlu1 %v1707_v46, %s4059_s21  ;;  %v2002_v46 = vmul.f32 %v4877_v45, %v4736_v1  ;;  %v2007_v45 = vmul.f32 %v4900_v7, %v4736_v1 }
 0x216   : > { %v5074_v54 = vpop.permute.xlu0 %1432  ;;  %v5078_v34 = vpop.permute.xlu1 %1430 }
 0x217   : > { %6798 = vst [vmem:[#allocation27_spill] sm:$0xff] %v5074_v54  ;;  %6800 = vst [vmem:[#allocation25_spill] sm:$0xff] %v5078_v34 }
 0x218   : > { %1802 = vrot.lane.b32.xlu0 %v1708_v14, %s4059_s21  ;;  %1804 = vrot.lane.b32.xlu1 %v1709_v59, %s4059_s21 }
 0x21a   : > { %v5084_v53 = vpop.permute.xlu0 %1436  ;;  %v5088_v21 = vpop.permute.xlu1 %1434 }
 0x21b   : > { %6801 = vst [vmem:[#allocation26_spill] sm:$0xff] %v5084_v53  ;;  %6802 = vst [vmem:[#allocation29_spill] sm:$0xff] %v5088_v21  ;;  %v4062_v53 = vmov 5  }
 0x21c   : > { %2064 = vrot.lane.b32.xlu0 %v1999_v15, %s4061_s22  ;;  %2062 = vrot.lane.b32.xlu1 %v1998_v0, %s4061_s22  ;;  %v2006_v15 = vmul.f32 %v4903_v19, %v4736_v1  ;;  %v2011_v19 = vmul.f32 %v4926_v58, %v4736_v1 }
 0x21e   : > { %v5094_v35 = vpop.permute.xlu0 %1440  ;;  %v5098_v5 = vpop.permute.xlu1 %1438 }
 0x21f   : > { %6803 = vst [vmem:[#allocation28_spill] sm:$0xff] %v5094_v35  ;;  %6804 = vst [vmem:[#allocation30_spill] sm:$0xff] %v5098_v5  ;;  %v5479_v5 = vld [vmem:[%s6701_s4 + $0xd8] sm:$0xff] }
 0x220   : > { %2068 = vrot.lane.b32.xlu0 %v2001_v52, %s4061_s22  ;;  %2066 = vrot.lane.b32.xlu1 %v2000_v41, %s4061_s22  ;;  %v2008_v52 = vmul.f32 %v4916_v62, %v4736_v1  ;;  %v2013_v62 = vmul.f32 %v4938_v28, %v4736_v1 }
 0x222   : > { %v5104_v2 = vpop.permute.xlu0 %1444  ;;  %v5108_v22 = vpop.permute.xlu1 %1442 }
 0x223   : > { %6805 = vst [vmem:[#allocation31_spill] sm:$0xff] %v5104_v2  ;;  %6806 = vst [vmem:[#allocation32_spill] sm:$0xff] %v5108_v22 }
 0x224   : > { %2072 = vrot.lane.b32.xlu0 %v2003_v29, %s4061_s22  ;;  %2070 = vrot.lane.b32.xlu1 %v2002_v46, %s4061_s22  ;;  %v2010_v29 = vmul.f32 %v4929_v8, %v4736_v1  ;;  %v2015_v8 = vmul.f32 %v4952_v12, %v4736_v1 }
 0x226   : > { %v5114_v14 = vpop.permute.xlu0 %1448  ;;  %v5118_v16 = vpop.permute.xlu1 %1446 }
 0x227   : > { %6807 = vst [vmem:[#allocation33_spill] sm:$0xff] %v5114_v14  ;;  %6808 = vst [vmem:[#allocation34_spill] sm:$0xff] %v5118_v16 }
 0x228   : > { %2076 = vrot.lane.b32.xlu0 %v2005_v11, %s4061_s22  ;;  %2074 = vrot.lane.b32.xlu1 %v2004_v60, %s4061_s22  ;;  %v2012_v11 = vmul.f32 %v4942_v43, %v4736_v1  ;;  %v2017_v43 = vmul.f32 %v4964_v17, %v4736_v1 }
 0x22a   : > { %v5124_v59 = vpop.permute.xlu0 %1452  ;;  %v5128_v50 = vpop.permute.xlu1 %1450 }
 0x22b   : > { %6809 = vst [vmem:[#allocation35_spill] sm:$0xff] %v5124_v59  ;;  %6810 = vst [vmem:[#allocation36_spill] sm:$0xff] %v5128_v50 }
 0x22c   : > { %2080 = vrot.lane.b32.xlu0 %v2007_v45, %s4061_s22  ;;  %2078 = vrot.lane.b32.xlu1 %v2006_v15, %s4061_s22  ;;  %v2014_v45 = vmul.f32 %v4955_v27, %v4736_v1  ;;  %v2019_v27 = vmul.f32 %v4978_v33, %v4736_v1 }
 0x22e   : > { %v5134_v0 = vpop.permute.xlu0 %1456  ;;  %v5138_v7 = vpop.permute.xlu1 %1454 }
 0x22f   : > { %6811 = vst [vmem:[#allocation37_spill] sm:$0xff] %v5134_v0  ;;  %6812 = vst [vmem:[#allocation38_spill] sm:$0xff] %v5138_v7 }
 0x230   : > { %2084 = vrot.lane.b32.xlu0 %v2009_v20, %s4061_s22  ;;  %2082 = vrot.lane.b32.xlu1 %v2008_v52, %s4061_s22  ;;  %v2016_v20 = vmul.f32 %v4968_v63, %v4736_v1  ;;  %v2021_v63 = vmul.f32 %v4990_v39, %v4736_v1 }
 0x232   : > { %v5144_v41 = vpop.permute.xlu0 %1460  ;;  %v5148_v32 = vpop.permute.xlu1 %1458 }
 0x233   : > { %6813 = vst [vmem:[#allocation39_spill] sm:$0xff] %v5144_v41  ;;  %6814 = vst [vmem:[#allocation40_spill] sm:$0xff] %v5148_v32  ;;  %v5335_v41 = vld [vmem:[%s6701_s4 + $0x48] sm:$0xff] }
 0x234   : > { %2088 = vrot.lane.b32.xlu0 %v2011_v19, %s4061_s22  ;;  %2086 = vrot.lane.b32.xlu1 %v2010_v29, %s4061_s22  ;;  %v2018_v19 = vmul.f32 %v4981_v37, %v4736_v1  ;;  %v2023_v37 = vmul.f32 %v5004_v51, %v4736_v1 }
 0x236   : > { %v5154_v46 = vpop.permute.xlu0 %1464  ;;  %v5158_v58 = vpop.permute.xlu1 %1462 }
 0x237   : > { %6815 = vst [vmem:[#allocation41_spill] sm:$0xff] %v5154_v46  ;;  %6816 = vst [vmem:[#allocation42_spill] sm:$0xff] %v5158_v58  ;;  %v5329_v58 = vld [vmem:[%s6701_s4 + $0x60] sm:$0xff] }
 0x238   : > { %2092 = vrot.lane.b32.xlu0 %v2013_v62, %s4061_s22  ;;  %2090 = vrot.lane.b32.xlu1 %v2012_v11, %s4061_s22  ;;  %v2020_v62 = vmul.f32 %v4994_v49, %v4736_v1  ;;  %v2025_v49 = vmul.f32 %v5016_v23, %v4736_v1 }
 0x23a   : > { %v5164_v60 = vpop.permute.xlu0 %1468  ;;  %v5168_v28 = vpop.permute.xlu1 %1466 }
 0x23b   : > { %6817 = vst [vmem:[#allocation43_spill] sm:$0xff] %v5164_v60  ;;  %6818 = vst [vmem:[#allocation44_spill] sm:$0xff] %v5168_v28  ;;  %v5319_v60 = vld [vmem:[%s6701_s4 + $0x38] sm:$0xff] }
 0x23c   : > { %2096 = vrot.lane.b32.xlu0 %v2015_v8, %s4061_s22  ;;  %2094 = vrot.lane.b32.xlu1 %v2014_v45, %s4061_s22  ;;  %v2022_v8 = vmul.f32 %v5007_v57, %v4736_v1  ;;  %v2027_v57 = vmul.f32 %v5030_v4, %v4736_v1 }
 0x23e   : > { %v5174_v15 = vpop.permute.xlu0 %1472  ;;  %v5178_v12 = vpop.permute.xlu1 %1470 }
 0x23f   : > { %6819 = vst [vmem:[#allocation45_spill] sm:$0xff] %v5174_v15  ;;  %6820 = vst [vmem:[#allocation46_spill] sm:$0xff] %v5178_v12  ;;  %v5313_v12 = vld [vmem:[%s6701_s4 + $0x50] sm:$0xff] }
 0x240   : > { %2100 = vrot.lane.b32.xlu0 %v2017_v43, %s4061_s22  ;;  %2098 = vrot.lane.b32.xlu1 %v2016_v20, %s4061_s22  ;;  %v2024_v43 = vmul.f32 %v5020_v40, %v4736_v1  ;;  %v2029_v40 = vmul.f32 %v5044_v3, %v4736_v1  ;;  %v5255_v3 = vld [vmem:[%s6701_s4] sm:$0xff] }
 0x242   : > { %v5184_v52 = vpop.permute.xlu0 %1476  ;;  %v5188_v17 = vpop.permute.xlu1 %1474 }
 0x243   : > { %6821 = vst [vmem:[#allocation47_spill] sm:$0xff] %v5184_v52  ;;  %6822 = vst [vmem:[#allocation48_spill] sm:$0xff] %v5188_v17  ;;  %v5303_v52 = vld [vmem:[%s6701_s4 + $0x28] sm:$0xff] }
 0x244   : > { %2104 = vrot.lane.b32.xlu0 %v2019_v27, %s4061_s22  ;;  %2102 = vrot.lane.b32.xlu1 %v2018_v19, %s4061_s22  ;;  %v2026_v27 = vmul.f32 %v5033_v18, %v4736_v1 }
 0x246   : > { %v5194_v29 = vpop.permute.xlu0 %1480  ;;  %v5198_v33 = vpop.permute.xlu1 %1478 }
 0x247   : > { %6823 = vst [vmem:[#allocation50_spill] sm:$0xff] %v5194_v29  ;;  %6824 = vst [vmem:[#allocation51_spill] sm:$0xff] %v5198_v33  ;;  %v5297_v33 = vld [vmem:[%s6701_s4 + $0x40] sm:$0xff] }
 0x248   : > { %2108 = vrot.lane.b32.xlu0 %v2021_v63, %s4061_s22  ;;  %2106 = vrot.lane.b32.xlu1 %v2020_v62, %s4061_s22  ;;  %v2028_v63 = vmul.f32 %v5048_v56, %v4736_v1 }
 0x24a   : > { %v5204_v11 = vpop.permute.xlu0 %1484  ;;  %v5208_v39 = vpop.permute.xlu1 %1482 }
 0x24b   : > { %6825 = vst [vmem:[#allocation52_spill] sm:$0xff] %v5204_v11 }
 0x24c   : > { %2112 = vrot.lane.b32.xlu0 %v2023_v37, %s4061_s22  ;;  %2110 = vrot.lane.b32.xlu1 %v2022_v8, %s4061_s22  ;;  %v5249_v37 = vld [vmem:[%s6701_s4 + $0x8] sm:$0xff] }
 0x24e   : > { %v5214_v45 = vpop.permute.xlu0 %1742  ;;  %v5218_v51 = vpop.permute.xlu1 %1744 }
 0x250   : > { %2116 = vrot.lane.b32.xlu0 %v2025_v49, %s4061_s22  ;;  %2114 = vrot.lane.b32.xlu1 %v2024_v43, %s4061_s22  ;;  %v5265_v49 = vld [vmem:[%s6701_s4 + $0x20] sm:$0xff]  ;;  %v5271_v43 = vld [vmem:[%s6701_s4 + $0x10] sm:$0xff] }
 0x252   : > { %v5224_v20 = vpop.permute.xlu0 %1746  ;;  %v5228_v23 = vpop.permute.xlu1 %1748 }
 0x253   : > { %6826 = vst [vmem:[#allocation53_spill] sm:$0xff] %v5224_v20  ;;  %6827 = vst [vmem:[#allocation54_spill] sm:$0xff] %v5228_v23 }
 0x254   : > { %2120 = vrot.lane.b32.xlu0 %v2027_v57, %s4061_s22  ;;  %2118 = vrot.lane.b32.xlu1 %v2026_v27, %s4061_s22 }
 0x256   : > { %v5234_v19 = vpop.permute.xlu0 %1750  ;;  %v5238_v4 = vpop.permute.xlu1 %1752 }
 0x257   : > { %6828 = vst [vmem:[#allocation63_spill] sm:$0xff] %v5234_v19  ;;  %6829 = vst [vmem:[#allocation64_spill] sm:$0xff] %v5238_v4 }
 0x258   : > { %2124 = vrot.lane.b32.xlu0 %v2029_v40, %s4061_s22  ;;  %2122 = vrot.lane.b32.xlu1 %v2028_v63, %s4061_s22  ;;  %v5281_v40 = vld [vmem:[%s6701_s4 + $0x30] sm:$0xff]  ;;  %v5287_v63 = vld [vmem:[%s6701_s4 + $0x18] sm:$0xff] }
 0x25a   : > { %v5242_v18 = vpop.permute.xlu0 %1754  ;;  %v5244_v62 = vpop.permute.xlu1 %1756 }
 0x25b   : > { %6830 = vst [vmem:[#allocation65_spill] sm:$0xff] %v5242_v18  ;;  %6831 = vst [vmem:[#allocation66_spill] sm:$0xff] %v5244_v62 }
 0x25c   : > { %2195 = vperm.xlu0 %3974, %v5249_v37   ;;  %2191 = vperm.xlu1 %3973, %v5255_v3  }
 0x25e   : > { %v5258_v56 = vpop.permute.xlu0 %1758  ;;  %v5260_v8 = vpop.permute.xlu1 %1760 }
 0x25f   : > { %6832 = vst [vmem:[#allocation67_spill] sm:$0xff] %v5258_v56  ;;  %6833 = vst [vmem:[#allocation68_spill] sm:$0xff] %v5260_v8  ;;  %v5463_v8 = vld [vmem:[%s6701_s4 + $0xc8] sm:$0xff]  ;;  %v5473_v56 = vld [vmem:[%s6701_s4 + $0xf0] sm:$0xff] }
 0x260   : > { %2207 = vperm.xlu0 %3974, %v5265_v49   ;;  %2199 = vperm.xlu1 %3973, %v5271_v43  }
 0x262   : > { %v5274_v57 = vpop.permute.xlu0 %1762  ;;  %v5276_v27 = vpop.permute.xlu1 %1764 }
 0x263   : > { %6834 = vst [vmem:[#allocation69_spill] sm:$0xff] %v5274_v57  ;;  %6835 = vst [vmem:[#allocation70_spill] sm:$0xff] %v5276_v27 }
 0x264   : > { %2215 = vperm.xlu0 %3974, %v5281_v40   ;;  %2203 = vperm.xlu1 %3973, %v5287_v63  }
 0x266   : > { %v5290_v11 = vpop.permute.xlu0 %1766  ;;  %v5292_v29 = vpop.permute.xlu1 %1768 }
 0x267   : > { %6836 = vst [vmem:[#allocation71_spill] sm:$0xff] %v5290_v11  ;;  %6837 = vst [vmem:[#allocation72_spill] sm:$0xff] %v5292_v29 }
 0x268   : > { %2223 = vperm.xlu0 %3974, %v5297_v33   ;;  %2211 = vperm.xlu1 %3973, %v5303_v52  }
 0x26a   : > { %v5306_v17 = vpop.permute.xlu0 %1770  ;;  %v5308_v15 = vpop.permute.xlu1 %1772 }
 0x26b   : > { %6838 = vst [vmem:[#allocation73_spill] sm:$0xff] %v5306_v17  ;;  %6839 = vst [vmem:[#allocation74_spill] sm:$0xff] %v5308_v15 }
 0x26c   : > { %2231 = vperm.xlu0 %3974, %v5313_v12   ;;  %2219 = vperm.xlu1 %3973, %v5319_v60  }
 0x26e   : > { %v5322_v28 = vpop.permute.xlu0 %1774  ;;  %v5324_v46 = vpop.permute.xlu1 %1776 }
 0x26f   : > { %6840 = vst [vmem:[#allocation75_spill] sm:$0xff] %v5322_v28  ;;  %6841 = vst [vmem:[#allocation76_spill] sm:$0xff] %v5324_v46  ;;  %v5345_v46 = vld [vmem:[%s6701_s4 + $0x70] sm:$0xff]  ;;  %v5351_v28 = vld [vmem:[%s6701_s4 + $0x58] sm:$0xff] }
 0x270   : > { %2239 = vperm.xlu0 %3974, %v5329_v58   ;;  %2227 = vperm.xlu1 %3973, %v5335_v41  }
 0x272   : > { %v5338_v32 = vpop.permute.xlu0 %1778  ;;  %v5340_v0 = vpop.permute.xlu1 %1780 }
 0x273   : > { %6842 = vst [vmem:[#allocation77_spill] sm:$0xff] %v5338_v32  ;;  %6843 = vst [vmem:[#allocation78_spill] sm:$0xff] %v5340_v0  ;;  %v5361_v0 = vld [vmem:[%s6701_s4 + $0x80] sm:$0xff]  ;;  %v5367_v32 = vld [vmem:[%s6701_s4 + $0x68] sm:$0xff] }
 0x274   : > { %2247 = vperm.xlu0 %3974, %v5345_v46   ;;  %2235 = vperm.xlu1 %3973, %v5351_v28  }
 0x276   : > { %v5354_v7 = vpop.permute.xlu0 %1782  ;;  %v5356_v15 = vpop.permute.xlu1 %1784 }
 0x277   : > { %6844 = vst [vmem:[#allocation79_spill] sm:$0xff] %v5354_v7  ;;  %6845 = vst [vmem:[#allocation80_spill] sm:$0xff] %v5356_v15  ;;  %v5377_v15 = vld [vmem:[%s6701_s4 + $0x90] sm:$0xff]  ;;  %v5383_v7 = vld [vmem:[%s6701_s4 + $0x78] sm:$0xff] }
 0x278   : > { %2255 = vperm.xlu0 %3974, %v5361_v0   ;;  %2243 = vperm.xlu1 %3973, %v5367_v32  }
 0x27a   : > { %v5370_v59 = vpop.permute.xlu0 %1786  ;;  %v5372_v17 = vpop.permute.xlu1 %1788 }
 0x27b   : > { %6846 = vst [vmem:[#allocation81_spill] sm:$0xff] %v5370_v59  ;;  %6847 = vst [vmem:[#allocation82_spill] sm:$0xff] %v5372_v17  ;;  %v5393_v17 = vld [vmem:[%s6701_s4 + $0xa0] sm:$0xff]  ;;  %v5399_v59 = vld [vmem:[%s6701_s4 + $0x88] sm:$0xff] }
 0x27c   : > { %2263 = vperm.xlu0 %3974, %v5377_v15   ;;  %2251 = vperm.xlu1 %3973, %v5383_v7  }
 0x27e   : > { %v5386_v50 = vpop.permute.xlu0 %1790  ;;  %v5388_v29 = vpop.permute.xlu1 %1792 }
 0x27f   : > { %6848 = vst [vmem:[#allocation83_spill] sm:$0xff] %v5386_v50  ;;  %6849 = vst [vmem:[#allocation84_spill] sm:$0xff] %v5388_v29  ;;  %v5409_v29 = vld [vmem:[%s6701_s4 + $0xb0] sm:$0xff]  ;;  %v5415_v50 = vld [vmem:[%s6701_s4 + $0x98] sm:$0xff] }
 0x280   : > { %2271 = vperm.xlu0 %3974, %v5393_v17   ;;  %2259 = vperm.xlu1 %3973, %v5399_v59  }
 0x282   : > { %v5402_v14 = vpop.permute.xlu0 %1794  ;;  %v5404_v11 = vpop.permute.xlu1 %1796 }
 0x283   : > { %6850 = vst [vmem:[#allocation85_spill] sm:$0xff] %v5402_v14  ;;  %6851 = vst [vmem:[#allocation86_spill] sm:$0xff] %v5404_v11  ;;  %v5425_v11 = vld [vmem:[%s6701_s4 + $0xc0] sm:$0xff]  ;;  %v5431_v14 = vld [vmem:[%s6701_s4 + $0xa8] sm:$0xff] }
 0x284   : > { %2279 = vperm.xlu0 %3974, %v5409_v29   ;;  %2267 = vperm.xlu1 %3973, %v5415_v50  }
 0x286   : > { %v5418_v16 = vpop.permute.xlu0 %1798  ;;  %v5420_v27 = vpop.permute.xlu1 %1800 }
 0x287   : > { %6852 = vst [vmem:[#allocation87_spill] sm:$0xff] %v5418_v16  ;;  %6853 = vst [vmem:[#allocation88_spill] sm:$0xff] %v5420_v27  ;;  %v5441_v27 = vld [vmem:[%s6701_s4 + $0xd0] sm:$0xff]  ;;  %v5447_v16 = vld [vmem:[%s6701_s4 + $0xb8] sm:$0xff] }
 0x288   : > { %2287 = vperm.xlu0 %3974, %v5425_v11   ;;  %2275 = vperm.xlu1 %3973, %v5431_v14  }
 0x28a   : > { %v5434_v2 = vpop.permute.xlu0 %1802  ;;  %v5436_v9 = vpop.permute.xlu1 %1804 }
 0x28b   : > { %6854 = vst [vmem:[#allocation89_spill] sm:$0xff] %v5436_v9  ;;  %v5457_v9 = vld [vmem:[%s6701_s4 + $0xe0] sm:$0xff] }
 0x28c   : > { %2295 = vperm.xlu0 %3974, %v5441_v27   ;;  %2283 = vperm.xlu1 %3973, %v5447_v16  }
 0x28e   : > { %v5450_v57 = vpop.permute.xlu0 %2064  ;;  %v5452_v22 = vpop.permute.xlu1 %2062 }
 0x290   : > { %2303 = vperm.xlu0 %3974, %v5457_v9   ;;  %2291 = vperm.xlu1 %3973, %v5463_v8  }
 0x292   : > { %v5466_v35 = vpop.permute.xlu0 %2068  ;;  %v5468_v48 = vpop.permute.xlu1 %2066 }
 0x293   : > { %6855 = vst [vmem:[#allocation90_spill] sm:$0xff] %v5466_v35  ;;  %6856 = vst [vmem:[#allocation91_spill] sm:$0xff] %v5468_v48 }
 0x294   : > { %2311 = vperm.xlu0 %3974, %v5473_v56   ;;  %2299 = vperm.xlu1 %3973, %v5479_v5  }
 0x296   : > { %v5482_v25 = vpop.permute.xlu0 %2072  ;;  %v5484_v62 = vpop.permute.xlu1 %2070 }
 0x297   : > { %6857 = vst [vmem:[#allocation92_spill] sm:$0xff] %v5482_v25  ;;  %6858 = vst [vmem:[#allocation93_spill] sm:$0xff] %v5484_v62  ;;  %v5500_v25 = vld [vmem:[%s6701_s4 + $0xf8] sm:$0xff] }
 0x298   : > { %3975 = vset.pattern.permute.xlu0 %v4062_v53  ;;  %2307 = vperm.xlu1 %3973, %v5489_v38  }
 0x299   : > { %2387 = vperm.xlu0 %3975, %v5255_v3  }
 0x29a   : > { %v5493_v18 = vpop.permute.xlu0 %2076  ;;  %v5495_v21 = vpop.permute.xlu1 %2074 }
 0x29b   : > { %6859 = vst [vmem:[#allocation94_spill] sm:$0xff] %v5493_v18  ;;  %6860 = vst [vmem:[#allocation95_spill] sm:$0xff] %v5495_v21 }
 0x29c   : > { %2315 = vperm.xlu1 %3973, %v5500_v25  }
 0x29d   : > { %2399 = vperm.xlu0 %3975, %v5287_v63  }
 0x29e   : > { %v5504_v55 = vpop.permute.xlu0 %2080  ;;  %v5506_v4 = vpop.permute.xlu1 %2078 }
 0x29f   : > { %6861 = vst [vmem:[#allocation96_spill] sm:$0xff] %v5504_v55  ;;  %6862 = vst [vmem:[#allocation97_spill] sm:$0xff] %v5506_v4  ;;  %v4063_v4 = vmov 6  }
 0x2a0   : > { %3976 = vset.pattern.permute.xlu1 %v4062_v53 }
 0x2a1   : > { %2407 = vperm.xlu0 %3975, %v5303_v52   ;;  %2391 = vperm.xlu1 %3976, %v5249_v37  }
 0x2a2   : > { %v5510_v18 = vpop.permute.xlu0 %2084  ;;  %v5512_v21 = vpop.permute.xlu1 %2082 }
 0x2a3   : > { %6863 = vst [vmem:[#allocation98_spill] sm:$0xff] %v5510_v18  ;;  %6864 = vst [vmem:[#allocation99_spill] sm:$0xff] %v5512_v21 }
 0x2a5   : > { %2415 = vperm.xlu0 %3975, %v5319_v60   ;;  %2395 = vperm.xlu1 %3976, %v5271_v43  }
 0x2a6   : > { %v5516_v62 = vpop.permute.xlu0 %2088  ;;  %v5518_v54 = vpop.permute.xlu1 %2086 }
 0x2a7   : > { %6865 = vst [vmem:[#allocation100_spill] sm:$0xff] %v5516_v62  ;;  %6866 = vst [vmem:[#allocation101_spill] sm:$0xff] %v5518_v54 }
 0x2a9   : > { %2423 = vperm.xlu0 %3975, %v5335_v41   ;;  %2403 = vperm.xlu1 %3976, %v5265_v49  }
 0x2aa   : > { %v5522_v53 = vpop.permute.xlu0 %2092  ;;  %v5524_v55 = vpop.permute.xlu1 %2090 }
 0x2ab   : > { %6867 = vst [vmem:[#allocation102_spill] sm:$0xff] %v5522_v53  ;;  %6868 = vst [vmem:[#allocation103_spill] sm:$0xff] %v5524_v55 }
 0x2ad   : > { %2431 = vperm.xlu0 %3975, %v5351_v28   ;;  %2411 = vperm.xlu1 %3976, %v5281_v40  }
 0x2ae   : > { %v5528_v18 = vpop.permute.xlu0 %2096  ;;  %v5530_v21 = vpop.permute.xlu1 %2094 }
 0x2af   : > { %6869 = vst [vmem:[#allocation104_spill] sm:$0xff] %v5528_v18  ;;  %6870 = vst [vmem:[#allocation105_spill] sm:$0xff] %v5530_v21 }
 0x2b1   : > { %2439 = vperm.xlu0 %3975, %v5367_v32   ;;  %2419 = vperm.xlu1 %3976, %v5297_v33  }
 0x2b2   : > { %v5534_v62 = vpop.permute.xlu0 %2100  ;;  %v5536_v54 = vpop.permute.xlu1 %2098 }
 0x2b3   : > { %6871 = vst [vmem:[#allocation106_spill] sm:$0xff] %v5534_v62  ;;  %6872 = vst [vmem:[#allocation107_spill] sm:$0xff] %v5536_v54 }
 0x2b5   : > { %2447 = vperm.xlu0 %3975, %v5383_v7   ;;  %2427 = vperm.xlu1 %3976, %v5313_v12  }
 0x2b6   : > { %v5540_v53 = vpop.permute.xlu0 %2104  ;;  %v5542_v55 = vpop.permute.xlu1 %2102 }
 0x2b7   : > { %6873 = vst [vmem:[#allocation108_spill] sm:$0xff] %v5540_v53  ;;  %6874 = vst [vmem:[#allocation109_spill] sm:$0xff] %v5542_v55 }
 0x2b9   : > { %2455 = vperm.xlu0 %3975, %v5399_v59   ;;  %2435 = vperm.xlu1 %3976, %v5329_v58  }
 0x2ba   : > { %v5546_v18 = vpop.permute.xlu0 %2108  ;;  %v5548_v21 = vpop.permute.xlu1 %2106 }
 0x2bb   : > { %6875 = vst [vmem:[#allocation110_spill] sm:$0xff] %v5546_v18  ;;  %6876 = vst [vmem:[#allocation111_spill] sm:$0xff] %v5548_v21 }
 0x2bd   : > { %2463 = vperm.xlu0 %3975, %v5415_v50   ;;  %2443 = vperm.xlu1 %3976, %v5345_v46  }
 0x2be   : > { %v5552_v62 = vpop.permute.xlu0 %2112  ;;  %v5555_v54 = vpop.permute.xlu1 %2110 }
 0x2bf   : > { %6877 = vst [vmem:[#allocation112_spill] sm:$0xff] %v5552_v62  ;;  %6878 = vst [vmem:[#allocation113_spill] sm:$0xff] %v5555_v54 }
 0x2c1   : > { %2471 = vperm.xlu0 %3975, %v5431_v14   ;;  %2451 = vperm.xlu1 %3976, %v5361_v0  }
 0x2c2   : > { %v5560_v53 = vpop.permute.xlu0 %2116  ;;  %v5562_v18 = vpop.permute.xlu1 %2114 }
 0x2c3   : > { %6879 = vst [vmem:[#allocation114_spill] sm:$0xff] %v5560_v53  ;;  %6880 = vst [vmem:[#allocation115_spill] sm:$0xff] %v5562_v18 }
 0x2c5   : > { %2479 = vperm.xlu0 %3975, %v5447_v16   ;;  %2459 = vperm.xlu1 %3976, %v5377_v15  }
 0x2c6   : > { %v5566_v21 = vpop.permute.xlu0 %2120  ;;  %v5569_v62 = vpop.permute.xlu1 %2118 }
 0x2c7   : > { %6881 = vst [vmem:[#allocation116_spill] sm:$0xff] %v5566_v21  ;;  %6882 = vst [vmem:[#allocation117_spill] sm:$0xff] %v5569_v62 }
 0x2c9   : > { %2487 = vperm.xlu0 %3975, %v5463_v8   ;;  %2467 = vperm.xlu1 %3976, %v5393_v17  }
 0x2ca   : > { %v5574_v54 = vpop.permute.xlu0 %2124  ;;  %v5576_v53 = vpop.permute.xlu1 %2122 }
 0x2cb   : > { %6883 = vst [vmem:[#allocation118_spill] sm:$0xff] %v5574_v54 }
 0x2cd   : > { %2495 = vperm.xlu0 %3975, %v5479_v5   ;;  %2475 = vperm.xlu1 %3976, %v5409_v29  }
 0x2d1   : > { %2503 = vperm.xlu0 %3975, %v5489_v38   ;;  %2483 = vperm.xlu1 %3976, %v5425_v11  }
 0x2d5   : > { %2511 = vperm.xlu0 %3975, %v5500_v25   ;;  %2491 = vperm.xlu1 %3976, %v5441_v27  }
 0x2d7   : > { %v5580_v18 = vpop.permute.xlu0 %2195  ;;  %v5582_v21 = vpop.permute.xlu1 %2191 }
 0x2d9   : > { %2499 = vperm.xlu1 %3976, %v5457_v9   ;;  %3978 = vset.pattern.permute.xlu0 %v4063_v4 }
 0x2db   : > { %v5585_v62 = vpop.permute.xlu0 %2207  ;;  %v5587_v55 = vpop.permute.xlu1 %2199 }
 0x2dc   : > { %6884 = vst [vmem:[#allocation119_spill] sm:$0xff] %v5585_v62  ;;  %6885 = vst [vmem:[#allocation120_spill] sm:$0xff] %v5587_v55 }
 0x2dd   : > { %2507 = vperm.xlu1 %3976, %v5473_v56  }
 0x2df   : > { %v5590_v54 = vpop.permute.xlu0 %2215  ;;  %v5592_v42 = vpop.permute.xlu1 %2203 }
 0x2e0   : > { %6886 = vst [vmem:[#allocation121_spill] sm:$0xff] %v5590_v54  ;;  %6887 = vst [vmem:[#allocation122_spill] sm:$0xff] %v5592_v42 }
 0x2e1   : > { %3977 = vset.pattern.permute.xlu1 %v4063_v4 }
 0x2e3   : > { %v5594_v19 = vpop.permute.xlu0 %2223  ;;  %v5596_v35 = vpop.permute.xlu1 %2211 }
 0x2e4   : > { %6888 = vst [vmem:[#allocation123_spill] sm:$0xff] %v5594_v19  ;;  %6889 = vst [vmem:[#allocation124_spill] sm:$0xff] %v5596_v35 }
 0x2e7   : > { %v5598_v34 = vpop.permute.xlu0 %2231  ;;  %v5600_v31 = vpop.permute.xlu1 %2219 }
 0x2e8   : > { %6890 = vst [vmem:[#allocation125_spill] sm:$0xff] %v5598_v34  ;;  %6891 = vst [vmem:[#allocation126_spill] sm:$0xff] %v5600_v31 }
 0x2eb   : > { %v5602_v62 = vpop.permute.xlu0 %2239  ;;  %v5604_v23 = vpop.permute.xlu1 %2227 }
 0x2ec   : > { %6892 = vst [vmem:[#allocation127_spill] sm:$0xff] %v5602_v62  ;;  %6893 = vst [vmem:[#allocation128_spill] sm:$0xff] %v5604_v23 }
 0x2ef   : > { %v5606_v48 = vpop.permute.xlu0 %2247  ;;  %v5608_v36 = vpop.permute.xlu1 %2235 }
 0x2f0   : > { %6894 = vst [vmem:[#allocation129_spill] sm:$0xff] %v5606_v48  ;;  %6895 = vst [vmem:[#allocation130_spill] sm:$0xff] %v5608_v36 }
 0x2f3   : > { %v5610_v54 = vpop.permute.xlu0 %2255  ;;  %v5612_v42 = vpop.permute.xlu1 %2243 }
 0x2f4   : > { %6896 = vst [vmem:[#allocation131_spill] sm:$0xff] %v5610_v54  ;;  %6897 = vst [vmem:[#allocation132_spill] sm:$0xff] %v5612_v42 }
 0x2f7   : > { %v5614_v4 = vpop.permute.xlu0 %2263  ;;  %v5616_v19 = vpop.permute.xlu1 %2251 }
 0x2f8   : > { %6898 = vst [vmem:[#allocation133_spill] sm:$0xff] %v5614_v4  ;;  %6899 = vst [vmem:[#allocation134_spill] sm:$0xff] %v5616_v19 }
 0x2fb   : > { %v5618_v35 = vpop.permute.xlu0 %2271  ;;  %v5620_v34 = vpop.permute.xlu1 %2259 }
 0x2fc   : > { %6900 = vst [vmem:[#allocation135_spill] sm:$0xff] %v5618_v35  ;;  %6901 = vst [vmem:[#allocation136_spill] sm:$0xff] %v5620_v34 }
 0x2ff   : > { %v5622_v31 = vpop.permute.xlu0 %2279  ;;  %v5624_v62 = vpop.permute.xlu1 %2267 }
 0x300   : > { %6902 = vst [vmem:[#allocation137_spill] sm:$0xff] %v5622_v31  ;;  %6903 = vst [vmem:[#allocation138_spill] sm:$0xff] %v5624_v62 }
 0x303   : > { %v5626_v23 = vpop.permute.xlu0 %2287  ;;  %v5628_v48 = vpop.permute.xlu1 %2275 }
 0x304   : > { %6904 = vst [vmem:[#allocation139_spill] sm:$0xff] %v5626_v23  ;;  %6905 = vst [vmem:[#allocation140_spill] sm:$0xff] %v5628_v48 }
 0x307   : > { %v5630_v36 = vpop.permute.xlu0 %2295  ;;  %v5632_v54 = vpop.permute.xlu1 %2283 }
 0x308   : > { %6906 = vst [vmem:[#allocation141_spill] sm:$0xff] %v5630_v36  ;;  %6907 = vst [vmem:[#allocation142_spill] sm:$0xff] %v5632_v54 }
 0x30b   : > { %v5634_v42 = vpop.permute.xlu0 %2303  ;;  %v5636_v4 = vpop.permute.xlu1 %2291 }
 0x30c   : > { %6908 = vst [vmem:[#allocation143_spill] sm:$0xff] %v5634_v42  ;;  %6909 = vst [vmem:[#allocation144_spill] sm:$0xff] %v5636_v4 }
 0x30f   : > { %v5638_v19 = vpop.permute.xlu0 %2311  ;;  %v5640_v35 = vpop.permute.xlu1 %2299 }
 0x310   : > { %6910 = vst [vmem:[#allocation145_spill] sm:$0xff] %v5640_v35 }
 0x313   : > { %v5642_v34 = vpop.permute.xlu1 %2307 }
 0x314   : > { %6911 = vst [vmem:[#allocation146_spill] sm:$0xff] %v5642_v34  ;;  %v2388_v31 = vpop.permute.xlu0 %2387 }
 0x315   : > { %v2514_v62 = vmul.f32 %v2388_v31, %v4866_v13 }
 0x317   : > { %2578 = vrot.lane.b32.xlu1 %v2514_v62, %s4058_s9  ;;  %v5646_v23 = vpop.permute.xlu1 %2315 }
 0x318   : > { %6912 = vst [vmem:[#allocation147_spill] sm:$0xff] %v5646_v23  ;;  %v2400_v36 = vpop.permute.xlu0 %2399 }
 0x319   : > { %v2517_v35 = vmul.f32 %v2400_v36, %v4866_v13 }
 0x31c   : > { %v2408_v48 = vpop.permute.xlu0 %2407  ;;  %v2392_v54 = vpop.permute.xlu1 %2391 }
 0x31d   : > { %v2515_v42 = vmul.f32 %v2392_v54, %v4866_v13  ;;  %v2519_v23 = vmul.f32 %v2408_v48, %v4866_v13 }
 0x31f   : > { %2580 = vrot.lane.b32.xlu0 %v2515_v42, %s4058_s9 }
 0x320   : > { %v2416_v4 = vpop.permute.xlu0 %2415  ;;  %v2396_v47 = vpop.permute.xlu1 %2395 }
 0x321   : > { %v2516_v34 = vmul.f32 %v2396_v47, %v4866_v13  ;;  %v2521_v36 = vmul.f32 %v2416_v4, %v4866_v13 }
 0x323   : > { %2584 = vrot.lane.b32.xlu0 %v2517_v35, %s4058_s9  ;;  %2582 = vrot.lane.b32.xlu1 %v2516_v34, %s4058_s9 }
 0x324   : > { %v2424_v31 = vpop.permute.xlu0 %2423  ;;  %v2404_v62 = vpop.permute.xlu1 %2403 }
 0x325   : > { %v2518_v55 = vmul.f32 %v2404_v62, %v4866_v13  ;;  %v2523_v48 = vmul.f32 %v2424_v31, %v4866_v13 }
 0x327   : > { %2588 = vrot.lane.b32.xlu0 %v2519_v23, %s4058_s9  ;;  %2586 = vrot.lane.b32.xlu1 %v2518_v55, %s4058_s9 }
 0x328   : > { %v2432_v42 = vpop.permute.xlu0 %2431  ;;  %v2412_v54 = vpop.permute.xlu1 %2411 }
 0x329   : > { %v2520_v47 = vmul.f32 %v2412_v54, %v4866_v13  ;;  %v2525_v4 = vmul.f32 %v2432_v42, %v4866_v13 }
 0x32b   : > { %2592 = vrot.lane.b32.xlu0 %v2521_v36, %s4058_s9  ;;  %2590 = vrot.lane.b32.xlu1 %v2520_v47, %s4058_s9 }
 0x32c   : > { %v2440_v34 = vpop.permute.xlu0 %2439  ;;  %v2420_v35 = vpop.permute.xlu1 %2419 }
 0x32d   : > { %v2522_v62 = vmul.f32 %v2420_v35, %v4866_v13  ;;  %v2527_v31 = vmul.f32 %v2440_v34, %v4866_v13 }
 0x32f   : > { %2596 = vrot.lane.b32.xlu0 %v2523_v48, %s4058_s9  ;;  %2594 = vrot.lane.b32.xlu1 %v2522_v62, %s4058_s9 }
 0x330   : > { %v2448_v55 = vpop.permute.xlu0 %2447  ;;  %v2428_v23 = vpop.permute.xlu1 %2427 }
 0x331   : > { %v2524_v54 = vmul.f32 %v2428_v23, %v4866_v13  ;;  %v2529_v42 = vmul.f32 %v2448_v55, %v4866_v13 }
 0x333   : > { %2600 = vrot.lane.b32.xlu0 %v2525_v4, %s4058_s9  ;;  %2598 = vrot.lane.b32.xlu1 %v2524_v54, %s4058_s9 }
 0x334   : > { %v2456_v36 = vpop.permute.xlu0 %2455  ;;  %v2436_v47 = vpop.permute.xlu1 %2435 }
 0x335   : > { %v2526_v35 = vmul.f32 %v2436_v47, %v4866_v13  ;;  %v2531_v34 = vmul.f32 %v2456_v36, %v4866_v13 }
 0x337   : > { %2604 = vrot.lane.b32.xlu0 %v2527_v31, %s4058_s9  ;;  %2602 = vrot.lane.b32.xlu1 %v2526_v35, %s4058_s9 }
 0x338   : > { %v2464_v48 = vpop.permute.xlu0 %2463  ;;  %v2444_v62 = vpop.permute.xlu1 %2443 }
 0x339   : > { %v2528_v23 = vmul.f32 %v2444_v62, %v4866_v13  ;;  %v2533_v55 = vmul.f32 %v2464_v48, %v4866_v13 }
 0x33b   : > { %2608 = vrot.lane.b32.xlu0 %v2529_v42, %s4058_s9  ;;  %2606 = vrot.lane.b32.xlu1 %v2528_v23, %s4058_s9 }
 0x33c   : > { %v2472_v4 = vpop.permute.xlu0 %2471  ;;  %v2452_v54 = vpop.permute.xlu1 %2451 }
 0x33d   : > { %v2530_v47 = vmul.f32 %v2452_v54, %v4866_v13  ;;  %v2535_v36 = vmul.f32 %v2472_v4, %v4866_v13 }
 0x33f   : > { %2612 = vrot.lane.b32.xlu0 %v2531_v34, %s4058_s9  ;;  %2610 = vrot.lane.b32.xlu1 %v2530_v47, %s4058_s9 }
 0x340   : > { %v2480_v31 = vpop.permute.xlu0 %2479  ;;  %v2460_v35 = vpop.permute.xlu1 %2459 }
 0x341   : > { %v2532_v62 = vmul.f32 %v2460_v35, %v4866_v13  ;;  %v2537_v47 = vmul.f32 %v2480_v31, %v4866_v13 }
 0x343   : > { %2616 = vrot.lane.b32.xlu0 %v2533_v55, %s4058_s9  ;;  %2614 = vrot.lane.b32.xlu1 %v2532_v62, %s4058_s9 }
 0x344   : > { %v2488_v42 = vpop.permute.xlu0 %2487  ;;  %v2468_v23 = vpop.permute.xlu1 %2467 }
 0x345   : > { %v2534_v54 = vmul.f32 %v2468_v23, %v4866_v13  ;;  %v2539_v62 = vmul.f32 %v2488_v42, %v4866_v13 }
 0x347   : > { %2620 = vrot.lane.b32.xlu0 %v2535_v36, %s4058_s9  ;;  %2618 = vrot.lane.b32.xlu1 %v2534_v54, %s4058_s9 }
 0x348   : > { %v2476_v34 = vpop.permute.xlu1 %2475  ;;  %v2496_v35 = vpop.permute.xlu0 %2495 }
 0x349   : > { %v2536_v48 = vmul.f32 %v2476_v34, %v4866_v13  ;;  %v2541_v31 = vmul.f32 %v2496_v35, %v4866_v13 }
 0x34b   : > { %2624 = vrot.lane.b32.xlu0 %v2537_v47, %s4058_s9  ;;  %2622 = vrot.lane.b32.xlu1 %v2536_v48, %s4058_s9 }
 0x34c   : > { %v2484_v55 = vpop.permute.xlu1 %2483  ;;  %v2504_v23 = vpop.permute.xlu0 %2503 }
 0x34d   : > { %v2538_v4 = vmul.f32 %v2484_v55, %v4866_v13  ;;  %v2543_v47 = vmul.f32 %v2504_v23, %v4866_v13 }
 0x34f   : > { %2628 = vrot.lane.b32.xlu0 %v2539_v62, %s4058_s9  ;;  %2626 = vrot.lane.b32.xlu1 %v2538_v4, %s4058_s9 }
 0x350   : > { %v2492_v36 = vpop.permute.xlu1 %2491  ;;  %v2512_v48 = vpop.permute.xlu0 %2511 }
 0x351   : > { %v2540_v54 = vmul.f32 %v2492_v36, %v4866_v13  ;;  %v2545_v62 = vmul.f32 %v2512_v48, %v4866_v13 }
 0x353   : > { %2632 = vrot.lane.b32.xlu0 %v2541_v31, %s4058_s9  ;;  %2630 = vrot.lane.b32.xlu1 %v2540_v54, %s4058_s9 }
 0x354   : > { %v2500_v34 = vpop.permute.xlu1 %2499 }
 0x355   : > { %v2542_v42 = vmul.f32 %v2500_v34, %v4866_v13 }
 0x357   : > { %2636 = vrot.lane.b32.xlu0 %v2543_v47, %s4058_s9  ;;  %2634 = vrot.lane.b32.xlu1 %v2542_v42, %s4058_s9  ;;  %v4064_v47 = vmov 7  }
 0x358   : > { %v2508_v55 = vpop.permute.xlu1 %2507 }
 0x359   : > { %v2544_v35 = vmul.f32 %v2508_v55, %v4866_v13 }
 0x35b   : > { %2640 = vrot.lane.b32.xlu0 %v2545_v62, %s4058_s9  ;;  %2638 = vrot.lane.b32.xlu1 %v2544_v35, %s4058_s9 }
 0x35f   : > { %2711 = vperm.xlu0 %3978, %v5249_v37   ;;  %2707 = vperm.xlu1 %3977, %v5255_v3  }
 0x363   : > { %2723 = vperm.xlu0 %3978, %v5265_v49   ;;  %2715 = vperm.xlu1 %3977, %v5271_v43  }
 0x367   : > { %2731 = vperm.xlu0 %3978, %v5281_v40   ;;  %2719 = vperm.xlu1 %3977, %v5287_v63  }
 0x36b   : > { %2739 = vperm.xlu0 %3978, %v5297_v33   ;;  %2727 = vperm.xlu1 %3977, %v5303_v52  }
 0x36f   : > { %2747 = vperm.xlu0 %3978, %v5313_v12   ;;  %2735 = vperm.xlu1 %3977, %v5319_v60  }
 0x373   : > { %2755 = vperm.xlu0 %3978, %v5329_v58   ;;  %2743 = vperm.xlu1 %3977, %v5335_v41  }
 0x377   : > { %2763 = vperm.xlu0 %3978, %v5345_v46   ;;  %2751 = vperm.xlu1 %3977, %v5351_v28  }
 0x37b   : > { %2771 = vperm.xlu0 %3978, %v5361_v0   ;;  %2759 = vperm.xlu1 %3977, %v5367_v32  }
 0x37f   : > { %2779 = vperm.xlu0 %3978, %v5377_v15   ;;  %2767 = vperm.xlu1 %3977, %v5383_v7  }
 0x383   : > { %2787 = vperm.xlu0 %3978, %v5393_v17   ;;  %2775 = vperm.xlu1 %3977, %v5399_v59  }
 0x387   : > { %2795 = vperm.xlu0 %3978, %v5409_v29   ;;  %2783 = vperm.xlu1 %3977, %v5415_v50  }
 0x389   : > { %v5736_v4 = vpop.permute.xlu1 %2578 }
 0x38b   : > { %2803 = vperm.xlu0 %3978, %v5425_v11   ;;  %2791 = vperm.xlu1 %3977, %v5431_v14  }
 0x38f   : > { %2811 = vperm.xlu0 %3978, %v5441_v27   ;;  %2799 = vperm.xlu1 %3977, %v5447_v16  }
 0x391   : > { %v5738_v23 = vpop.permute.xlu0 %2580 }
 0x392   : > { %6913 = vst [vmem:[#allocation148_spill] sm:$0xff] %v5738_v23 }
 0x393   : > { %2819 = vperm.xlu0 %3978, %v5457_v9   ;;  %2807 = vperm.xlu1 %3977, %v5463_v8  }
 0x395   : > { %v5742_v36 = vpop.permute.xlu0 %2584  ;;  %v5744_v31 = vpop.permute.xlu1 %2582 }
 0x396   : > { %6914 = vst [vmem:[#allocation149_spill] sm:$0xff] %v5742_v36  ;;  %6915 = vst [vmem:[#allocation150_spill] sm:$0xff] %v5744_v31 }
 0x397   : > { %2827 = vperm.xlu0 %3978, %v5473_v56   ;;  %2815 = vperm.xlu1 %3977, %v5479_v5  }
 0x399   : > { %v5748_v54 = vpop.permute.xlu0 %2588  ;;  %v5750_v34 = vpop.permute.xlu1 %2586 }
 0x39a   : > { %6916 = vst [vmem:[#allocation151_spill] sm:$0xff] %v5748_v54  ;;  %6917 = vst [vmem:[#allocation152_spill] sm:$0xff] %v5750_v34 }
 0x39b   : > { %2823 = vperm.xlu1 %3977, %v5489_v38   ;;  %3979 = vset.pattern.permute.xlu0 %v4064_v47 }
 0x39d   : > { %v5753_v42 = vpop.permute.xlu0 %2592  ;;  %v5755_v48 = vpop.permute.xlu1 %2590 }
 0x39e   : > { %6918 = vst [vmem:[#allocation153_spill] sm:$0xff] %v5753_v42  ;;  %6919 = vst [vmem:[#allocation154_spill] sm:$0xff] %v5755_v48 }
 0x39f   : > { %2831 = vperm.xlu1 %3977, %v5500_v25  }
 0x3a1   : > { %v5758_v55 = vpop.permute.xlu0 %2596  ;;  %v5760_v62 = vpop.permute.xlu1 %2594 }
 0x3a2   : > { %6920 = vst [vmem:[#allocation155_spill] sm:$0xff] %v5758_v55  ;;  %6921 = vst [vmem:[#allocation156_spill] sm:$0xff] %v5760_v62 }
 0x3a3   : > { %3980 = vset.pattern.permute.xlu1 %v4064_v47 }
 0x3a5   : > { %v5762_v35 = vpop.permute.xlu0 %2600  ;;  %v5764_v54 = vpop.permute.xlu1 %2598 }
 0x3a6   : > { %6922 = vst [vmem:[#allocation157_spill] sm:$0xff] %v5762_v35  ;;  %6923 = vst [vmem:[#allocation158_spill] sm:$0xff] %v5764_v54 }
 0x3a9   : > { %v5766_v34 = vpop.permute.xlu0 %2604  ;;  %v5768_v36 = vpop.permute.xlu1 %2602 }
 0x3aa   : > { %6924 = vst [vmem:[#allocation159_spill] sm:$0xff] %v5766_v34  ;;  %6925 = vst [vmem:[#allocation160_spill] sm:$0xff] %v5768_v36 }
 0x3ad   : > { %v5770_v31 = vpop.permute.xlu0 %2608  ;;  %v5772_v42 = vpop.permute.xlu1 %2606 }
 0x3ae   : > { %6926 = vst [vmem:[#allocation161_spill] sm:$0xff] %v5770_v31  ;;  %6927 = vst [vmem:[#allocation162_spill] sm:$0xff] %v5772_v42 }
 0x3b1   : > { %v5774_v48 = vpop.permute.xlu0 %2612  ;;  %v5776_v23 = vpop.permute.xlu1 %2610 }
 0x3b2   : > { %6928 = vst [vmem:[#allocation163_spill] sm:$0xff] %v5774_v48  ;;  %6929 = vst [vmem:[#allocation164_spill] sm:$0xff] %v5776_v23 }
 0x3b5   : > { %v5778_v55 = vpop.permute.xlu0 %2616  ;;  %v5780_v62 = vpop.permute.xlu1 %2614 }
 0x3b6   : > { %6930 = vst [vmem:[#allocation165_spill] sm:$0xff] %v5778_v55  ;;  %6931 = vst [vmem:[#allocation166_spill] sm:$0xff] %v5780_v62 }
 0x3b9   : > { %v5782_v47 = vpop.permute.xlu0 %2620  ;;  %v5784_v35 = vpop.permute.xlu1 %2618 }
 0x3ba   : > { %6932 = vst [vmem:[#allocation167_spill] sm:$0xff] %v5782_v47  ;;  %6933 = vst [vmem:[#allocation168_spill] sm:$0xff] %v5784_v35 }
 0x3bd   : > { %v5786_v54 = vpop.permute.xlu0 %2624  ;;  %v5788_v34 = vpop.permute.xlu1 %2622 }
 0x3be   : > { %6934 = vst [vmem:[#allocation169_spill] sm:$0xff] %v5786_v54  ;;  %6935 = vst [vmem:[#allocation170_spill] sm:$0xff] %v5788_v34 }
 0x3c1   : > { %v5790_v36 = vpop.permute.xlu0 %2628  ;;  %v5792_v31 = vpop.permute.xlu1 %2626 }
 0x3c2   : > { %6936 = vst [vmem:[#allocation171_spill] sm:$0xff] %v5790_v36  ;;  %6937 = vst [vmem:[#allocation172_spill] sm:$0xff] %v5792_v31 }
 0x3c5   : > { %v5794_v42 = vpop.permute.xlu0 %2632  ;;  %v5796_v48 = vpop.permute.xlu1 %2630 }
 0x3c6   : > { %6938 = vst [vmem:[#allocation173_spill] sm:$0xff] %v5794_v42  ;;  %6939 = vst [vmem:[#allocation174_spill] sm:$0xff] %v5796_v48 }
 0x3c9   : > { %v5798_v23 = vpop.permute.xlu0 %2636  ;;  %v5800_v55 = vpop.permute.xlu1 %2634 }
 0x3ca   : > { %6940 = vst [vmem:[#allocation175_spill] sm:$0xff] %v5798_v23  ;;  %6941 = vst [vmem:[#allocation176_spill] sm:$0xff] %v5800_v55 }
 0x3cd   : > { %v5802_v62 = vpop.permute.xlu0 %2640  ;;  %v5804_v47 = vpop.permute.xlu1 %2638 }
 0x3ce   : > { %6942 = vst [vmem:[#allocation177_spill] sm:$0xff] %v5802_v62 }
 0x3da   : > { %v2712_v35 = vpop.permute.xlu0 %2711  ;;  %v2708_v54 = vpop.permute.xlu1 %2707 }
 0x3db   : > { %v2835_v34 = vmul.f32 %v2712_v35, %v4866_v13  ;;  %v2834_v36 = vmul.f32 %v2708_v54, %v4866_v13 }
 0x3dd   : > { %2900 = vrot.lane.b32.xlu1 %v2835_v34, %s4059_s21  ;;  %2898 = vrot.lane.b32.xlu0 %v2834_v36, %s4059_s21 }
 0x3de   : > { %v2724_v42 = vpop.permute.xlu0 %2723  ;;  %v2716_v48 = vpop.permute.xlu1 %2715 }
 0x3df   : > { %v2836_v23 = vmul.f32 %v2716_v48, %v4866_v13  ;;  %v2838_v31 = vmul.f32 %v2724_v42, %v4866_v13 }
 0x3e1   : > { %2902 = vrot.lane.b32.xlu0 %v2836_v23, %s4059_s21 }
 0x3e2   : > { %v2732_v55 = vpop.permute.xlu0 %2731  ;;  %v2720_v62 = vpop.permute.xlu1 %2719 }
 0x3e3   : > { %v2837_v20 = vmul.f32 %v2720_v62, %v4866_v13  ;;  %v2840_v36 = vmul.f32 %v2732_v55, %v4866_v13 }
 0x3e5   : > { %2906 = vrot.lane.b32.xlu0 %v2838_v31, %s4059_s21  ;;  %2904 = vrot.lane.b32.xlu1 %v2837_v20, %s4059_s21 }
 0x3e6   : > { %v2740_v54 = vpop.permute.xlu0 %2739  ;;  %v2728_v34 = vpop.permute.xlu1 %2727 }
 0x3e7   : > { %v2839_v35 = vmul.f32 %v2728_v34, %v4866_v13  ;;  %v2842_v42 = vmul.f32 %v2740_v54, %v4866_v13 }
 0x3e9   : > { %2910 = vrot.lane.b32.xlu0 %v2840_v36, %s4059_s21  ;;  %2908 = vrot.lane.b32.xlu1 %v2839_v35, %s4059_s21 }
 0x3ea   : > { %v2748_v23 = vpop.permute.xlu0 %2747  ;;  %v2736_v48 = vpop.permute.xlu1 %2735 }
 0x3eb   : > { %v2841_v62 = vmul.f32 %v2736_v48, %v4866_v13  ;;  %v2844_v55 = vmul.f32 %v2748_v23, %v4866_v13 }
 0x3ed   : > { %2914 = vrot.lane.b32.xlu0 %v2842_v42, %s4059_s21  ;;  %2912 = vrot.lane.b32.xlu1 %v2841_v62, %s4059_s21 }
 0x3ee   : > { %v2756_v20 = vpop.permute.xlu0 %2755  ;;  %v2744_v31 = vpop.permute.xlu1 %2743 }
 0x3ef   : > { %v2843_v34 = vmul.f32 %v2744_v31, %v4866_v13  ;;  %v2846_v54 = vmul.f32 %v2756_v20, %v4866_v13 }
 0x3f1   : > { %2918 = vrot.lane.b32.xlu0 %v2844_v55, %s4059_s21  ;;  %2916 = vrot.lane.b32.xlu1 %v2843_v34, %s4059_s21 }
 0x3f2   : > { %v2764_v36 = vpop.permute.xlu0 %2763  ;;  %v2752_v35 = vpop.permute.xlu1 %2751 }
 0x3f3   : > { %v2845_v48 = vmul.f32 %v2752_v35, %v4866_v13  ;;  %v2848_v23 = vmul.f32 %v2764_v36, %v4866_v13 }
 0x3f5   : > { %2922 = vrot.lane.b32.xlu0 %v2846_v54, %s4059_s21  ;;  %2920 = vrot.lane.b32.xlu1 %v2845_v48, %s4059_s21 }
 0x3f6   : > { %v2772_v42 = vpop.permute.xlu0 %2771  ;;  %v2760_v62 = vpop.permute.xlu1 %2759 }
 0x3f7   : > { %v2847_v31 = vmul.f32 %v2760_v62, %v4866_v13  ;;  %v2850_v20 = vmul.f32 %v2772_v42, %v4866_v13 }
 0x3f9   : > { %2926 = vrot.lane.b32.xlu0 %v2848_v23, %s4059_s21  ;;  %2924 = vrot.lane.b32.xlu1 %v2847_v31, %s4059_s21 }
 0x3fa   : > { %v2780_v55 = vpop.permute.xlu0 %2779  ;;  %v2768_v34 = vpop.permute.xlu1 %2767 }
 0x3fb   : > { %v2849_v35 = vmul.f32 %v2768_v34, %v4866_v13  ;;  %v2852_v36 = vmul.f32 %v2780_v55, %v4866_v13 }
 0x3fd   : > { %2930 = vrot.lane.b32.xlu0 %v2850_v20, %s4059_s21  ;;  %2928 = vrot.lane.b32.xlu1 %v2849_v35, %s4059_s21 }
 0x3fe   : > { %v2788_v54 = vpop.permute.xlu0 %2787  ;;  %v2776_v48 = vpop.permute.xlu1 %2775 }
 0x3ff   : > { %v2851_v62 = vmul.f32 %v2776_v48, %v4866_v13  ;;  %v2854_v42 = vmul.f32 %v2788_v54, %v4866_v13 }
 0x401   : > { %2934 = vrot.lane.b32.xlu0 %v2852_v36, %s4059_s21  ;;  %2932 = vrot.lane.b32.xlu1 %v2851_v62, %s4059_s21 }
 0x402   : > { %v2796_v23 = vpop.permute.xlu0 %2795  ;;  %v2784_v31 = vpop.permute.xlu1 %2783 }
 0x403   : > { %v2853_v34 = vmul.f32 %v2784_v31, %v4866_v13  ;;  %v2856_v55 = vmul.f32 %v2796_v23, %v4866_v13 }
 0x405   : > { %2938 = vrot.lane.b32.xlu0 %v2854_v42, %s4059_s21  ;;  %2936 = vrot.lane.b32.xlu1 %v2853_v34, %s4059_s21 }
 0x406   : > { %v2804_v20 = vpop.permute.xlu0 %2803  ;;  %v2792_v35 = vpop.permute.xlu1 %2791 }
 0x407   : > { %v2855_v48 = vmul.f32 %v2792_v35, %v4866_v13  ;;  %v2858_v54 = vmul.f32 %v2804_v20, %v4866_v13 }
 0x409   : > { %2942 = vrot.lane.b32.xlu0 %v2856_v55, %s4059_s21  ;;  %2940 = vrot.lane.b32.xlu1 %v2855_v48, %s4059_s21 }
 0x40a   : > { %v2812_v36 = vpop.permute.xlu0 %2811  ;;  %v2800_v62 = vpop.permute.xlu1 %2799 }
 0x40b   : > { %v2857_v31 = vmul.f32 %v2800_v62, %v4866_v13  ;;  %v2860_v23 = vmul.f32 %v2812_v36, %v4866_v13 }
 0x40d   : > { %2946 = vrot.lane.b32.xlu0 %v2858_v54, %s4059_s21  ;;  %2944 = vrot.lane.b32.xlu1 %v2857_v31, %s4059_s21 }
 0x40e   : > { %v2820_v42 = vpop.permute.xlu0 %2819  ;;  %v2808_v34 = vpop.permute.xlu1 %2807 }
 0x40f   : > { %v2859_v35 = vmul.f32 %v2808_v34, %v4866_v13  ;;  %v2862_v48 = vmul.f32 %v2820_v42, %v4866_v13  ;;  %v5877_v42 = vpop.f32.mrf.mxu1 }
 0x411   : > { %2950 = vrot.lane.b32.xlu0 %v2860_v23, %s4059_s21  ;;  %2948 = vrot.lane.b32.xlu1 %v2859_v35, %s4059_s21  ;;  %v5881_v35 = vpop.f32.mrf.mxu1 }
 0x412   : > { %v2816_v55 = vpop.permute.xlu1 %2815  ;;  %v2828_v62 = vpop.permute.xlu0 %2827 }
 0x413   : > { %v2861_v20 = vmul.f32 %v2816_v55, %v4866_v13  ;;  %v2864_v31 = vmul.f32 %v2828_v62, %v4866_v13  ;;  %v5885_v55 = vpop.f32.mrf.mxu1 }
 0x415   : > { %2954 = vrot.lane.b32.xlu0 %v2862_v48, %s4059_s21  ;;  %2952 = vrot.lane.b32.xlu1 %v2861_v20, %s4059_s21 }
 0x416   : > { %v2824_v54 = vpop.permute.xlu1 %2823 }
 0x417   : > { %v2863_v36 = vmul.f32 %v2824_v54, %v4866_v13 }
 0x419   : > { %2958 = vrot.lane.b32.xlu0 %v2864_v31, %s4059_s21  ;;  %2956 = vrot.lane.b32.xlu1 %v2863_v36, %s4059_s21 }
 0x41a   : > { %v2832_v34 = vpop.permute.xlu1 %2831 }
 0x41b   : > { %v2865_v23 = vmul.f32 %v2832_v34, %v4866_v13 }
 0x41d   : > { %3027 = vperm.xlu0 %3979, %v5255_v3   ;;  %2960 = vrot.lane.b32.xlu1 %v2865_v23, %s4059_s21 }
 0x421   : > { %3039 = vperm.xlu0 %3979, %v5287_v63   ;;  %3031 = vperm.xlu1 %3980, %v5249_v37  }
 0x425   : > { %3047 = vperm.xlu0 %3979, %v5303_v52   ;;  %3035 = vperm.xlu1 %3980, %v5271_v43  }
 0x429   : > { %3055 = vperm.xlu0 %3979, %v5319_v60   ;;  %3043 = vperm.xlu1 %3980, %v5265_v49   ;;  %v5889_v60 = vpop.f32.mrf.mxu1 }
 0x42d   : > { %3063 = vperm.xlu0 %3979, %v5335_v41   ;;  %3051 = vperm.xlu1 %3980, %v5281_v40   ;;  %v5893_v41 = vpop.f32.mrf.mxu1 }
 0x431   : > { %3071 = vperm.xlu0 %3979, %v5351_v28   ;;  %3059 = vperm.xlu1 %3980, %v5297_v33   ;;  %v5897_v28 = vpop.f32.mrf.mxu1 }
 0x435   : > { %3079 = vperm.xlu0 %3979, %v5367_v32   ;;  %3067 = vperm.xlu1 %3980, %v5313_v12   ;;  %v5901_v32 = vpop.f32.mrf.mxu1 }
 0x439   : > { %3087 = vperm.xlu0 %3979, %v5383_v7   ;;  %3075 = vperm.xlu1 %3980, %v5329_v58   ;;  %v5905_v7 = vpop.f32.mrf.mxu1 }
 0x43d   : > { %3095 = vperm.xlu0 %3979, %v5399_v59   ;;  %3083 = vperm.xlu1 %3980, %v5345_v46   ;;  %v5909_v59 = vpop.f32.mrf.mxu1 }
 0x441   : > { %3103 = vperm.xlu0 %3979, %v5415_v50   ;;  %3091 = vperm.xlu1 %3980, %v5361_v0   ;;  %v5915_v0 = vpop.f32.mrf.mxu1 }
 0x445   : > { %3111 = vperm.xlu0 %3979, %v5431_v14   ;;  %3099 = vperm.xlu1 %3980, %v5377_v15  }
 0x449   : > { %3119 = vperm.xlu0 %3979, %v5447_v16   ;;  %3107 = vperm.xlu1 %3980, %v5393_v17   ;;  %v5923_v16 = vpop.f32.mrf.mxu1 }
 0x44b   : > { %v5931_v12 = vpop.f32.mrf.mxu1 }
 0x44d   : > { %3127 = vperm.xlu0 %3979, %v5463_v8   ;;  %3115 = vperm.xlu1 %3980, %v5409_v29   ;;  %v5939_v17 = vpop.f32.mrf.mxu1  ;;  %v4065_v29 = vmov 8  }
 0x44f   : > { %v5913_v50 = vpop.permute.xlu0 %2898  ;;  %v5919_v14 = vpop.permute.xlu1 %2900 }
 0x451   : > { %3135 = vperm.xlu0 %3979, %v5479_v5   ;;  %3123 = vperm.xlu1 %3980, %v5425_v11   ;;  %v5947_v11 = vpop.f32.mrf.mxu1 }
 0x453   : > { %v5921_v46 = vpop.permute.xlu0 %2902  ;;  %v5954_v8 = vpop.f32.mrf.mxu1 }
 0x455   : > { %3143 = vperm.xlu0 %3979, %v5489_v38   ;;  %3131 = vperm.xlu1 %3980, %v5441_v27   ;;  %v5961_v49 = vpop.f32.mrf.mxu1 }
 0x457   : > { %v5927_v58 = vpop.permute.xlu0 %2906  ;;  %v5929_v15 = vpop.permute.xlu1 %2904 }
 0x459   : > { %3151 = vperm.xlu0 %3979, %v5500_v25   ;;  %3139 = vperm.xlu1 %3980, %v5457_v9  }
 0x45b   : > { %v5935_v5 = vpop.permute.xlu0 %2910  ;;  %v5937_v52 = vpop.permute.xlu1 %2908 }
 0x45d   : > { %3982 = vset.pattern.permute.xlu0 %v4065_v29  ;;  %3147 = vperm.xlu1 %3980, %v5473_v56  }
 0x45e   : > { %3351 = vperm.xlu0 %3982, %v5249_v37  }
 0x45f   : > { %v5943_v38 = vpop.permute.xlu0 %2914  ;;  %v5945_v33 = vpop.permute.xlu1 %2912 }
 0x461   : > { %3981 = vset.pattern.permute.xlu1 %v4065_v29 }
 0x462   : > { %3347 = vperm.xlu1 %3981, %v5255_v3   ;;  %v5968_v3 = vpop.f32.mrf.mxu1 }
 0x463   : > { %v5950_v25 = vpop.permute.xlu0 %2918  ;;  %v5952_v9 = vpop.permute.xlu1 %2916 }
 0x464   : > { %6943 = vst [vmem:[#allocation178_spill] sm:$0xff] %v5950_v25  ;;  %v5974_v62 = vpop.f32.mrf.mxu1 }
 0x466   : > { %3355 = vperm.xlu1 %3981, %v5271_v43   ;;  %v5980_v31 = vpop.f32.mrf.mxu1 }
 0x467   : > { %v5957_v56 = vpop.permute.xlu0 %2922  ;;  %v5959_v37 = vpop.permute.xlu1 %2920 }
 0x468   : > { %6944 = vst [vmem:[#allocation179_spill] sm:$0xff] %v5957_v56  ;;  %6945 = vst [vmem:[#allocation180_spill] sm:$0xff] %v5959_v37  ;;  %v813_v34 = vpop.f32.mrf.mxu1 }
 0x46a   : > { %3359 = vperm.xlu1 %3981, %v5287_v63  }
 0x46b   : > { %v5964_v27 = vpop.permute.xlu0 %2926  ;;  %v5966_v40 = vpop.permute.xlu1 %2924 }
 0x46c   : > { %6946 = vst [vmem:[#allocation181_spill] sm:$0xff] %v5964_v27  ;;  %6947 = vst [vmem:[#allocation182_spill] sm:$0xff] %v5966_v40 }
 0x46f   : > { %v5970_v48 = vpop.permute.xlu0 %2930  ;;  %v5972_v20 = vpop.permute.xlu1 %2928 }
 0x470   : > { %6948 = vst [vmem:[#allocation183_spill] sm:$0xff] %v5970_v48  ;;  %6949 = vst [vmem:[#allocation184_spill] sm:$0xff] %v5972_v20  ;;  %v6956_v48 = vld [vmem:[#allocation23_spill] sm:$0xff] }
 0x471   : > { %v1196_v20 = vmul.f32 %v4736_v1, %v6956_v48  ;;  %v2352_v48 = vmul.f32 %v4866_v13, %v5638_v19 }
 0x473   : > { %v5976_v43 = vpop.permute.xlu0 %2934  ;;  %v5978_v54 = vpop.permute.xlu1 %2932 }
 0x474   : > { %6950 = vst [vmem:[#allocation185_spill] sm:$0xff] %v5976_v43  ;;  %6951 = vst [vmem:[#allocation186_spill] sm:$0xff] %v5978_v54  ;;  %v5995_v43 = vld [vmem:[%s6704_s7] ss:$0 sm:$0xff] }
 0x475   : > { %v814_v54 = vadd.f32 %v5995_v43, %v813_v34 }
 0x477   : > { %v5982_v36 = vpop.permute.xlu0 %2938  ;;  %v5984_v63 = vpop.permute.xlu1 %2936 }
 0x478   : > { %6952 = vst [vmem:[#allocation187_spill] sm:$0xff] %v5982_v36  ;;  %6953 = vst [vmem:[#allocation188_spill] sm:$0xff] %v5984_v63  ;;  %v1228_v36 = vadd.f32 %v1196_v20, %v814_v54 }
 0x47a   : > { %v1548_v63 = vadd.f32 %v5208_v39, %v1228_v36 }
 0x47b   : > { %v5986_v23 = vpop.permute.xlu0 %2942  ;;  %v5988_v29 = vpop.permute.xlu1 %2940 }
 0x47c   : > { %6954 = vst [vmem:[#allocation189_spill] sm:$0xff] %v5986_v23  ;;  %6955 = vst [vmem:[#allocation190_spill] sm:$0xff] %v5988_v29  ;;  %v1868_v29 = vadd.f32 %v5434_v2, %v1548_v63 }
 0x47e   : > { %v2188_v56 = vadd.f32 %v5576_v53, %v1868_v29 }
 0x47f   : > { %v5998_v27 = vpop.permute.xlu0 %2946  ;;  %v6000_v40 = vpop.permute.xlu1 %2944 }
 0x480   : > { %6957 = vst [vmem:[#allocation23_spill] sm:$0xff] %v5998_v27  ;;  %6958 = vst [vmem:[#allocation191_spill] sm:$0xff] %v6000_v40  ;;  %v2384_v34 = vadd.f32 %v2352_v48, %v2188_v56 }
 0x482   : > { %v2704_v20 = vadd.f32 %v5804_v47, %v2384_v34  ;;  %v4016_v47 = vld [vmem:[%s6701_s4 + $0x20] sm:$0xff] }
 0x483   : > { %v6003_v23 = vpop.permute.xlu0 %2950  ;;  %v6009_v37 = vpop.permute.xlu1 %2948 }
 0x484   : > { %6959 = vst [vmem:[#allocation192_spill] sm:$0xff] %v6003_v23  ;;  %6960 = vst [vmem:[#allocation193_spill] sm:$0xff] %v6009_v37 }
 0x487   : > { %v6011_v25 = vpop.permute.xlu0 %2954  ;;  %v6014_v27 = vpop.permute.xlu1 %2952 }
 0x488   : > { %6961 = vst [vmem:[#allocation194_spill] sm:$0xff] %v6011_v25  ;;  %6962 = vst [vmem:[#allocation195_spill] sm:$0xff] %v6014_v27 }
 0x48b   : > { %v2959_v54 = vpop.permute.xlu0 %2958  ;;  %v6018_v36 = vpop.permute.xlu1 %2956 }
 0x48c   : > { %v6016_v39 = vadd.f32 %v2959_v54, %v2704_v20  ;;  %6964 = vst [vmem:[#allocation197_spill] sm:$0xff] %v6018_v36  ;;  %v4017_v20 = vld [vmem:[%s6701_s4 + $0x28] sm:$0xff] }
 0x48e   : > { %6963 = vst [vmem:[#allocation196_spill] sm:$0xff] %v6016_v39 }
 0x48f   : > { %v6020_v2 = vpop.permute.xlu1 %2960 }
 0x490   : > { %6965 = vst [vmem:[#allocation198_spill] sm:$0xff] %v6020_v2 }
 0x498   : > { %v3028_v63 = vpop.permute.xlu0 %3027 }
 0x499   : > { %v3154_v19 = vmul.f32 %v3028_v63, %v4866_v13 }
 0x49b   : > { %3218 = vrot.lane.b32.xlu0 %v3154_v19, %s4061_s22  ;;  %v4018_v19 = vld [vmem:[%s6701_s4 + $0x30] sm:$0xff] }
 0x49c   : > { %v3032_v53 = vpop.permute.xlu1 %3031  ;;  %v3040_v34 = vpop.permute.xlu0 %3039 }
 0x49d   : > { %v3155_v29 = vmul.f32 %v3032_v53, %v4866_v13  ;;  %v3157_v63 = vmul.f32 %v3040_v34, %v4866_v13 }
 0x49f   : > { %3363 = vperm.xlu0 %3982, %v4016_v47   ;;  %3220 = vrot.lane.b32.xlu1 %v3155_v29, %s4061_s22 }
 0x4a0   : > { %v3036_v56 = vpop.permute.xlu1 %3035  ;;  %v3048_v47 = vpop.permute.xlu0 %3047 }
 0x4a1   : > { %v3156_v48 = vmul.f32 %v3036_v56, %v4866_v13  ;;  %v4019_v56 = vld [vmem:[%s6701_s4 + $0x38] sm:$0xff]  ;;  %v3159_v34 = vmul.f32 %v3048_v47, %v4866_v13 }
 0x4a3   : > { %3367 = vperm.xlu0 %3982, %v4017_v20   ;;  %3222 = vrot.lane.b32.xlu1 %v3156_v48, %s4061_s22  ;;  %v4020_v20 = vld [vmem:[%s6701_s4 + $0x40] sm:$0xff] }
 0x4a4   : > { %v3044_v54 = vpop.permute.xlu1 %3043 }
 0x4a5   : > { %v3158_v29 = vmul.f32 %v3044_v54, %v4866_v13 }
 0x4a7   : > { %3371 = vperm.xlu0 %3982, %v4018_v19   ;;  %3224 = vrot.lane.b32.xlu1 %v3157_v63, %s4061_s22  ;;  %v3056_v19 = vpop.permute.xlu0 %3055 }
 0x4a8   : > { %v3052_v53 = vpop.permute.xlu1 %3051  ;;  %v3161_v47 = vmul.f32 %v3056_v19, %v4866_v13 }
 0x4a9   : > { %v3160_v54 = vmul.f32 %v3052_v53, %v4866_v13 }
 0x4ab   : > { %3375 = vperm.xlu0 %3982, %v4019_v56   ;;  %3226 = vrot.lane.b32.xlu1 %v3158_v29, %s4061_s22  ;;  %v4021_v56 = vld [vmem:[%s6701_s4 + $0x48] sm:$0xff]  ;;  %v3064_v39 = vpop.permute.xlu0 %3063 }
 0x4ac   : > { %v3060_v48 = vpop.permute.xlu1 %3059  ;;  %v3163_v19 = vmul.f32 %v3064_v39, %v4866_v13 }
 0x4ad   : > { %v3162_v53 = vmul.f32 %v3060_v48, %v4866_v13 }
 0x4af   : > { %3379 = vperm.xlu0 %3982, %v4020_v20   ;;  %3228 = vrot.lane.b32.xlu1 %v3159_v34, %s4061_s22  ;;  %v4022_v20 = vld [vmem:[%s6701_s4 + $0x50] sm:$0xff]  ;;  %v3072_v2 = vpop.permute.xlu0 %3071 }
 0x4b0   : > { %v3068_v63 = vpop.permute.xlu1 %3067  ;;  %v3165_v39 = vmul.f32 %v3072_v2, %v4866_v13 }
 0x4b1   : > { %v3164_v48 = vmul.f32 %v3068_v63, %v4866_v13 }
 0x4b3   : > { %3383 = vperm.xlu0 %3982, %v4021_v56   ;;  %3230 = vrot.lane.b32.xlu1 %v3160_v54, %s4061_s22  ;;  %v4023_v56 = vld [vmem:[%s6701_s4 + $0x58] sm:$0xff]  ;;  %v3080_v36 = vpop.permute.xlu0 %3079 }
 0x4b4   : > { %v3076_v29 = vpop.permute.xlu1 %3075  ;;  %v3167_v2 = vmul.f32 %v3080_v36, %v4866_v13 }
 0x4b5   : > { %v3166_v63 = vmul.f32 %v3076_v29, %v4866_v13 }
 0x4b7   : > { %3387 = vperm.xlu0 %3982, %v4022_v20   ;;  %3232 = vrot.lane.b32.xlu1 %v3161_v47, %s4061_s22  ;;  %v4024_v20 = vld [vmem:[%s6701_s4 + $0x60] sm:$0xff]  ;;  %v3088_v25 = vpop.permute.xlu0 %3087 }
 0x4b8   : > { %v3084_v34 = vpop.permute.xlu1 %3083 }
 0x4b9   : > { %v3168_v29 = vmul.f32 %v3084_v34, %v4866_v13 }
 0x4bb   : > { %3391 = vperm.xlu0 %3982, %v4023_v56   ;;  %3234 = vrot.lane.b32.xlu1 %v3162_v53, %s4061_s22  ;;  %v4025_v56 = vld [vmem:[%s6701_s4 + $0x68] sm:$0xff] }
 0x4bc   : > { %v3092_v54 = vpop.permute.xlu1 %3091 }
 0x4bd   : > { %v3170_v27 = vmul.f32 %v3092_v54, %v4866_v13 }
 0x4bf   : > { %3395 = vperm.xlu0 %3982, %v4024_v20   ;;  %3236 = vrot.lane.b32.xlu1 %v3163_v19, %s4061_s22  ;;  %v4026_v20 = vld [vmem:[%s6701_s4 + $0x70] sm:$0xff] }
 0x4c0   : > { %v3100_v47 = vpop.permute.xlu1 %3099 }
 0x4c1   : > { %v3172_v54 = vmul.f32 %v3100_v47, %v4866_v13  ;;  %v4034_v47 = vld [vmem:[%s6701_s4 + $0xb0] sm:$0xff] }
 0x4c3   : > { %3399 = vperm.xlu0 %3982, %v4025_v56   ;;  %3238 = vrot.lane.b32.xlu1 %v3164_v48, %s4061_s22  ;;  %v4027_v56 = vld [vmem:[%s6701_s4 + $0x78] sm:$0xff] }
 0x4c4   : > { %v3108_v53 = vpop.permute.xlu1 %3107 }
 0x4c7   : > { %3403 = vperm.xlu0 %3982, %v4026_v20   ;;  %3240 = vrot.lane.b32.xlu1 %v3165_v39, %s4061_s22  ;;  %v4028_v20 = vld [vmem:[%s6701_s4 + $0x80] sm:$0xff] }
 0x4c8   : > { %v3116_v19 = vpop.permute.xlu1 %3115 }
 0x4cb   : > { %3407 = vperm.xlu0 %3982, %v4027_v56   ;;  %3242 = vrot.lane.b32.xlu1 %v3166_v63, %s4061_s22  ;;  %v4029_v56 = vld [vmem:[%s6701_s4 + $0x88] sm:$0xff]  ;;  %v3169_v63 = vmul.f32 %v3088_v25, %v4866_v13 }
 0x4cc   : > { %v3124_v48 = vpop.permute.xlu1 %3123 }
 0x4cf   : > { %3411 = vperm.xlu0 %3982, %v4028_v20   ;;  %3244 = vrot.lane.b32.xlu1 %v3167_v2, %s4061_s22  ;;  %v4030_v2 = vld [vmem:[%s6701_s4 + $0x90] sm:$0xff]  ;;  %v3096_v20 = vpop.permute.xlu0 %3095 }
 0x4d0   : > { %v6089_v39 = vpop.permute.xlu1 %3131  ;;  %v3171_v25 = vmul.f32 %v3096_v20, %v4866_v13 }
 0x4d3   : > { %3415 = vperm.xlu0 %3982, %v4029_v56   ;;  %3246 = vrot.lane.b32.xlu1 %v3168_v29, %s4061_s22  ;;  %v4031_v29 = vld [vmem:[%s6701_s4 + $0x98] sm:$0xff] }
 0x4d4   : > { %v6096_v36 = vpop.permute.xlu1 %3139 }
 0x4d7   : > { %3419 = vperm.xlu0 %3982, %v4030_v2   ;;  %3248 = vrot.lane.b32.xlu1 %v3169_v63, %s4061_s22  ;;  %v3104_v2 = vpop.permute.xlu0 %3103  ;;  %v4032_v63 = vld [vmem:[%s6701_s4 + $0xa0] sm:$0xff] }
 0x4d8   : > { %v6103_v34 = vpop.permute.xlu1 %3147  ;;  %v3173_v20 = vmul.f32 %v3104_v2, %v4866_v13  ;;  %v4036_v2 = vld [vmem:[%s6701_s4 + $0xc0] sm:$0xff] }
 0x4db   : > { %3423 = vperm.xlu0 %3982, %v4031_v29   ;;  %3250 = vrot.lane.b32.xlu1 %v3170_v27, %s4061_s22  ;;  %v4033_v27 = vld [vmem:[%s6701_s4 + $0xa8] sm:$0xff] }
 0x4dd   : > { %v3348_v56 = vpop.permute.xlu1 %3347 }
 0x4de   : > { %v6112_v23 = vmul.f32 %v4870_v24, %v3348_v56  ;;  %v3112_v56 = vpop.permute.xlu0 %3111 }
 0x4df   : > { %3427 = vperm.xlu0 %3982, %v4032_v63   ;;  %3252 = vrot.lane.b32.xlu1 %v3171_v25, %s4061_s22 }
 0x4e1   : > { %v3356_v37 = vpop.permute.xlu1 %3355 }
 0x4e2   : > { %v6120_v29 = vmul.f32 %v4870_v24, %v3356_v37  ;;  %v3174_v37 = vmul.f32 %v3108_v53, %v4866_v13  ;;  %v3120_v25 = vpop.permute.xlu0 %3119  ;;  %v3176_v53 = vmul.f32 %v3116_v19, %v4866_v13  ;;  %v4039_v19 = vld [vmem:[%s6701_s4 + $0xd8] sm:$0xff] }
 0x4e3   : > { %3431 = vperm.xlu0 %3982, %v4033_v27   ;;  %3254 = vrot.lane.b32.xlu1 %v3172_v54, %s4061_s22  ;;  %v4035_v54 = vld [vmem:[%s6701_s4 + $0xb8] sm:$0xff] }
 0x4e5   : > { %v3360_v40 = vpop.permute.xlu1 %3359 }
 0x4e6   : > { %v6128_v63 = vmul.f32 %v4870_v24, %v3360_v40  ;;  %v3175_v40 = vmul.f32 %v3112_v56, %v4866_v13  ;;  %v3128_v27 = vpop.permute.xlu0 %3127 }
 0x4e7   : > { %3435 = vperm.xlu0 %3982, %v4034_v47   ;;  %3256 = vrot.lane.b32.xlu1 %v3173_v20, %s4061_s22  ;;  %v4037_v20 = vld [vmem:[%s6701_s4 + $0xc8] sm:$0xff]  ;;  %v3177_v47 = vmul.f32 %v3120_v25, %v4866_v13 }
 0x4ea   : > { %v3136_v56 = vpop.permute.xlu0 %3135 }
 0x4eb   : > { %3439 = vperm.xlu0 %3982, %v4035_v54   ;;  %3258 = vrot.lane.b32.xlu1 %v3174_v37, %s4061_s22  ;;  %v4038_v37 = vld [vmem:[%s6701_s4 + $0xd0] sm:$0xff]  ;;  %v3178_v54 = vmul.f32 %v3124_v48, %v4866_v13  ;;  %v6168_v48 = vadd.f32 %v5995_v43, %v5877_v42  ;;  %v3180_v42 = vmul.f32 %v6089_v39, %v4866_v13 }
 0x4ec   : > { %v6208_v39 = vadd.f32 %v5995_v43, %v5915_v0  ;;  %v2322_v0 = vmul.f32 %v4866_v13, %v5582_v21  ;;  %v6250_v21 = vadd.f32 %v5995_v43, %v5968_v3  ;;  %v4042_v3 = vld [vmem:[%s6701_s4 + $0xf0] sm:$0xff] }
 0x4ee   : > { %v6160_v25 = vpop.permute.xlu0 %3143  ;;  %6970 = vst [vmem:[#allocation201_spill] sm:$0xff] %v6250_v21 }
 0x4ef   : > { %3443 = vperm.xlu0 %3982, %v4036_v2   ;;  %3260 = vrot.lane.b32.xlu1 %v3175_v40, %s4061_s22  ;;  %v3179_v40 = vmul.f32 %v3128_v27, %v4866_v13  ;;  %v4040_v2 = vld [vmem:[%s6701_s4 + $0xe0] sm:$0xff]  ;;  %v6176_v27 = vadd.f32 %v5995_v43, %v5885_v55  ;;  %v6198_v55 = vadd.f32 %v5995_v43, %v5905_v7  ;;  %v4041_v7 = vld [vmem:[%s6701_s4 + $0xe8] sm:$0xff] }
 0x4f3   : > { %3447 = vperm.xlu0 %3982, %v4037_v20   ;;  %3262 = vrot.lane.b32.xlu1 %v3176_v53, %s4061_s22  ;;  %v6172_v53 = vadd.f32 %v5995_v43, %v5881_v35  ;;  %v6180_v20 = vadd.f32 %v5995_v43, %v5889_v60  ;;  %v6194_v35 = vadd.f32 %v5995_v43, %v5901_v32  ;;  %v6214_v32 = vpop.permute.xlu0 %3151 }
 0x4f4   : > { %v1518_v60 = vadd.f32 %v5058_v10, %v4827_v26  ;;  %v6222_v26 = vadd.f32 %v5995_v43, %v5931_v12  ;;  %v6226_v10 = vadd.f32 %v5995_v43, %v5939_v17  ;;  %v3181_v17 = vmul.f32 %v3136_v56, %v4866_v13 }
 0x4f5   : > { %v6261_v56 = vadd.f32 %v5995_v43, %v5980_v31  ;;  %v6975_v31 = vld [vmem:[#allocation3_spill] sm:$0xff] }
 0x4f6   : > { %6966 = vst [vmem:[#allocation199_spill] sm:$0xff] %v6226_v10 }
 0x4f7   : > { %3451 = vperm.xlu0 %3982, %v4038_v37   ;;  %3264 = vrot.lane.b32.xlu1 %v3177_v47, %s4061_s22  ;;  %v6184_v47 = vadd.f32 %v5995_v43, %v5893_v41  ;;  %v6190_v37 = vadd.f32 %v5995_v43, %v5897_v28  ;;  %v6204_v41 = vadd.f32 %v5995_v43, %v5909_v59 }
 0x4f8   : > { %v6212_v28 = vadd.f32 %v5995_v43, %v5923_v16  ;;  %v1838_v59 = vadd.f32 %v5214_v45, %v1518_v60  ;;  %v6233_v16 = vadd.f32 %v5995_v43, %v5947_v11  ;;  %v6246_v45 = vadd.f32 %v5995_v43, %v5961_v49  ;;  %6972 = vst [vmem:[#allocation203_spill] sm:$0xff] %v6261_v56  ;;  %v6976_v60 = vld [vmem:[#allocation8_spill] sm:$0xff] }
 0x4f9   : > { %v1519_v11 = vadd.f32 %v5054_v6, %v4830_v44  ;;  %v6974_v44 = vld [vmem:[#allocation6_spill] sm:$0xff]  ;;  %v6986_v56 = vld [vmem:[#allocation24_spill] sm:$0xff] }
 0x4fa   : > { %v6273_v6 = vmul.f32 %v4736_v1, %v6974_v44 }
 0x4fb   : > { %3455 = vperm.xlu0 %3982, %v4039_v19   ;;  %3266 = vrot.lane.b32.xlu1 %v3178_v54, %s4061_s22  ;;  %v6237_v54 = vadd.f32 %v5995_v43, %v5954_v8  ;;  %v6968_v19 = vld [vmem:[#allocation49_spill] sm:$0xff]  ;;  %v2158_v8 = vadd.f32 %v5452_v22, %v1838_v59  ;;  %v1839_v22 = vadd.f32 %v5218_v51, %v1519_v11  ;;  %v3352_v51 = vpop.permute.xlu0 %3351  ;;  %v6978_v11 = vld [vmem:[#allocation10_spill] sm:$0xff] }
 0x4fc   : > { %v6241_v12 = vadd.f32 %v5995_v43, %v6968_v19  ;;  %6969 = vst [vmem:[#allocation49_spill] sm:$0xff] %v6246_v45  ;;  %v6977_v59 = vld [vmem:[#allocation5_spill] sm:$0xff] }
 0x4fd   : > { %6967 = vst [vmem:[#allocation200_spill] sm:$0xff] %v6237_v54  ;;  %v6288_v19 = vmul.f32 %v4736_v1, %v6977_v59 }
 0x4ff   : > { %3459 = vperm.xlu0 %3982, %v4040_v2   ;;  %3268 = vrot.lane.b32.xlu1 %v3179_v40, %s4061_s22  ;;  %v6257_v40 = vadd.f32 %v5995_v43, %v5974_v62  ;;  %v6973_v2 = vld [vmem:[#allocation4_spill] sm:$0xff]  ;;  %v2323_v62 = vmul.f32 %v4866_v13, %v5580_v18  ;;  %v2354_v43 = vadd.f32 %v2322_v0, %v2158_v8 }
 0x500   : > { %v6265_v49 = vmul.f32 %v4736_v1, %v6973_v2  ;;  %v6294_v18 = vmul.f32 %v4736_v1, %v6978_v11  ;;  %v1520_v0 = vadd.f32 %v5068_v30, %v4832_v61  ;;  %v2159_v8 = vadd.f32 %v5450_v57, %v1839_v22  ;;  %v4043_v61 = vld [vmem:[%s6701_s4 + $0xf8] sm:$0xff] }
 0x501   : > { %6971 = vst [vmem:[#allocation202_spill] sm:$0xff] %v6257_v40  ;;  %v2674_v2 = vadd.f32 %v5736_v4, %v2354_v43  ;;  %v6982_v30 = vld [vmem:[#allocation53_spill] sm:$0xff]  ;;  %v6983_v4 = vld [vmem:[#allocation120_spill] sm:$0xff] }
 0x502   : > { %v1840_v57 = vadd.f32 %v6982_v30, %v1520_v0  ;;  %v2324_v22 = vmul.f32 %v4866_v13, %v6983_v4  ;;  %v2355_v43 = vadd.f32 %v2323_v62, %v2159_v8  ;;  %v6987_v30 = vld [vmem:[#allocation11_spill] sm:$0xff]  ;;  %v6989_v8 = vld [vmem:[#allocation148_spill] sm:$0xff] }
 0x503   : > { %3463 = vperm.xlu0 %3982, %v4041_v7   ;;  %3270 = vrot.lane.b32.xlu1 %v3180_v42, %s4061_s22  ;;  %v6280_v42 = vmul.f32 %v4736_v1, %v6975_v31  ;;  %v6284_v7 = vmul.f32 %v4736_v1, %v6976_v60  ;;  %v6980_v31 = vld [vmem:[#allocation12_spill] sm:$0xff]  ;;  %v2994_v11 = vadd.f32 %v5913_v50, %v2674_v2  ;;  %v6988_v62 = vld [vmem:[#allocation91_spill] sm:$0xff] }
 0x504   : > { %v6306_v60 = vmul.f32 %v4736_v1, %v6980_v31  ;;  %v6332_v4 = vmul.f32 %v4736_v1, %v6987_v30  ;;  %v2160_v50 = vadd.f32 %v6988_v62, %v1840_v57  ;;  %v2675_v2 = vadd.f32 %v6989_v8, %v2355_v43  ;;  %v6990_v40 = vld [vmem:[#allocation16_spill] sm:$0xff]  ;;  %v6997_v62 = vld [vmem:[#allocation25_spill] sm:$0xff] }
 0x505   : > { %v6338_v54 = vmul.f32 %v4736_v1, %v6990_v40  ;;  %v6994_v40 = vld [vmem:[#allocation18_spill] sm:$0xff] }
 0x506   : > { %v2356_v57 = vadd.f32 %v2324_v22, %v2160_v50  ;;  %v2995_v43 = vadd.f32 %v5919_v14, %v2675_v2  ;;  %v3479_v22 = vmul.f32 %v4870_v24, %v3352_v51 }
 0x507   : > { %3467 = vperm.xlu0 %3982, %v4042_v3   ;;  %3272 = vrot.lane.b32.xlu1 %v3181_v17, %s4061_s22  ;;  %v3182_v17 = vmul.f32 %v6096_v36, %v4866_v13  ;;  %v6979_v3 = vld [vmem:[#allocation7_spill] sm:$0xff]  ;;  %v6981_v36 = vld [vmem:[#allocation9_spill] sm:$0xff] }
 0x508   : > { %v6302_v44 = vmul.f32 %v4736_v1, %v6979_v3  ;;  %v6310_v59 = vmul.f32 %v4736_v1, %v6981_v36  ;;  %v6984_v3 = vld [vmem:[#allocation14_spill] sm:$0xff]  ;;  %v6985_v36 = vld [vmem:[#allocation55_spill] sm:$0xff] }
 0x509   : > { %v6322_v31 = vmul.f32 %v4736_v1, %v6984_v3  ;;  %v1521_v21 = vadd.f32 %v6986_v56, %v6985_v36  ;;  %v6991_v56 = vld [vmem:[#allocation54_spill] sm:$0xff] }
 0x50b   : > { %3471 = vperm.xlu0 %3982, %v4043_v61   ;;  %3274 = vrot.lane.b32.xlu1 %v3182_v17, %s4061_s22  ;;  %v3183_v61 = vmul.f32 %v6160_v25, %v4866_v13  ;;  %v3184_v17 = vmul.f32 %v6103_v34, %v4866_v13  ;;  %v1841_v36 = vadd.f32 %v6991_v56, %v1521_v21  ;;  %v6992_v25 = vld [vmem:[#allocation122_spill] sm:$0xff]  ;;  %v6993_v34 = vld [vmem:[#allocation13_spill] sm:$0xff]  ;;  %v6996_v21 = vld [vmem:[#allocation56_spill] sm:$0xff] }
 0x50c   : > { %v2325_v45 = vmul.f32 %v4866_v13, %v6992_v25  ;;  %v6347_v30 = vmul.f32 %v4736_v1, %v6993_v34  ;;  %v1522_v8 = vadd.f32 %v6997_v62, %v6996_v21  ;;  %v6998_v56 = vld [vmem:[#allocation90_spill] sm:$0xff]  ;;  %v7006_v62 = vld [vmem:[#allocation57_spill] sm:$0xff] }
 0x50d   : > { %v3219_v0 = vpop.permute.xlu0 %3218  ;;  %v6999_v34 = vld [vmem:[#allocation150_spill] sm:$0xff] }
 0x50e   : > { %v3314_v3 = vadd.f32 %v3219_v0, %v2994_v11  ;;  %v6353_v0 = vmul.f32 %v4736_v1, %v6994_v40  ;;  %v2676_v10 = vadd.f32 %v6999_v34, %v2356_v57 }
 0x50f   : > { %3276 = vrot.lane.b32.xlu1 %v3183_v61, %s4061_s22  ;;  %3278 = vrot.lane.b32.xlu0 %v3184_v17, %s4061_s22  ;;  %v2161_v61 = vadd.f32 %v6998_v56, %v1841_v36  ;;  %v3185_v17 = vmul.f32 %v6214_v32, %v4866_v13  ;;  %v7002_v36 = vld [vmem:[#allocation15_spill] sm:$0xff]  ;;  %v7004_v32 = vld [vmem:[#allocation20_spill] sm:$0xff] }
 0x510   : > { %v3510_v11 = vadd.f32 %v6112_v23, %v3314_v3  ;;  %6995 = vst [vmem:[#allocation4_spill] sm:$0xff] %v6353_v0  ;;  %v7000_v23 = vld [vmem:[#allocation63_spill] sm:$0xff]  ;;  %v6368_v21 = vmul.f32 %v4736_v1, %v7002_v36  ;;  %v6372_v57 = vmul.f32 %v4736_v1, %v7004_v32  ;;  %v2996_v51 = vadd.f32 %v5921_v46, %v2676_v10  ;;  %v7013_v10 = vld [vmem:[#allocation124_spill] sm:$0xff] }
 0x511   : > { %v3221_v25 = vpop.permute.xlu1 %3220  ;;  %v1842_v2 = vadd.f32 %v7000_v23, %v1522_v8  ;;  %v7001_v3 = vld [vmem:[#allocation119_spill] sm:$0xff]  ;;  %v2357_v0 = vadd.f32 %v2325_v45, %v2161_v61  ;;  %v7009_v45 = vld [vmem:[#allocation149_spill] sm:$0xff] }
 0x512   : > { %v3574_v14 = vmul.f32 0.2, %v3510_v11  ;;  %v3315_v50 = vadd.f32 %v3221_v25, %v2995_v43  ;;  %v2326_v40 = vmul.f32 %v4866_v13, %v7001_v3  ;;  %vm3542_vm5 = vcmp.gt.f32.partialorder %v3510_v11, 0.0  ;;  %7003 = vst [vmem:[#allocation6_spill] sm:$0xff] %v6368_v21  ;;  %7005 = vst [vmem:[#allocation3_spill] sm:$0xff] %v6372_v57  ;;  %v7007_v8 = vld [vmem:[#allocation27_spill] sm:$0xff] }
 0x513   : > { %3280 = vrot.lane.b32.xlu1 %v3185_v17, %s4061_s22  ;;  %v1523_v56 = vadd.f32 %v7007_v8, %v7006_v62  ;;  %v7008_v25 = vld [vmem:[#allocation93_spill] sm:$0xff]  ;;  %v2677_v61 = vadd.f32 %v7009_v45, %v2357_v0  ;;  %v7012_v57 = vld [vmem:[#allocation64_spill] sm:$0xff]  ;;  %v7014_v62 = vld [vmem:[#allocation58_spill] sm:$0xff] }
 0x514   : > { %v3511_v43 = vadd.f32 %v3479_v22, %v3315_v50  ;;  %v2162_v34 = vadd.f32 %v7008_v25, %v1842_v2  ;;  %v3606_v23 = vsel %vm3542_vm5, %v3510_v11, %v3574_v14  ;;  %v7010_v21 = vld [vmem:[#allocation17_spill] sm:$0xff]  ;;  %v2327_v22 = vmul.f32 %v4866_v13, %v7013_v10  ;;  %v7016_v14 = vld [vmem:[#allocation92_spill] sm:$0xff] }
 0x515   : > { %v3223_v17 = vpop.permute.xlu1 %3222  ;;  %v6381_v32 = vmul.f32 %v4736_v1, %v7010_v21  ;;  %v1843_v46 = vadd.f32 %v7012_v57, %v1523_v56  ;;  %v7015_v2 = vld [vmem:[#allocation29_spill] sm:$0xff]  ;;  %v2997_v0 = vadd.f32 %v5929_v15, %v2677_v61  ;;  %v7017_v45 = vld [vmem:[#allocation152_spill] sm:$0xff]  ;;  %v3639_v21 = vsel %vm3638_vm6, %v3606_v23, 0.0  ;;  %v7022_v23 = vld [vmem:[#allocation26_spill] sm:$0xff] }
 0x516   : > { %vm3543_vm7 = vcmp.gt.f32.partialorder %v3511_v43, 0.0  ;;  %v3575_v3 = vmul.f32 0.2, %v3511_v43  ;;  %v3316_v36 = vadd.f32 %v3223_v17, %v2996_v51  ;;  %v2358_v50 = vadd.f32 %v2326_v40, %v2162_v34  ;;  %v7020_v61 = vld [vmem:[#allocation121_spill] sm:$0xff] }
 0x517   : > { %7011 = vst [vmem:[#allocation8_spill] sm:$0xff] %v6381_v32  ;;  %v1524_v8 = vadd.f32 %v7015_v2, %v7014_v62  ;;  %v2163_v51 = vadd.f32 %v7016_v14, %v1843_v46  ;;  %v7018_v62 = vld [vmem:[#allocation22_spill] sm:$0xff]  ;;  %v7021_v46 = vld [vmem:[#allocation59_spill] sm:$0xff] }
 0x518   : > { %v3607_v25 = vsel %vm3543_vm7, %v3511_v43, %v3575_v3  ;;  %v3512_v11 = vadd.f32 %v6120_v29, %v3316_v36  ;;  %v2678_v17 = vadd.f32 %v7017_v45, %v2358_v50  ;;  %v6396_v15 = vmul.f32 %v4736_v1, %v7018_v62  ;;  %v7019_v43 = vld [vmem:[#allocation65_spill] sm:$0xff] }
 0x519   : > { %v3640_v57 = vsel %vm3638_vm6, %v3607_v25, 0.0  ;;  %v3225_v56 = vpop.permute.xlu1 %3224  ;;  %v1844_v29 = vadd.f32 %v7019_v43, %v1524_v8  ;;  %v2328_v3 = vmul.f32 %v4866_v13, %v7020_v61  ;;  %v2359_v36 = vadd.f32 %v2327_v22, %v2163_v51 }
 0x51a   : > { %v3641_v32 = vadd.f32 %v3640_v57, %v3639_v21  ;;  %vm3544_vm8 = vcmp.gt.f32.partialorder %v3512_v11, 0.0  ;;  %v3576_v40 = vmul.f32 0.2, %v3512_v11  ;;  %v3317_v34 = vadd.f32 %v3225_v56, %v2997_v0  ;;  %v3364_v10 = vpop.permute.xlu0 %3363  ;;  %v7023_v0 = vld [vmem:[#allocation95_spill] sm:$0xff] }
 0x51b   : > { %v1525_v50 = vadd.f32 %v7022_v23, %v7021_v46  ;;  %v2998_v2 = vadd.f32 %v5927_v58, %v2678_v17  ;;  %v2164_v45 = vadd.f32 %v7023_v0, %v1844_v29  ;;  %v7024_v21 = vld [vmem:[#allocation151_spill] sm:$0xff]  ;;  %v3482_v8 = vmul.f32 %v4870_v24, %v3364_v10  ;;  %v7027_v17 = vld [vmem:[#allocation126_spill] sm:$0xff]  ;;  %v7028_v29 = vld [vmem:[#allocation60_spill] sm:$0xff] }
 0x51c   : > { %v3608_v25 = vsel %vm3544_vm8, %v3512_v11, %v3576_v40  ;;  %v3513_v14 = vadd.f32 %v6128_v63, %v3317_v34  ;;  %v2679_v57 = vadd.f32 %v7024_v21, %v2359_v36  ;;  %v7025_v46 = vld [vmem:[#allocation19_spill] sm:$0xff]  ;;  %v7026_v11 = vld [vmem:[#allocation66_spill] sm:$0xff]  ;;  %v2329_v40 = vmul.f32 %v4866_v13, %v7027_v17 }
 0x51d   : > { %v3642_v56 = vsel %vm3638_vm6, %v3608_v25, 0.0  ;;  %v3227_v62 = vpop.permute.xlu1 %3226  ;;  %v6411_v58 = vmul.f32 %v4736_v1, %v7025_v46  ;;  %v1845_v63 = vadd.f32 %v7026_v11, %v1525_v50  ;;  %v2360_v34 = vadd.f32 %v2328_v3, %v2164_v45  ;;  %v7029_v36 = vld [vmem:[#allocation30_spill] sm:$0xff] }
 0x51e   : > { %v3643_v43 = vadd.f32 %v3642_v56, %v3641_v32  ;;  %vm3545_vm9 = vcmp.gt.f32.partialorder %v3513_v14, 0.0  ;;  %v3577_v22 = vmul.f32 0.2, %v3513_v14  ;;  %v3318_v51 = vadd.f32 %v3227_v62, %v2998_v2  ;;  %v3368_v61 = vpop.permute.xlu0 %3367  ;;  %v7030_v0 = vld [vmem:[#allocation94_spill] sm:$0xff] }
 0x51f   : > { %v1526_v23 = vadd.f32 %v7029_v36, %v7028_v29  ;;  %v2999_v10 = vadd.f32 %v5937_v52, %v2679_v57  ;;  %v2165_v2 = vadd.f32 %v7030_v0, %v1845_v63  ;;  %v7031_v21 = vld [vmem:[#allocation154_spill] sm:$0xff]  ;;  %v3483_v46 = vmul.f32 %v4870_v24, %v3368_v61  ;;  %v7032_v52 = vld [vmem:[#allocation67_spill] sm:$0xff]  ;;  %v7035_v63 = vld [vmem:[#allocation28_spill] sm:$0xff] }
 0x520   : > { %v3609_v32 = vsel %vm3545_vm9, %v3513_v14, %v3577_v22  ;;  %v3514_v25 = vadd.f32 %v3482_v8, %v3318_v51  ;;  %v2680_v56 = vadd.f32 %v7031_v21, %v2360_v34  ;;  %v1208_v29 = vadd.f32 %v6265_v49, %v6241_v12  ;;  %v7033_v57 = vld [vmem:[#allocation123_spill] sm:$0xff]  ;;  %v7034_v51 = vld [vmem:[#allocation61_spill] sm:$0xff] }
 0x521   : > { %v3644_v62 = vsel %vm3638_vm6, %v3609_v32, 0.0  ;;  %v3229_v50 = vpop.permute.xlu1 %3228  ;;  %v1846_v14 = vadd.f32 %v7032_v52, %v1526_v23  ;;  %v2330_v8 = vmul.f32 %v4866_v13, %v7033_v57  ;;  %v2361_v22 = vadd.f32 %v2329_v40, %v2165_v2  ;;  %v7036_v32 = vld [vmem:[#allocation97_spill] sm:$0xff] }
 0x522   : > { %v3645_v11 = vadd.f32 %v3644_v62, %v3643_v43  ;;  %vm3546_vm10 = vcmp.gt.f32.partialorder %v3514_v25, 0.0  ;;  %v3578_v17 = vmul.f32 0.2, %v3514_v25  ;;  %v3319_v3 = vadd.f32 %v3229_v50, %v2999_v10  ;;  %v3372_v45 = vpop.permute.xlu0 %3371  ;;  %v7037_v10 = vld [vmem:[#allocation153_spill] sm:$0xff] }
 0x523   : > { %v1527_v34 = vadd.f32 %v7035_v63, %v7034_v51  ;;  %v3000_v61 = vadd.f32 %v5935_v5, %v2680_v56  ;;  %v2166_v0 = vadd.f32 %v7036_v32, %v1846_v14  ;;  %v2681_v21 = vadd.f32 %v7037_v10, %v2361_v22  ;;  %v7038_v52 = vld [vmem:[#allocation21_spill] sm:$0xff]  ;;  %v7039_v5 = vld [vmem:[#allocation68_spill] sm:$0xff] }
 0x524   : > { %v3610_v36 = vsel %vm3546_vm10, %v3514_v25, %v3578_v17  ;;  %v3515_v43 = vadd.f32 %v3483_v46, %v3319_v3  ;;  %v3484_v12 = vmul.f32 %v4870_v24, %v3372_v45  ;;  %v6437_v57 = vmul.f32 %v4736_v1, %v7038_v52  ;;  %v7040_v56 = vld [vmem:[#allocation128_spill] sm:$0xff] }
 0x525   : > { %v3646_v62 = vsel %vm3638_vm6, %v3610_v36, 0.0  ;;  %v3231_v49 = vpop.permute.xlu1 %3230  ;;  %v1847_v25 = vadd.f32 %v7039_v5, %v1527_v34  ;;  %v2331_v46 = vmul.f32 %v4866_v13, %v7040_v56  ;;  %v2362_v17 = vadd.f32 %v2330_v8, %v2166_v0  ;;  %v7041_v3 = vld [vmem:[#allocation32_spill] sm:$0xff]  ;;  %v7045_v0 = vld [vmem:[#allocation125_spill] sm:$0xff] }
 0x526   : > { %v3647_v23 = vadd.f32 %v3646_v62, %v3645_v11  ;;  %vm3547_vm11 = vcmp.gt.f32.partialorder %v3515_v43, 0.0  ;;  %v3579_v50 = vmul.f32 0.2, %v3515_v43  ;;  %v3320_v40 = vadd.f32 %v3231_v49, %v3000_v61  ;;  %v3376_v2 = vpop.permute.xlu0 %3375  ;;  %v7042_v51 = vld [vmem:[#allocation96_spill] sm:$0xff] }
 0x527   : > { %v1528_v14 = vadd.f32 %v7041_v3, %v1208_v29  ;;  %v3001_v45 = vadd.f32 %v5945_v33, %v2681_v21  ;;  %v2167_v63 = vadd.f32 %v7042_v51, %v1847_v25  ;;  %v7043_v61 = vld [vmem:[#allocation156_spill] sm:$0xff]  ;;  %v3485_v1 = vmul.f32 %v4870_v24, %v3376_v2  ;;  %v7044_v33 = vld [vmem:[#allocation69_spill] sm:$0xff]  ;;  %v7048_v25 = vld [vmem:[#allocation99_spill] sm:$0xff] }
 0x528   : > { %v3611_v22 = vsel %vm3547_vm11, %v3515_v43, %v3579_v50  ;;  %v3516_v11 = vadd.f32 %v3484_v12, %v3320_v40  ;;  %v2682_v36 = vadd.f32 %v7043_v61, %v2362_v17  ;;  %v1210_v29 = vadd.f32 %v6273_v6, %v6172_v53  ;;  %v7046_v50 = vld [vmem:[#allocation62_spill] sm:$0xff]  ;;  %v7047_v40 = vld [vmem:[#allocation31_spill] sm:$0xff] }
 0x529   : > { %v3648_v32 = vsel %vm3638_vm6, %v3611_v22, 0.0  ;;  %v3233_v10 = vpop.permute.xlu1 %3232  ;;  %v1848_v43 = vadd.f32 %v7044_v33, %v1528_v14  ;;  %v2332_v21 = vmul.f32 %v4866_v13, %v7045_v0  ;;  %v2363_v12 = vadd.f32 %v2331_v46, %v2167_v63  ;;  %v7049_v17 = vld [vmem:[#allocation155_spill] sm:$0xff]  ;;  %v7051_v61 = vld [vmem:[#allocation130_spill] sm:$0xff] }
 0x52a   : > { %v3649_v34 = vadd.f32 %v3648_v32, %v3647_v23  ;;  %vm3548_vm12 = vcmp.gt.f32.partialorder %v3516_v11, 0.0  ;;  %v3580_v62 = vmul.f32 0.2, %v3516_v11  ;;  %v3321_v49 = vadd.f32 %v3233_v10, %v3001_v45  ;;  %v3380_v8 = vpop.permute.xlu0 %3379 }
 0x52b   : > { %v1529_v52 = vadd.f32 %v7047_v40, %v7046_v50  ;;  %v3002_v2 = vadd.f32 %v5943_v38, %v2682_v36  ;;  %v2168_v56 = vadd.f32 %v7048_v25, %v1848_v43  ;;  %v2683_v3 = vadd.f32 %v7049_v17, %v2363_v12  ;;  %v7050_v38 = vld [vmem:[#allocation70_spill] sm:$0xff] }
 0x52c   : > { %v3612_v5 = vsel %vm3548_vm12, %v3516_v11, %v3580_v62  ;;  %v3517_v23 = vadd.f32 %v3485_v1, %v3321_v49  ;;  %v3486_v53 = vmul.f32 %v4870_v24, %v3380_v8  ;;  %v1211_v63 = vadd.f32 %v6280_v42, %v6168_v48  ;;  %v7052_v1 = vld [vmem:[#allocation34_spill] sm:$0xff] }
 0x52d   : > { %v3650_v45 = vsel %vm3638_vm6, %v3612_v5, 0.0  ;;  %v3235_v6 = vpop.permute.xlu1 %3234  ;;  %v1849_v11 = vadd.f32 %v7050_v38, %v1529_v52  ;;  %v2333_v36 = vmul.f32 %v4866_v13, %v7051_v61  ;;  %v2364_v32 = vadd.f32 %v2332_v21, %v2168_v56  ;;  %v7054_v43 = vld [vmem:[#allocation158_spill] sm:$0xff]  ;;  %v7056_v5 = vld [vmem:[#allocation127_spill] sm:$0xff]  ;;  %v7057_v56 = vld [vmem:[#allocation33_spill] sm:$0xff] }
 0x52e   : > { %v3651_v14 = vadd.f32 %v3650_v45, %v3649_v34  ;;  %vm3549_vm13 = vcmp.gt.f32.partialorder %v3517_v23, 0.0  ;;  %v3581_v22 = vmul.f32 0.2, %v3517_v23  ;;  %v3322_v46 = vadd.f32 %v3235_v6, %v3002_v2  ;;  %v3384_v51 = vpop.permute.xlu0 %3383  ;;  %v7053_v34 = vld [vmem:[#allocation98_spill] sm:$0xff] }
 0x52f   : > { %v1530_v10 = vadd.f32 %v7052_v1, %v1210_v29  ;;  %v3003_v62 = vadd.f32 %v5952_v9, %v2683_v3  ;;  %v2169_v33 = vadd.f32 %v7053_v34, %v1849_v11  ;;  %v2684_v0 = vadd.f32 %v7054_v43, %v2364_v32  ;;  %v7055_v9 = vld [vmem:[#allocation71_spill] sm:$0xff]  ;;  %v7058_v3 = vld [vmem:[#allocation178_spill] sm:$0xff]  ;;  %v7061_v1 = vld [vmem:[#allocation72_spill] sm:$0xff] }
 0x530   : > { %v3613_v49 = vsel %vm3549_vm13, %v3517_v23, %v3581_v22  ;;  %v3518_v8 = vadd.f32 %v3486_v53, %v3322_v46  ;;  %v3487_v48 = vmul.f32 %v4870_v24, %v3384_v51  ;;  %v1212_v29 = vadd.f32 %v6284_v7, %v6180_v20  ;;  %v7060_v46 = vld [vmem:[#allocation157_spill] sm:$0xff]  ;;  %v7063_v34 = vld [vmem:[#allocation36_spill] sm:$0xff] }
 0x531   : > { %v3652_v12 = vsel %vm3638_vm6, %v3613_v49, 0.0  ;;  %v3237_v42 = vpop.permute.xlu1 %3236  ;;  %v1850_v2 = vadd.f32 %v7055_v9, %v1530_v10  ;;  %v2334_v23 = vmul.f32 %v4866_v13, %v7056_v5  ;;  %v2365_v25 = vadd.f32 %v2333_v36, %v2169_v33  ;;  %v7064_v43 = vld [vmem:[#allocation180_spill] sm:$0xff] }
 0x532   : > { %v3653_v50 = vadd.f32 %v3652_v12, %v3651_v14  ;;  %vm3550_vm14 = vcmp.gt.f32.partialorder %v3518_v8, 0.0  ;;  %v3582_v40 = vmul.f32 0.2, %v3518_v8  ;;  %v3323_v52 = vadd.f32 %v3237_v42, %v3003_v62  ;;  %v3388_v21 = vpop.permute.xlu0 %3387  ;;  %v7059_v14 = vld [vmem:[#allocation101_spill] sm:$0xff]  ;;  %v7062_v62 = vld [vmem:[#allocation132_spill] sm:$0xff] }
 0x533   : > { %v1531_v17 = vadd.f32 %v7057_v56, %v1211_v63  ;;  %v3004_v45 = vadd.f32 %v7058_v3, %v2684_v0  ;;  %v2170_v22 = vadd.f32 %v7059_v14, %v1850_v2  ;;  %v2685_v51 = vadd.f32 %v7060_v46, %v2365_v25  ;;  %v7065_v42 = vld [vmem:[#allocation100_spill] sm:$0xff]  ;;  %v7067_v25 = vld [vmem:[#allocation73_spill] sm:$0xff]  ;;  %v7070_v14 = vld [vmem:[#allocation179_spill] sm:$0xff] }
 0x534   : > { %v3614_v53 = vsel %vm3550_vm14, %v3518_v8, %v3582_v40  ;;  %v3519_v6 = vadd.f32 %v3487_v48, %v3323_v52  ;;  %v3488_v20 = vmul.f32 %v4870_v24, %v3388_v21  ;;  %v1213_v63 = vadd.f32 %v6288_v19, %v6176_v27  ;;  %v7066_v40 = vld [vmem:[#allocation160_spill] sm:$0xff] }
 0x535   : > { %v3654_v38 = vsel %vm3638_vm6, %v3614_v53, 0.0  ;;  %v3239_v7 = vpop.permute.xlu1 %3238  ;;  %v1851_v10 = vadd.f32 %v7061_v1, %v1531_v17  ;;  %v2335_v49 = vmul.f32 %v4866_v13, %v7062_v62  ;;  %v2366_v8 = vadd.f32 %v2334_v23, %v2170_v22  ;;  %v7068_v17 = vld [vmem:[#allocation129_spill] sm:$0xff]  ;;  %v7069_v53 = vld [vmem:[#allocation35_spill] sm:$0xff]  ;;  %v7073_v62 = vld [vmem:[#allocation74_spill] sm:$0xff] }
 0x536   : > { %v3655_v11 = vadd.f32 %v3654_v38, %v3653_v50  ;;  %vm3551_vm15 = vcmp.gt.f32.partialorder %v3519_v6, 0.0  ;;  %v3583_v61 = vmul.f32 0.2, %v3519_v6  ;;  %v3324_v32 = vadd.f32 %v3239_v7, %v3004_v45  ;;  %v3392_v36 = vpop.permute.xlu0 %3391  ;;  %v7071_v38 = vld [vmem:[#allocation103_spill] sm:$0xff] }
 0x537   : > { %v1532_v33 = vadd.f32 %v7063_v34, %v1212_v29  ;;  %v3005_v0 = vadd.f32 %v7064_v43, %v2685_v51  ;;  %v2171_v50 = vadd.f32 %v7065_v42, %v1851_v10  ;;  %v2686_v52 = vadd.f32 %v7066_v40, %v2366_v8  ;;  %v7072_v7 = vld [vmem:[#allocation159_spill] sm:$0xff]  ;;  %v7074_v8 = vld [vmem:[#allocation134_spill] sm:$0xff] }
 0x538   : > { %v3615_v12 = vsel %vm3551_vm15, %v3519_v6, %v3583_v61  ;;  %v3520_v48 = vadd.f32 %v3488_v20, %v3324_v32  ;;  %v3489_v27 = vmul.f32 %v4870_v24, %v3392_v36  ;;  %v1214_v29 = vadd.f32 %v6294_v18, %v6190_v37  ;;  %v7075_v43 = vld [vmem:[#allocation38_spill] sm:$0xff] }
 0x539   : > { %v3656_v21 = vsel %vm3638_vm6, %v3615_v12, 0.0  ;;  %v3241_v19 = vpop.permute.xlu1 %3240  ;;  %v1852_v56 = vadd.f32 %v7067_v25, %v1532_v33  ;;  %v2336_v3 = vmul.f32 %v4866_v13, %v7068_v17  ;;  %v2367_v45 = vadd.f32 %v2335_v49, %v2171_v50  ;;  %v7076_v12 = vld [vmem:[#allocation182_spill] sm:$0xff]  ;;  %v7079_v25 = vld [vmem:[#allocation75_spill] sm:$0xff] }
 0x53a   : > { %v3657_v9 = vadd.f32 %v3656_v21, %v3655_v11  ;;  %vm3552_vm0 = vcmp.gt.f32.partialorder %v3520_v48, 0.0  ;;  %v3584_v2 = vmul.f32 0.2, %v3520_v48  ;;  %v3325_v5 = vadd.f32 %v3241_v19, %v3005_v0  ;;  %v3396_v23 = vpop.permute.xlu0 %3395  ;;  %v7077_v40 = vld [vmem:[#allocation102_spill] sm:$0xff]  ;;  %v7080_v17 = vld [vmem:[#allocation131_spill] sm:$0xff] }
 0x53b   : > { %v1533_v6 = vadd.f32 %v7069_v53, %v1213_v63  ;;  %v3006_v22 = vadd.f32 %v7070_v14, %v2686_v52  ;;  %v2172_v20 = vadd.f32 %v7071_v38, %v1852_v56  ;;  %v2687_v11 = vadd.f32 %v7072_v7, %v2367_v45  ;;  %v7078_v21 = vld [vmem:[#allocation162_spill] sm:$0xff]  ;;  %v7081_v53 = vld [vmem:[#allocation37_spill] sm:$0xff] }
 0x53c   : > { %v3616_v46 = vsel %vm3552_vm0, %v3520_v48, %v3584_v2  ;;  %v3521_v51 = vadd.f32 %v3489_v27, %v3325_v5  ;;  %v3490_v37 = vmul.f32 %v4870_v24, %v3396_v23  ;;  %v1215_v63 = vadd.f32 %v6302_v44, %v6184_v47  ;;  %v7082_v14 = vld [vmem:[#allocation181_spill] sm:$0xff] }
 0x53d   : > { %v3658_v61 = vsel %vm3638_vm6, %v3616_v46, 0.0  ;;  %v3243_v18 = vpop.permute.xlu1 %3242  ;;  %v1853_v49 = vadd.f32 %v7073_v62, %v1533_v6  ;;  %v2337_v34 = vmul.f32 %v4866_v13, %v7074_v8  ;;  %v2368_v33 = vadd.f32 %v2336_v3, %v2172_v20  ;;  %v7083_v38 = vld [vmem:[#allocation105_spill] sm:$0xff]  ;;  %v7086_v62 = vld [vmem:[#allocation136_spill] sm:$0xff] }
 0x53e   : > { %v3659_v32 = vadd.f32 %v3658_v61, %v3657_v9  ;;  %vm3553_vm1 = vcmp.gt.f32.partialorder %v3521_v51, 0.0  ;;  %v3585_v36 = vmul.f32 0.2, %v3521_v51  ;;  %v3326_v1 = vadd.f32 %v3243_v18, %v3006_v22  ;;  %v3400_v10 = vpop.permute.xlu0 %3399  ;;  %v7084_v7 = vld [vmem:[#allocation161_spill] sm:$0xff] }
 0x53f   : > { %v1534_v0 = vadd.f32 %v7075_v43, %v1214_v29  ;;  %v3007_v48 = vadd.f32 %v7076_v12, %v2687_v11  ;;  %v2173_v52 = vadd.f32 %v7077_v40, %v1853_v49  ;;  %v2688_v27 = vadd.f32 %v7078_v21, %v2368_v33  ;;  %v7088_v43 = vld [vmem:[#allocation184_spill] sm:$0xff] }
 0x540   : > { %v3617_v42 = vsel %vm3553_vm1, %v3521_v51, %v3585_v36  ;;  %v3522_v50 = vadd.f32 %v3490_v37, %v3326_v1  ;;  %v3491_v47 = vmul.f32 %v4870_v24, %v3400_v10  ;;  %v1216_v29 = vadd.f32 %v6306_v60, %v6198_v55  ;;  %v7085_v10 = vld [vmem:[#allocation76_spill] sm:$0xff] }
 0x541   : > { %v3660_v19 = vsel %vm3638_vm6, %v3617_v42, 0.0  ;;  %v3245_v44 = vpop.permute.xlu1 %3244  ;;  %v1854_v56 = vadd.f32 %v7079_v25, %v1534_v0  ;;  %v2338_v3 = vmul.f32 %v4866_v13, %v7080_v17  ;;  %v2369_v45 = vadd.f32 %v2337_v34, %v2173_v52  ;;  %v7087_v34 = vld [vmem:[#allocation40_spill] sm:$0xff] }
 0x542   : > { %v3661_v9 = vadd.f32 %v3660_v19, %v3659_v32  ;;  %vm3554_vm2 = vcmp.gt.f32.partialorder %v3522_v50, 0.0  ;;  %v3586_v2 = vmul.f32 0.2, %v3522_v50  ;;  %v3327_v5 = vadd.f32 %v3245_v44, %v3007_v48  ;;  %v3404_v23 = vpop.permute.xlu0 %3403  ;;  %v7089_v42 = vld [vmem:[#allocation104_spill] sm:$0xff] }
 0x543   : > { %v1535_v6 = vadd.f32 %v7081_v53, %v1215_v63  ;;  %v3008_v22 = vadd.f32 %v7082_v14, %v2688_v27  ;;  %v2174_v20 = vadd.f32 %v7083_v38, %v1854_v56  ;;  %v2689_v11 = vadd.f32 %v7084_v7, %v2369_v45  ;;  %v7090_v40 = vld [vmem:[#allocation164_spill] sm:$0xff]  ;;  %v7093_v56 = vld [vmem:[#allocation39_spill] sm:$0xff] }
 0x544   : > { %v3618_v46 = vsel %vm3554_vm2, %v3522_v50, %v3586_v2  ;;  %v3523_v51 = vadd.f32 %v3491_v47, %v3327_v5  ;;  %v3492_v55 = vmul.f32 %v4870_v24, %v3404_v23  ;;  %v1217_v1 = vadd.f32 %v6310_v59, %v6194_v35  ;;  %v7091_v2 = vld [vmem:[#allocation77_spill] sm:$0xff]  ;;  %v7095_v14 = vld [vmem:[#allocation107_spill] sm:$0xff] }
 0x545   : > { %v3662_v61 = vsel %vm3638_vm6, %v3618_v46, 0.0  ;;  %v3247_v60 = vpop.permute.xlu1 %3246  ;;  %v1855_v63 = vadd.f32 %v7085_v10, %v1535_v6  ;;  %v2339_v49 = vmul.f32 %v4866_v13, %v7086_v62  ;;  %v2370_v8 = vadd.f32 %v2338_v3, %v2174_v20  ;;  %v7092_v23 = vld [vmem:[#allocation133_spill] sm:$0xff]  ;;  %v7094_v3 = vld [vmem:[#allocation183_spill] sm:$0xff] }
 0x546   : > { %v3663_v37 = vadd.f32 %v3662_v61, %v3661_v9  ;;  %vm3555_vm3 = vcmp.gt.f32.partialorder %v3523_v51, 0.0  ;;  %v3587_v18 = vmul.f32 0.2, %v3523_v51  ;;  %v3328_v32 = vadd.f32 %v3247_v60, %v3008_v22  ;;  %v3408_v36 = vpop.permute.xlu0 %3407  ;;  %v7096_v46 = vld [vmem:[#allocation163_spill] sm:$0xff]  ;;  %v7097_v60 = vld [vmem:[#allocation78_spill] sm:$0xff] }
 0x547   : > { %v1536_v33 = vadd.f32 %v7087_v34, %v1216_v29  ;;  %v3009_v0 = vadd.f32 %v7088_v43, %v2689_v11  ;;  %v2175_v50 = vadd.f32 %v7089_v42, %v1855_v63  ;;  %v2690_v52 = vadd.f32 %v7090_v40, %v2370_v8  ;;  %v7100_v63 = vld [vmem:[#allocation186_spill] sm:$0xff] }
 0x548   : > { %v3619_v12 = vsel %vm3555_vm3, %v3523_v51, %v3587_v18  ;;  %v3524_v48 = vadd.f32 %v3492_v55, %v3328_v32  ;;  %v3493_v35 = vmul.f32 %v4870_v24, %v3408_v36  ;;  %v1218_v9 = vadd.f32 %v6322_v31, %v6208_v39  ;;  %v7098_v18 = vld [vmem:[#allocation138_spill] sm:$0xff] }
 0x549   : > { %v3664_v21 = vsel %vm3638_vm6, %v3619_v12, 0.0  ;;  %v3249_v59 = vpop.permute.xlu1 %3248  ;;  %v1856_v5 = vadd.f32 %v7091_v2, %v1536_v33  ;;  %v2340_v29 = vmul.f32 %v4866_v13, %v7092_v23  ;;  %v2371_v25 = vadd.f32 %v2339_v49, %v2175_v50  ;;  %v7101_v34 = vld [vmem:[#allocation106_spill] sm:$0xff] }
 0x54a   : > { %v3665_v27 = vadd.f32 %v3664_v21, %v3663_v37  ;;  %vm3556_vm4 = vcmp.gt.f32.partialorder %v3524_v48, 0.0  ;;  %v3588_v19 = vmul.f32 0.2, %v3524_v48  ;;  %v3329_v47 = vadd.f32 %v3249_v59, %v3009_v0  ;;  %v3412_v44 = vpop.permute.xlu0 %3411  ;;  %v7102_v43 = vld [vmem:[#allocation166_spill] sm:$0xff]  ;;  %v7103_v21 = vld [vmem:[#allocation79_spill] sm:$0xff] }
 0x54b   : > { %v1537_v17 = vadd.f32 %v7093_v56, %v1217_v1  ;;  %v3010_v45 = vadd.f32 %v7094_v3, %v2690_v52  ;;  %v2176_v22 = vadd.f32 %v7095_v14, %v1856_v5  ;;  %v2691_v51 = vadd.f32 %v7096_v46, %v2371_v25  ;;  %v7099_v1 = vld [vmem:[#allocation42_spill] sm:$0xff]  ;;  %v7104_v59 = vld [vmem:[#allocation135_spill] sm:$0xff]  ;;  %v7108_v56 = vld [vmem:[#allocation165_spill] sm:$0xff] }
 0x54c   : > { %v3620_v53 = vsel %vm3556_vm4, %v3524_v48, %v3588_v19  ;;  %v3525_v6 = vadd.f32 %v3493_v35, %v3329_v47  ;;  %v3494_v39 = vmul.f32 %v4870_v24, %v3412_v44  ;;  %v1219_v55 = vadd.f32 %v6332_v4, %v6204_v41  ;;  %v7105_v47 = vld [vmem:[#allocation41_spill] sm:$0xff]  ;;  %v7109_v46 = vld [vmem:[#allocation80_spill] sm:$0xff] }
 0x54d   : > { %v3666_v38 = vsel %vm3638_vm6, %v3620_v53, 0.0  ;;  %v3251_v31 = vpop.permute.xlu1 %3250  ;;  %v1857_v37 = vadd.f32 %v7097_v60, %v1537_v17  ;;  %v2341_v32 = vmul.f32 %v4866_v13, %v7098_v18  ;;  %v2372_v36 = vadd.f32 %v2340_v29, %v2176_v22  ;;  %v7107_v29 = vld [vmem:[#allocation109_spill] sm:$0xff] }
 0x54e   : > { %v3667_v20 = vadd.f32 %v3666_v38, %v3665_v27  ;;  %vm3557_vm5 = vcmp.gt.f32.partialorder %v3525_v6, 0.0  ;;  %v3589_v7 = vmul.f32 0.2, %v3525_v6  ;;  %v3330_v11 = vadd.f32 %v3251_v31, %v3010_v45  ;;  %v3416_v61 = vpop.permute.xlu0 %3415  ;;  %v7110_v38 = vld [vmem:[#allocation140_spill] sm:$0xff] }
 0x54f   : > { %v1538_v10 = vadd.f32 %v7099_v1, %v1218_v9  ;;  %v3011_v62 = vadd.f32 %v7100_v63, %v2691_v51  ;;  %v2177_v33 = vadd.f32 %v7101_v34, %v1857_v37  ;;  %v2692_v0 = vadd.f32 %v7102_v43, %v2372_v36  ;;  %v7106_v9 = vld [vmem:[#allocation185_spill] sm:$0xff]  ;;  %v7113_v37 = vld [vmem:[#allocation108_spill] sm:$0xff] }
 0x550   : > { %v3621_v49 = vsel %vm3557_vm5, %v3525_v6, %v3589_v7  ;;  %v3526_v8 = vadd.f32 %v3494_v39, %v3330_v11  ;;  %v3495_v41 = vmul.f32 %v4870_v24, %v3416_v61  ;;  %v1220_v52 = vadd.f32 %v6338_v54, %v6222_v26  ;;  %v7112_v11 = vld [vmem:[#allocation188_spill] sm:$0xff] }
 0x551   : > { %v3668_v12 = vsel %vm3638_vm6, %v3621_v49, 0.0  ;;  %v3253_v4 = vpop.permute.xlu1 %3252  ;;  %v1858_v35 = vadd.f32 %v7103_v21, %v1538_v10  ;;  %v2342_v27 = vmul.f32 %v4866_v13, %v7104_v59  ;;  %v2373_v19 = vadd.f32 %v2341_v32, %v2177_v33  ;;  %v7114_v32 = vld [vmem:[#allocation168_spill] sm:$0xff]  ;;  %v7116_v33 = vld [vmem:[#allocation81_spill] sm:$0xff]  ;;  %v7120_v21 = vld [vmem:[#allocation111_spill] sm:$0xff] }
 0x552   : > { %v3669_v48 = vadd.f32 %v3668_v12, %v3667_v20  ;;  %vm3558_vm7 = vcmp.gt.f32.partialorder %v3526_v8, 0.0  ;;  %v3590_v42 = vmul.f32 0.2, %v3526_v8  ;;  %v3331_v50 = vadd.f32 %v3253_v4, %v3011_v62  ;;  %v3420_v40 = vpop.permute.xlu0 %3419  ;;  %v7111_v20 = vld [vmem:[#allocation44_spill] sm:$0xff]  ;;  %v7118_v4 = vld [vmem:[#allocation43_spill] sm:$0xff] }
 0x553   : > { %v1539_v44 = vadd.f32 %v7105_v47, %v1219_v55  ;;  %v3012_v2 = vadd.f32 %v7106_v9, %v2692_v0  ;;  %v2178_v25 = vadd.f32 %v7107_v29, %v1858_v35  ;;  %v2693_v17 = vadd.f32 %v7108_v56, %v2373_v19  ;;  %v7117_v0 = vld [vmem:[#allocation137_spill] sm:$0xff]  ;;  %v7121_v59 = vld [vmem:[#allocation167_spill] sm:$0xff]  ;;  %v7123_v29 = vld [vmem:[#allocation6_spill] sm:$0xff] }
 0x554   : > { %v3622_v5 = vsel %vm3558_vm7, %v3526_v8, %v3590_v42  ;;  %v3527_v23 = vadd.f32 %v3495_v41, %v3331_v50  ;;  %v3496_v26 = vmul.f32 %v4870_v24, %v3420_v40  ;;  %v1221_v22 = vadd.f32 %v6347_v30, %v6212_v28  ;;  %v7115_v8 = vld [vmem:[#allocation4_spill] sm:$0xff]  ;;  %v7119_v42 = vld [vmem:[#allocation187_spill] sm:$0xff]  ;;  %v7124_v56 = vld [vmem:[#allocation82_spill] sm:$0xff] }
 0x555   : > { %v3670_v3 = vsel %vm3638_vm6, %v3622_v5, 0.0  ;;  %v3255_v54 = vpop.permute.xlu1 %3254  ;;  %v1859_v51 = vadd.f32 %v7109_v46, %v1539_v44  ;;  %v2343_v39 = vmul.f32 %v4866_v13, %v7110_v38  ;;  %v2374_v31 = vadd.f32 %v2342_v27, %v2178_v25 }
 0x556   : > { %v3671_v45 = vadd.f32 %v3670_v3, %v3669_v48  ;;  %vm3559_vm8 = vcmp.gt.f32.partialorder %v3527_v23, 0.0  ;;  %v3591_v53 = vmul.f32 0.2, %v3527_v23  ;;  %v3332_v6 = vadd.f32 %v3255_v54, %v3012_v2  ;;  %v3424_v14 = vpop.permute.xlu0 %3423  ;;  %v7125_v3 = vld [vmem:[#allocation142_spill] sm:$0xff] }
 0x557   : > { %v1540_v7 = vadd.f32 %v7111_v20, %v1220_v52  ;;  %v3013_v61 = vadd.f32 %v7112_v11, %v2693_v17  ;;  %v2179_v18 = vadd.f32 %v7113_v37, %v1859_v51  ;;  %v2694_v36 = vadd.f32 %v7114_v32, %v2374_v31  ;;  %v7128_v51 = vld [vmem:[#allocation110_spill] sm:$0xff]  ;;  %v7131_v32 = vld [vmem:[#allocation3_spill] sm:$0xff] }
 0x558   : > { %v3623_v55 = vsel %vm3559_vm8, %v3527_v23, %v3591_v53  ;;  %v3528_v60 = vadd.f32 %v3496_v26, %v3332_v6  ;;  %v3497_v28 = vmul.f32 %v4870_v24, %v3424_v14  ;;  %v1222_v34 = vadd.f32 %v7115_v8, %v6233_v16  ;;  %v7122_v23 = vld [vmem:[#allocation199_spill] sm:$0xff]  ;;  %v7127_v6 = vld [vmem:[#allocation190_spill] sm:$0xff]  ;;  %v7135_v8 = vld [vmem:[#allocation189_spill] sm:$0xff] }
 0x559   : > { %v3672_v1 = vsel %vm3638_vm6, %v3623_v55, 0.0  ;;  %v3257_v30 = vpop.permute.xlu1 %3256  ;;  %v1860_v43 = vadd.f32 %v7116_v33, %v1540_v7  ;;  %v2344_v12 = vmul.f32 %v4866_v13, %v7117_v0  ;;  %v2375_v41 = vadd.f32 %v2343_v39, %v2179_v18  ;;  %v7129_v39 = vld [vmem:[#allocation170_spill] sm:$0xff]  ;;  %v7130_v18 = vld [vmem:[#allocation49_spill] sm:$0xff] }
 0x55a   : > { %v3673_v10 = vadd.f32 %v3672_v1, %v3671_v45  ;;  %vm3560_vm9 = vcmp.gt.f32.partialorder %v3528_v60, 0.0  ;;  %v3592_v63 = vmul.f32 0.2, %v3528_v60  ;;  %v3333_v62 = vadd.f32 %v3257_v30, %v3013_v61  ;;  %v3428_v49 = vpop.permute.xlu0 %3427  ;;  %v7126_v45 = vld [vmem:[#allocation46_spill] sm:$0xff]  ;;  %v7132_v1 = vld [vmem:[#allocation83_spill] sm:$0xff]  ;;  %v7136_v0 = vld [vmem:[#allocation113_spill] sm:$0xff] }
 0x55b   : > { %v1541_v48 = vadd.f32 %v7118_v4, %v1221_v22  ;;  %v3014_v50 = vadd.f32 %v7119_v42, %v2694_v36  ;;  %v2180_v35 = vadd.f32 %v7120_v21, %v1860_v43  ;;  %v2695_v27 = vadd.f32 %v7121_v59, %v2375_v41  ;;  %v7133_v30 = vld [vmem:[#allocation139_spill] sm:$0xff]  ;;  %v7137_v41 = vld [vmem:[#allocation169_spill] sm:$0xff]  ;;  %v7138_v59 = vld [vmem:[#allocation200_spill] sm:$0xff] }
 0x55c   : > { %v3624_v40 = vsel %vm3560_vm9, %v3528_v60, %v3592_v63  ;;  %v3529_v52 = vadd.f32 %v3497_v28, %v3333_v62  ;;  %v3498_v16 = vmul.f32 %v4870_v24, %v3428_v49  ;;  %v1223_v25 = vadd.f32 %v7123_v29, %v7122_v23  ;;  %v7134_v62 = vld [vmem:[#allocation45_spill] sm:$0xff]  ;;  %v7143_v29 = vld [vmem:[#allocation191_spill] sm:$0xff] }
 0x55d   : > { %v3674_v19 = vsel %vm3638_vm6, %v3624_v40, 0.0  ;;  %v3259_v47 = vpop.permute.xlu1 %3258  ;;  %v1861_v17 = vadd.f32 %v7124_v56, %v1541_v48  ;;  %v2345_v26 = vmul.f32 %v4866_v13, %v7125_v3  ;;  %v2376_v54 = vadd.f32 %v2344_v12, %v2180_v35  ;;  %v7144_v3 = vld [vmem:[#allocation112_spill] sm:$0xff] }
 0x55e   : > { %v3675_v44 = vadd.f32 %v3674_v19, %v3673_v10  ;;  %vm3561_vm10 = vcmp.gt.f32.partialorder %v3529_v52, 0.0  ;;  %v3593_v9 = vmul.f32 0.2, %v3529_v52  ;;  %v3334_v2 = vadd.f32 %v3259_v47, %v3014_v50  ;;  %v3432_v5 = vpop.permute.xlu0 %3431 }
 0x55f   : > { %v1542_v53 = vadd.f32 %v7126_v45, %v1222_v34  ;;  %v3015_v14 = vadd.f32 %v7127_v6, %v2695_v27  ;;  %v2181_v38 = vadd.f32 %v7128_v51, %v1861_v17  ;;  %v2696_v31 = vadd.f32 %v7129_v39, %v2376_v54  ;;  %v7139_v27 = vld [vmem:[#allocation8_spill] sm:$0xff]  ;;  %v7146_v39 = vld [vmem:[#allocation202_spill] sm:$0xff] }
 0x560   : > { %v3625_v22 = vsel %vm3561_vm10, %v3529_v52, %v3593_v9  ;;  %v3530_v46 = vadd.f32 %v3498_v16, %v3334_v2  ;;  %v3499_v7 = vmul.f32 %v4870_v24, %v3432_v5  ;;  %v1224_v36 = vadd.f32 %v7131_v32, %v7130_v18  ;;  %v7140_v16 = vld [vmem:[#allocation84_spill] sm:$0xff]  ;;  %v7150_v18 = vld [vmem:[#allocation23_spill] sm:$0xff] }
 0x561   : > { %v3676_v20 = vsel %vm3638_vm6, %v3625_v22, 0.0  ;;  %v3261_v11 = vpop.permute.xlu1 %3260  ;;  %v1862_v28 = vadd.f32 %v7132_v1, %v1542_v53  ;;  %v2346_v10 = vmul.f32 %v4866_v13, %v7133_v30  ;;  %v2377_v63 = vadd.f32 %v2345_v26, %v2181_v38  ;;  %v7142_v5 = vld [vmem:[#allocation48_spill] sm:$0xff] }
 0x562   : > { %v3677_v61 = vadd.f32 %v3676_v20, %v3675_v44  ;;  %vm3562_vm11 = vcmp.gt.f32.partialorder %v3530_v46, 0.0  ;;  %v3594_v55 = vmul.f32 0.2, %v3530_v46  ;;  %v3335_v60 = vadd.f32 %v3261_v11, %v3015_v14  ;;  %v3436_v37 = vpop.permute.xlu0 %3435  ;;  %v7141_v44 = vld [vmem:[#allocation144_spill] sm:$0xff]  ;;  %v7147_v20 = vld [vmem:[#allocation85_spill] sm:$0xff] }
 0x563   : > { %v1543_v49 = vadd.f32 %v7134_v62, %v1223_v25  ;;  %v3016_v34 = vadd.f32 %v7135_v8, %v2696_v31  ;;  %v2182_v12 = vadd.f32 %v7136_v0, %v1862_v28  ;;  %v2697_v4 = vadd.f32 %v7137_v41, %v2377_v63  ;;  %v7145_v54 = vld [vmem:[#allocation172_spill] sm:$0xff]  ;;  %v7148_v11 = vld [vmem:[#allocation141_spill] sm:$0xff]  ;;  %v7151_v28 = vld [vmem:[#allocation115_spill] sm:$0xff] }
 0x564   : > { %v3626_v33 = vsel %vm3562_vm11, %v3530_v46, %v3594_v55  ;;  %v3531_v43 = vadd.f32 %v3499_v7, %v3335_v60  ;;  %v3500_v42 = vmul.f32 %v4870_v24, %v3436_v37  ;;  %v1225_v19 = vadd.f32 %v7139_v27, %v7138_v59  ;;  %v7149_v60 = vld [vmem:[#allocation47_spill] sm:$0xff]  ;;  %v7153_v0 = vld [vmem:[#allocation201_spill] sm:$0xff]  ;;  %v7154_v41 = vld [vmem:[#allocation86_spill] sm:$0xff] }
 0x565   : > { %v3678_v48 = vsel %vm3638_vm6, %v3626_v33, 0.0  ;;  %v3263_v50 = vpop.permute.xlu1 %3262  ;;  %v1863_v47 = vadd.f32 %v7140_v16, %v1543_v49  ;;  %v2347_v9 = vmul.f32 %v4866_v13, %v7141_v44  ;;  %v2378_v2 = vadd.f32 %v2346_v10, %v2182_v12  ;;  %v7152_v10 = vld [vmem:[#allocation171_spill] sm:$0xff] }
 0x566   : > { %v3679_v40 = vadd.f32 %v3678_v48, %v3677_v61  ;;  %vm3563_vm12 = vcmp.gt.f32.partialorder %v3531_v43, 0.0  ;;  %v3595_v52 = vmul.f32 0.2, %v3531_v43  ;;  %v3336_v21 = vadd.f32 %v3263_v50, %v3016_v34  ;;  %v3440_v35 = vpop.permute.xlu0 %3439  ;;  %v7155_v48 = vld [vmem:[#allocation145_spill] sm:$0xff] }
 0x567   : > { %v1544_v23 = vadd.f32 %v7142_v5, %v1224_v36  ;;  %v3017_v25 = vadd.f32 %v7143_v29, %v2697_v4  ;;  %v2183_v26 = vadd.f32 %v7144_v3, %v1863_v47  ;;  %v2698_v45 = vadd.f32 %v7145_v54, %v2378_v2  ;;  %v7159_v47 = vld [vmem:[#allocation174_spill] sm:$0xff]  ;;  %v7161_v3 = vld [vmem:[#allocation87_spill] sm:$0xff] }
 0x568   : > { %v3627_v56 = vsel %vm3563_vm12, %v3531_v43, %v3595_v52  ;;  %v3532_v17 = vadd.f32 %v3500_v42, %v3336_v21  ;;  %v3501_v6 = vmul.f32 %v4870_v24, %v3440_v35  ;;  %v1226_v31 = vadd.f32 %v6396_v15, %v7146_v39  ;;  %v7157_v21 = vld [vmem:[#allocation193_spill] sm:$0xff]  ;;  %v7162_v54 = vld [vmem:[#allocation143_spill] sm:$0xff] }
 0x569   : > { %v3680_v53 = vsel %vm3638_vm6, %v3627_v56, 0.0  ;;  %v3265_v14 = vpop.permute.xlu1 %3264  ;;  %v1864_v7 = vadd.f32 %v7147_v20, %v1544_v23  ;;  %v2348_v61 = vmul.f32 %v4866_v13, %v7148_v11  ;;  %v2379_v55 = vadd.f32 %v2347_v9, %v2183_v26  ;;  %v7160_v56 = vld [vmem:[#allocation203_spill] sm:$0xff]  ;;  %v7165_v39 = vld [vmem:[#allocation117_spill] sm:$0xff] }
 0x56a   : > { %v3681_v22 = vadd.f32 %v3680_v53, %v3679_v40  ;;  %vm3564_vm13 = vcmp.gt.f32.partialorder %v3532_v17, 0.0  ;;  %v3596_v46 = vmul.f32 0.2, %v3532_v17  ;;  %v3337_v51 = vadd.f32 %v3265_v14, %v3017_v25  ;;  %v3444_v38 = vpop.permute.xlu0 %3443  ;;  %v7156_v40 = vld [vmem:[#allocation51_spill] sm:$0xff]  ;;  %v7166_v20 = vld [vmem:[#allocation173_spill] sm:$0xff] }
 0x56b   : > { %v1545_v37 = vadd.f32 %v7149_v60, %v1225_v19  ;;  %v3018_v32 = vadd.f32 %v7150_v18, %v2698_v45  ;;  %v2184_v30 = vadd.f32 %v7151_v28, %v1864_v7  ;;  %v2699_v63 = vadd.f32 %v7152_v10, %v2379_v55  ;;  %v7158_v19 = vld [vmem:[#allocation114_spill] sm:$0xff]  ;;  %v7169_v10 = vld [vmem:[#allocation52_spill] sm:$0xff] }
 0x56c   : > { %v3628_v36 = vsel %vm3564_vm13, %v3532_v17, %v3596_v46  ;;  %v3533_v1 = vadd.f32 %v3501_v6, %v3337_v51  ;;  %v3502_v15 = vmul.f32 %v4870_v24, %v3444_v38  ;;  %v1227_v12 = vadd.f32 %v6411_v58, %v7153_v0  ;;  %v7163_v6 = vld [vmem:[#allocation50_spill] sm:$0xff] }
 0x56d   : > { %v3682_v62 = vsel %vm3638_vm6, %v3628_v36, 0.0  ;;  %v3267_v49 = vpop.permute.xlu1 %3266  ;;  %v1865_v4 = vadd.f32 %v7154_v41, %v1545_v37  ;;  %v2349_v42 = vmul.f32 %v4866_v13, %v7155_v48  ;;  %v2380_v50 = vadd.f32 %v2348_v61, %v2184_v30 }
 0x56e   : > { %v3683_v8 = vadd.f32 %v3682_v62, %v3681_v22  ;;  %vm3565_vm14 = vcmp.gt.f32.partialorder %v3533_v1, 0.0  ;;  %v3597_v34 = vmul.f32 0.2, %v3533_v1  ;;  %v3338_v33 = vadd.f32 %v3267_v49, %v3018_v32  ;;  %v3448_v43 = vpop.permute.xlu0 %3447  ;;  %v7164_v22 = vld [vmem:[#allocation192_spill] sm:$0xff]  ;;  %v7170_v62 = vld [vmem:[#allocation195_spill] sm:$0xff] }
 0x56f   : > { %v1546_v52 = vadd.f32 %v7156_v40, %v1226_v31  ;;  %v3019_v35 = vadd.f32 %v7157_v21, %v2699_v63  ;;  %v2185_v16 = vadd.f32 %v7158_v19, %v1865_v4  ;;  %v2700_v44 = vadd.f32 %v7159_v47, %v2380_v50  ;;  %v7167_v32 = vld [vmem:[#allocation88_spill] sm:$0xff]  ;;  %v7175_v19 = vld [vmem:[#allocation194_spill] sm:$0xff] }
 0x570   : > { %v3629_v59 = vsel %vm3565_vm14, %v3533_v1, %v3597_v34  ;;  %v3534_v27 = vadd.f32 %v3502_v15, %v3338_v33  ;;  %v3503_v58 = vmul.f32 %v4870_v24, %v3448_v43  ;;  %v1229_v17 = vadd.f32 %v6437_v57, %v7160_v56  ;;  %v7168_v1 = vld [vmem:[#allocation146_spill] sm:$0xff]  ;;  %v7171_v34 = vld [vmem:[#allocation116_spill] sm:$0xff] }
 0x571   : > { %v3684_v9 = vsel %vm3638_vm6, %v3629_v59, 0.0  ;;  %v3269_v2 = vpop.permute.xlu1 %3268  ;;  %v1866_v26 = vadd.f32 %v7161_v3, %v1546_v52  ;;  %v2350_v45 = vmul.f32 %v4866_v13, %v7162_v54  ;;  %v2381_v53 = vadd.f32 %v2349_v42, %v2185_v16  ;;  %v7172_v43 = vld [vmem:[#allocation176_spill] sm:$0xff]  ;;  %v7173_v52 = vld [vmem:[#allocation89_spill] sm:$0xff] }
 0x572   : > { %v3685_v5 = vadd.f32 %v3684_v9, %v3683_v8  ;;  %vm3566_vm15 = vcmp.gt.f32.partialorder %v3534_v27, 0.0  ;;  %v3598_v23 = vmul.f32 0.2, %v3534_v27  ;;  %v3339_v29 = vadd.f32 %v3269_v2, %v3019_v35  ;;  %v3452_v25 = vpop.permute.xlu0 %3451  ;;  %v7174_v35 = vld [vmem:[#allocation147_spill] sm:$0xff]  ;;  %v7176_v9 = vld [vmem:[#allocation118_spill] sm:$0xff]  ;;  %v7178_v54 = vld [vmem:[#allocation197_spill] sm:$0xff] }
 0x573   : > { %v1547_v14 = vadd.f32 %v7163_v6, %v1227_v12  ;;  %v3020_v46 = vadd.f32 %v7164_v22, %v2700_v44  ;;  %v2186_v31 = vadd.f32 %v7165_v39, %v1866_v26  ;;  %v2701_v7 = vadd.f32 %v7166_v20, %v2381_v53  ;;  %v7177_v2 = vld [vmem:[#allocation175_spill] sm:$0xff] }
 0x574   : > { %v3630_v51 = vsel %vm3566_vm15, %v3534_v27, %v3598_v23  ;;  %v3535_v38 = vadd.f32 %v3503_v58, %v3339_v29  ;;  %v3504_v57 = vmul.f32 %v4870_v24, %v3452_v25  ;;  %v2351_v28 = vmul.f32 %v4866_v13, %v7168_v1 }
 0x575   : > { %v3686_v11 = vsel %vm3638_vm6, %v3630_v51, 0.0  ;;  %v3271_v61 = vpop.permute.xlu1 %3270  ;;  %v1867_v36 = vadd.f32 %v7167_v32, %v1547_v14  ;;  %v2382_v30 = vadd.f32 %v2350_v45, %v2186_v31  ;;  %v1549_v63 = vadd.f32 %v7169_v10, %v1229_v17  ;;  %v7179_v14 = vld [vmem:[#allocation177_spill] sm:$0xff] }
 0x576   : > { %v3687_v55 = vadd.f32 %v3686_v11, %v3685_v5  ;;  %vm3567_vm0 = vcmp.gt.f32.partialorder %v3535_v38, 0.0  ;;  %v3599_v60 = vmul.f32 0.2, %v3535_v38  ;;  %v3340_v37 = vadd.f32 %v3271_v61, %v3020_v46  ;;  %v3456_v18 = vpop.permute.xlu0 %3455  ;;  %v7180_v11 = vld [vmem:[#allocation198_spill] sm:$0xff] }
 0x577   : > { %v3021_v15 = vadd.f32 %v7170_v62, %v2701_v7  ;;  %v2187_v33 = vadd.f32 %v7171_v34, %v1867_v36  ;;  %v2702_v0 = vadd.f32 %v7172_v43, %v2382_v30  ;;  %v3505_v41 = vmul.f32 %v4870_v24, %v3456_v18 }
 0x578   : > { %v3631_v49 = vsel %vm3567_vm0, %v3535_v38, %v3599_v60  ;;  %v3536_v8 = vadd.f32 %v3504_v57, %v3340_v37  ;;  %v1869_v21 = vadd.f32 %v7173_v52, %v1549_v63  ;;  %v2353_v59 = vmul.f32 %v4866_v13, %v7174_v35 }
 0x579   : > { %v3688_v12 = vsel %vm3638_vm6, %v3631_v49, 0.0  ;;  %v3273_v4 = vpop.permute.xlu1 %3272  ;;  %v2383_v27 = vadd.f32 %v2351_v28, %v2187_v33  ;;  %v3022_v16 = vadd.f32 %v7175_v19, %v2702_v0  ;;  %vm3711_vm8 = vcmask 253952  }
 0x57a   : > { %v3689_v48 = vadd.f32 %v3688_v12, %v3687_v55  ;;  %vm3568_vm1 = vcmp.gt.f32.partialorder %v3536_v8, 0.0  ;;  %v3600_v42 = vmul.f32 0.2, %v3536_v8  ;;  %v3341_v50 = vadd.f32 %v3273_v4, %v3021_v15  ;;  %v3460_v40 = vpop.permute.xlu0 %3459 }
 0x57b   : > { %v2189_v58 = vadd.f32 %v7176_v9, %v1869_v21  ;;  %v2703_v5 = vadd.f32 %v7177_v2, %v2383_v27  ;;  %v3506_v29 = vmul.f32 %v4870_v24, %v3460_v40  ;;  %v3709_v27 = vld [vmem:[%s6705_s8] sm:$0x1] }
 0x57c   : > { %v3632_v47 = vsel %vm3568_vm1, %v3536_v8, %v3600_v42  ;;  %v3537_v44 = vadd.f32 %v3505_v41, %v3341_v50  ;;  %v7181_v8 = vld [vmem:[#allocation196_spill] sm:$0xff] }
 0x57d   : > { %v3690_v23 = vsel %vm3638_vm6, %v3632_v47, 0.0  ;;  %v3275_v25 = vpop.permute.xlu1 %3274  ;;  %v2385_v13 = vadd.f32 %v2353_v59, %v2189_v58  ;;  %v3023_v45 = vadd.f32 %v7178_v54, %v2703_v5 }
 0x57e   : > { %v3691_v56 = vadd.f32 %v3690_v23, %v3689_v48  ;;  %vm3569_vm2 = vcmp.gt.f32.partialorder %v3537_v44, 0.0  ;;  %v3601_v17 = vmul.f32 0.2, %v3537_v44  ;;  %v3342_v3 = vadd.f32 %v3275_v25, %v3022_v16  ;;  %v3464_v26 = vpop.permute.xlu0 %3463 }
 0x57f   : > { %v2705_v22 = vadd.f32 %v7179_v14, %v2385_v13  ;;  %v3507_v51 = vmul.f32 %v4870_v24, %v3464_v26 }
 0x580   : > { %v3633_v53 = vsel %vm3569_vm2, %v3537_v44, %v3601_v17  ;;  %v3538_v6 = vadd.f32 %v3506_v29, %v3342_v3  ;;  %v3715_v44 = vld [vmem:[#allocation2] sm:$0x1] }
 0x581   : > { %v3692_v46 = vsel %vm3638_vm6, %v3633_v53, 0.0  ;;  %v3277_v38 = vpop.permute.xlu1 %3276  ;;  %v3025_v57 = vadd.f32 %v7180_v11, %v2705_v22 }
 0x582   : > { %v3693_v39 = vadd.f32 %v3692_v46, %v3691_v56  ;;  %vm3570_vm3 = vcmp.gt.f32.partialorder %v3538_v6, 0.0  ;;  %v3602_v31 = vmul.f32 0.2, %v3538_v6  ;;  %v3343_v20 = vadd.f32 %v3277_v38, %v3023_v45  ;;  %v3468_v7 = vpop.permute.xlu0 %3467 }
 0x583   : > { %v3508_v49 = vmul.f32 %v4870_v24, %v3468_v7 }
 0x584   : > { %v3634_v61 = vsel %vm3570_vm3, %v3538_v6, %v3602_v31  ;;  %v3539_v55 = vadd.f32 %v3507_v51, %v3343_v20 }
 0x585   : > { %v3694_v60 = vsel %vm3638_vm6, %v3634_v61, 0.0  ;;  %v3281_v37 = vpop.permute.xlu1 %3280 }
 0x586   : > { %v3695_v18 = vadd.f32 %v3694_v60, %v3693_v39  ;;  %vm3571_vm4 = vcmp.gt.f32.partialorder %v3539_v55, 0.0  ;;  %v3603_v32 = vmul.f32 0.2, %v3539_v55  ;;  %v3345_v36 = vadd.f32 %v3281_v37, %v3025_v57  ;;  %v3472_v1 = vpop.permute.xlu0 %3471 }
 0x587   : > { %v3509_v28 = vmul.f32 %v4870_v24, %v3472_v1 }
 0x588   : > { %v3635_v30 = vsel %vm3571_vm4, %v3539_v55, %v3603_v32 }
 0x589   : > { %v3696_v10 = vsel %vm3638_vm6, %v3635_v30, 0.0  ;;  %v3541_v63 = vadd.f32 %v3509_v28, %v3345_v36 }
 0x58a   : > { %v3697_v62 = vadd.f32 %v3696_v10, %v3695_v18  ;;  %v3279_v15 = vpop.permute.xlu0 %3278 }
 0x58b   : > { %v3344_v34 = vadd.f32 %v3279_v15, %v7181_v8  ;;  %v3605_v33 = vmul.f32 0.2, %v3541_v63  ;;  %vm3573_vm5 = vcmp.gt.f32.partialorder %v3541_v63, 0.0 }
 0x58d   : > { %v3540_v43 = vadd.f32 %v3508_v49, %v3344_v34  ;;  %v3637_v12 = vsel %vm3573_vm5, %v3541_v63, %v3605_v33 }
 0x58e   : > { %v3700_v42 = vsel %vm3638_vm6, %v3637_v12, 0.0 }
 0x58f   : > { %vm3572_vm7 = vcmp.gt.f32.partialorder %v3540_v43, 0.0  ;;  %v3604_v0 = vmul.f32 0.2, %v3540_v43 }
 0x591   : > { %v3636_v41 = vsel %vm3572_vm7, %v3540_v43, %v3604_v0 }
 0x592   : > { %v3698_v4 = vsel %vm3638_vm6, %v3636_v41, 0.0  ;;  %vm3717_vm6 = vcmask 0  }
 0x593   : > { %v3699_v48 = vadd.f32 %v3698_v4, %v3697_v62 }
 0x595   : > { %v3701_v50 = vadd.f32 %v3700_v42, %v3699_v48 }
 0x597   : > { %v3702_v40 = vrot.slane %v3701_v50, 4 }
 0x599   : > { %v3703_v52 = vadd.f32 %v3702_v40, %v3701_v50 }
 0x59b   : > { %v3704_v21 = vrot.slane %v3703_v52, 2 }
 0x59d   : > { %v3705_v24 = vadd.f32 %v3704_v21, %v3703_v52 }
 0x59f   : > { %v3706_v35 = vrot.slane %v3705_v24, 1 }
 0x5a1   : > { %v3707_v59 = vadd.f32 %v3706_v35, %v3705_v24 }
 0x5a3   : > { %v3708_v19 = vmul.f32 0.00390625, %v3707_v59 }
 0x5a5   : > { %v3710_v16 = vmul.f32 %v3709_v27, %v3708_v19 }
 0x5a7   : > { %v3712_v47 = vsel %vm3711_vm8, %v3710_v16, 0.0 }
 0x5a8   : > { %3713 = vadd.xlane.f32.xlu0 %v3712_v47 }
 0x631   : > { %v3714_v9 = vpop.xlane.xlu0 %3713 }
 0x632   : > { %v3716_v58 = vadd.f32 %v3715_v44, %v3714_v9 }
 0x634   : > { %3718 = vst.msk [vmem:[%s373_s16] sm:$0x1] %vm3717_vm6, %v3716_v58 }
 0x635 PF: > { %s22_s15 = sadd.s32 1, %s4050_s15  }
 0x636   : > { %p19_p5 = scmp.ge.s32.totalorder %s22_s15, 4  }
 0x638   :  { %21 = sbr.rel (!%p19_p5) target bundleno = 3 (0x3), region = 93 }

</bundles_post_ra>
